<compile_context>
chip_gen: v7x
topology: tpu7x:2x2x1
jax: 0.10.0
libtpu: 0.0.40
codegen_flags: <defaults>
</compile_context>

<pallas_src>
import functools

import jax
import jax.numpy as jnp
from jax import lax
from jax.experimental import pallas as pl
from jax.experimental.pallas import tpu as pltpu

LANE = 128


def _round_up(c, m=LANE):
    return ((c + m - 1) // m) * m


# -----------------------------------------------------------------------------
# Fused bottleneck kernel (one grid step = one batch image, NHWC, lane-padded)
# -----------------------------------------------------------------------------
def _bottleneck_kernel(x_ref, w1_ref, w2_ref, w3_ref,
                       s1_ref, b1_ref, s2_ref, b2_ref, s3_ref, b3_ref,
                       o_ref, y1_ref, *, H, W, Cp, Wp, Cop):
    # --- conv1 (1x1) + bn1 + relu  (matmul over channels) --------------------
    x2d = x_ref[0].reshape(H * W, Cp)                                   # bf16
    a1 = jnp.dot(x2d, w1_ref[...], preferred_element_type=jnp.float32)  # f32
    y1 = jnp.maximum(a1 * s1_ref[...] + b1_ref[...], 0.0)               # (H*W, Wp)

    # Zero-padded y1 (halo for the 3x3 conv) kept entirely in VMEM scratch.
    y1_ref[...] = jnp.zeros(y1_ref.shape, y1_ref.dtype)
    y1_ref[1:H + 1, 1:W + 1, :] = y1.reshape(H, W, Wp).astype(y1_ref.dtype)

    # --- conv2 (3x3, pad=1, stride=1) + bn2 + relu ----------------------------
    # im2col: 9 shifted taps concatenated on the lane axis -> one MXU pass
    # with K = 9*Wp (lane-dense, each tap a full multiple of 128 lanes).
    taps = []
    for ky in range(3):
        for kx in range(3):
            taps.append(y1_ref[ky:ky + H, kx:kx + W, :].reshape(H * W, Wp))
    patches = jnp.concatenate(taps, axis=1)                             # (H*W, 9*Wp) bf16
    a2 = jnp.dot(patches, w2_ref[...], preferred_element_type=jnp.float32)
    y2 = jnp.maximum(a2 * s2_ref[...] + b2_ref[...], 0.0).astype(jnp.bfloat16)

    # --- conv3 (1x1) + bn3 + residual add + relu ------------------------------
    a3 = jnp.dot(y2, w3_ref[...], preferred_element_type=jnp.float32)
    identity = x2d.astype(jnp.float32)        # downsample=None: Cin == 4*out_channel
    y3 = jnp.maximum(a3 * s3_ref[...] + b3_ref[...] + identity, 0.0)
    o_ref[0] = y3.reshape(H, W, Cop).astype(o_ref.dtype)


# -----------------------------------------------------------------------------
# Parameter setup / folding (plain JAX glue)
# -----------------------------------------------------------------------------
def init_params(key, in_channel, out_channel):
    """Deterministic synthetic parameters matching the PyTorch module shapes."""
    expansion = 4
    width = out_channel  # groups=1, width_per_group=64
    out_c = out_channel * expansion
    ks = jax.random.split(key, 9)
    params = {
        # PyTorch OIHW conv weights
        "conv1_w": jax.random.normal(ks[0], (width, in_channel, 1, 1), jnp.float32) * 0.1,
        "conv2_w": jax.random.normal(ks[1], (width, width, 3, 3), jnp.float32) * 0.1,
        "conv3_w": jax.random.normal(ks[2], (out_c, width, 1, 1), jnp.float32) * 0.1,
        # BN parameters (gamma, beta, running_mean, running_var) - eval mode
        "bn1": (jax.random.uniform(ks[3], (width,), jnp.float32, 0.5, 1.5),
                jax.random.normal(ks[4], (width,)) * 0.1,
                jnp.zeros((width,), jnp.float32),
                jnp.ones((width,), jnp.float32)),
        "bn2": (jax.random.uniform(ks[5], (width,), jnp.float32, 0.5, 1.5),
                jax.random.normal(ks[6], (width,)) * 0.1,
                jnp.zeros((width,), jnp.float32),
                jnp.ones((width,), jnp.float32)),
        "bn3": (jax.random.uniform(ks[7], (out_c,), jnp.float32, 0.5, 1.5),
                jax.random.normal(ks[8], (out_c,)) * 0.1,
                jnp.zeros((out_c,), jnp.float32),
                jnp.ones((out_c,), jnp.float32)),
    }
    return params


def _fold_bn_padded(bn, cpad, eps=1e-5):
    gamma, beta, mean, var = bn
    s = gamma / jnp.sqrt(var + eps)
    b = beta - mean * s
    s = jnp.pad(s, (0, cpad - s.shape[0])).reshape(1, cpad).astype(jnp.float32)
    b = jnp.pad(b, (0, cpad - b.shape[0])).reshape(1, cpad).astype(jnp.float32)
    return s, b


def bottleneck_forward(x_nchw, params, stride=1):
    """Fused Pallas implementation of Bottleneck.forward (downsample=None)."""
    N, Cin, H, W = x_nchw.shape
    conv1_w, conv2_w, conv3_w = params["conv1_w"], params["conv2_w"], params["conv3_w"]
    width = conv1_w.shape[0]
    out_c = conv3_w.shape[0]

    # downsample=None -> identity add requires these (as in the PyTorch module).
    assert stride == 1 and Cin == out_c, \
        "downsample=None requires stride==1 and in_channel == 4*out_channel"
    # TODO(synk): stride>1 / downsample branch of Bottleneck not implemented.

    Cp, Wp, Cop = _round_up(Cin), _round_up(width), _round_up(out_c)

    # Fold BN (eval semantics) into lane-padded scale/bias.
    s1, b1 = _fold_bn_padded(params["bn1"], Wp)
    s2, b2 = _fold_bn_padded(params["bn2"], Wp)
    s3, b3 = _fold_bn_padded(params["bn3"], Cop)

    # Weights: OIHW -> matmul layouts, zero-padded to lane-dense shapes, bf16.
    w1 = jnp.pad(jnp.transpose(conv1_w[:, :, 0, 0], (1, 0)),
                 ((0, Cp - Cin), (0, Wp - width))).astype(jnp.bfloat16)          # (Cp, Wp)
    w2 = jnp.pad(jnp.transpose(conv2_w, (2, 3, 1, 0)),
                 ((0, 0), (0, 0), (0, Wp - width), (0, Wp - width)))
    w2 = w2.reshape(9 * Wp, Wp).astype(jnp.bfloat16)                             # (9*Wp, Wp)
    w3 = jnp.pad(jnp.transpose(conv3_w[:, :, 0, 0], (1, 0)),
                 ((0, Wp - width), (0, Cop - out_c))).astype(jnp.bfloat16)        # (Wp, Cop)

    # NCHW -> NHWC, channels padded to 128 lanes, bf16 matmul operand.
    x_nhwc = jnp.transpose(x_nchw, (0, 2, 3, 1))
    x_p = jnp.pad(x_nhwc, ((0, 0), (0, 0), (0, 0), (0, Cp - Cin))).astype(jnp.bfloat16)

    kernel = functools.partial(_bottleneck_kernel, H=H, W=W, Cp=Cp, Wp=Wp, Cop=Cop)

    out_p = pl.pallas_call(
        kernel,
        out_shape=jax.ShapeDtypeStruct((N, H, W, Cop), jnp.float32),
        grid_spec=pltpu.PrefetchScalarGridSpec(
            num_scalar_prefetch=0,
            grid=(N,),
            in_specs=[
                pl.BlockSpec((1, H, W, Cp), lambda n: (n, 0, 0, 0)),   # x
                pl.BlockSpec((Cp, Wp), lambda n: (0, 0)),              # w1
                pl.BlockSpec((9 * Wp, Wp), lambda n: (0, 0)),          # w2 (im2col)
                pl.BlockSpec((Wp, Cop), lambda n: (0, 0)),             # w3
                pl.BlockSpec((1, Wp), lambda n: (0, 0)),               # s1
                pl.BlockSpec((1, Wp), lambda n: (0, 0)),               # b1
                pl.BlockSpec((1, Wp), lambda n: (0, 0)),               # s2
                pl.BlockSpec((1, Wp), lambda n: (0, 0)),               # b2
                pl.BlockSpec((1, Cop), lambda n: (0, 0)),              # s3
                pl.BlockSpec((1, Cop), lambda n: (0, 0)),              # b3
            ],
            out_specs=pl.BlockSpec((1, H, W, Cop), lambda n: (n, 0, 0, 0)),
            scratch_shapes=[pltpu.VMEM((H + 2, W + 2, Wp), jnp.bfloat16)],  # padded y1
        ),
        compiler_params=pltpu.CompilerParams(
            dimension_semantics=("parallel",),
            vmem_limit_bytes=32 * 1024 * 1024,
        ),
    )(x_p, w1, w2, w3, s1, b1, s2, b2, s3, b3)

    out = out_p[..., :out_c]                      # drop lane padding (fused with transpose)
    return jnp.transpose(out, (0, 3, 1, 2))       # back to NCHW


# -----------------------------------------------------------------------------
# Pure-JAX f32 reference (mirrors PyTorch NCHW convs) for verification
# -----------------------------------------------------------------------------
def bottleneck_reference(x_nchw, params, stride=1):
    def bn(y, gamma, beta, mean, var, eps=1e-5):
        g = gamma.reshape(1, -1, 1, 1)
        b = beta.reshape(1, -1, 1, 1)
        m = mean.reshape(1, -1, 1, 1)
        v = var.reshape(1, -1, 1, 1)
        return (y - m) / jnp.sqrt(v + eps) * g + b

    dn = lax.conv_dimension_numbers(x_nchw.shape, params["conv1_w"].shape,
                                    ("NCHW", "OIHW", "NCHW"))
    y = lax.conv_general_dilated(x_nchw, params["conv1_w"], (1, 1), "VALID",
                                 dimension_numbers=dn)
    y = jnp.maximum(bn(y, *params["bn1"]), 0.0)
    dn2 = lax.conv_dimension_numbers(y.shape, params["conv2_w"].shape,
                                     ("NCHW", "OIHW", "NCHW"))
    y = lax.conv_general_dilated(y, params["conv2_w"], (stride, stride),
                                 ((1, 1), (1, 1)), dimension_numbers=dn2)
    y = jnp.maximum(bn(y, *params["bn2"]), 0.0)
    dn3 = lax.conv_dimension_numbers(y.shape, params["conv3_w"].shape,
                                     ("NCHW", "OIHW", "NCHW"))
    y = lax.conv_general_dilated(y, params["conv3_w"], (1, 1), "VALID",
                                 dimension_numbers=dn3)
    y = bn(y, *params["bn3"]) + x_nchw
    return jnp.maximum(y, 0.0)


if __name__ == "__main__":
    key = jax.random.PRNGKey(0)
    kx, kp = jax.random.split(key)

    # Shapes consistent with the module (downsample=None): out_channel=4 ->
    # width=4, output channels=16, identity path requires in_channel=16.
    N, in_channel, H, W = 2, 16, 16, 16
    out_channel = 4
    stride = 1

    x = jax.random.normal(kx, (N, in_channel, H, W), jnp.float32)
    params = init_params(kp, in_channel, out_channel)

    out = jax.block_until_ready(bottleneck_forward(x, params, stride=stride))
    ref = bottleneck_reference(x, params, stride=stride)

    assert out.shape == ref.shape == (N, out_channel * 4, H, W)
    err = float(jnp.max(jnp.abs(out - ref)))
    # bf16 MXU operands with f32 accumulation -> small rounding vs f32 reference.
    assert err < 5e-2, f"max abs err {err}"

    print("KERNEL_OK")
</pallas_src>

<mosaic_0001>
module attributes {stable_mosaic.version = 11 : i64} {
  func.func @_bottleneck_kernel(%arg0: i32, %arg1: memref<1x16x16x128xbf16, #tpu.memory_space<vmem>>, %arg2: memref<128x128xbf16, #tpu.memory_space<vmem>>, %arg3: memref<1152x128xbf16, #tpu.memory_space<vmem>>, %arg4: memref<128x128xbf16, #tpu.memory_space<vmem>>, %arg5: memref<1x128xf32, #tpu.memory_space<vmem>>, %arg6: memref<1x128xf32, #tpu.memory_space<vmem>>, %arg7: memref<1x128xf32, #tpu.memory_space<vmem>>, %arg8: memref<1x128xf32, #tpu.memory_space<vmem>>, %arg9: memref<1x128xf32, #tpu.memory_space<vmem>>, %arg10: memref<1x128xf32, #tpu.memory_space<vmem>>, %arg11: memref<1x16x16x128xf32, #tpu.memory_space<vmem>>, %arg12: memref<18x18x128xbf16, #tpu.memory_space<vmem>>) attributes {dimension_semantics = [#tpu.dimension_semantics<parallel>], iteration_bounds = array<i64: 2>, scalar_prefetch = 0 : i64, scratch_operands = 1 : i64, tpu.core_type = #tpu.core_type<tc>, window_params = [{transform_indices = @transform_0, window_bounds = array<i64: 1, 16, 16, 128>}, {pipeline_mode = #tpu.pipeline_mode<synchronous>, transform_indices = @transform_1, window_bounds = array<i64: 128, 128>}, {pipeline_mode = #tpu.pipeline_mode<synchronous>, transform_indices = @transform_2, window_bounds = array<i64: 1152, 128>}, {pipeline_mode = #tpu.pipeline_mode<synchronous>, transform_indices = @transform_3, window_bounds = array<i64: 128, 128>}, {pipeline_mode = #tpu.pipeline_mode<synchronous>, transform_indices = @transform_4, window_bounds = array<i64: 1, 128>}, {pipeline_mode = #tpu.pipeline_mode<synchronous>, transform_indices = @transform_5, window_bounds = array<i64: 1, 128>}, {pipeline_mode = #tpu.pipeline_mode<synchronous>, transform_indices = @transform_6, window_bounds = array<i64: 1, 128>}, {pipeline_mode = #tpu.pipeline_mode<synchronous>, transform_indices = @transform_7, window_bounds = array<i64: 1, 128>}, {pipeline_mode = #tpu.pipeline_mode<synchronous>, transform_indices = @transform_8, window_bounds = array<i64: 1, 128>}, {pipeline_mode = #tpu.pipeline_mode<synchronous>, transform_indices = @transform_9, window_bounds = array<i64: 1, 128>}, {transform_indices = @transform_10, window_bounds = array<i64: 1, 16, 16, 128>}]} {
    %c0 = arith.constant 0 : index
    %c0_0 = arith.constant 0 : index
    %c0_1 = arith.constant 0 : index
    %c0_2 = arith.constant 0 : index
    %0 = vector.load %arg1[%c0, %c0_0, %c0_1, %c0_2] : memref<1x16x16x128xbf16, #tpu.memory_space<vmem>>, vector<1x16x16x128xbf16>
    %1 = vector.shape_cast %0 : vector<1x16x16x128xbf16> to vector<16x16x128xbf16>
    %2 = vector.shape_cast %1 : vector<16x16x128xbf16> to vector<256x128xbf16>
    %c0_3 = arith.constant 0 : index
    %c0_4 = arith.constant 0 : index
    %3 = vector.load %arg2[%c0_3, %c0_4] : memref<128x128xbf16, #tpu.memory_space<vmem>>, vector<128x128xbf16>
    %cst = arith.constant dense<0.000000e+00> : vector<256x128xf32>
    %4 = tpu.matmul %2, %3, %cst {dimension_numbers = #tpu.dot_dimension_numbers<[1], [0], [0], [1], [0, 0, 1, 1], [], []>} : vector<256x128xbf16>, vector<128x128xbf16>, vector<256x128xf32> -> vector<256x128xf32>
    %c0_5 = arith.constant 0 : index
    %c0_6 = arith.constant 0 : index
    %5 = vector.load %arg5[%c0_5, %c0_6] : memref<1x128xf32, #tpu.memory_space<vmem>>, vector<1x128xf32>
    %6 = vector.broadcast %5 : vector<1x128xf32> to vector<256x128xf32>
    %7 = arith.mulf %4, %6 : vector<256x128xf32>
    %c0_7 = arith.constant 0 : index
    %c0_8 = arith.constant 0 : index
    %8 = vector.load %arg6[%c0_7, %c0_8] : memref<1x128xf32, #tpu.memory_space<vmem>>, vector<1x128xf32>
    %9 = vector.broadcast %8 : vector<1x128xf32> to vector<256x128xf32>
    %10 = arith.addf %7, %9 : vector<256x128xf32>
    %cst_9 = arith.constant 0.000000e+00 : f32
    %11 = vector.broadcast %cst_9 : f32 to vector<256x128xf32>
    %12 = arith.maximumf %10, %11 : vector<256x128xf32>
    %cst_10 = arith.constant 0.000000e+00 : bf16
    %13 = vector.broadcast %cst_10 : bf16 to vector<18x18x128xbf16>
    %c0_11 = arith.constant 0 : index
    %c0_12 = arith.constant 0 : index
    %c0_13 = arith.constant 0 : index
    %14 = vector.load %arg12[%c0_11, %c0_12, %c0_13] : memref<18x18x128xbf16, #tpu.memory_space<vmem>>, vector<18x18x128xbf16>
    tpu.vector_store %arg12[%c0_11, %c0_12, %c0_13], %13 {strides = array<i32>} : memref<18x18x128xbf16, #tpu.memory_space<vmem>>, vector<18x18x128xbf16>,
    %15 = vector.shape_cast %12 : vector<256x128xf32> to vector<16x16x128xf32>
    %16 = arith.truncf %15 : vector<16x16x128xf32> to vector<16x16x128xbf16>
    %c1 = arith.constant 1 : index
    %c1_14 = arith.constant 1 : index
    %c0_15 = arith.constant 0 : index
    %17 = vector.load %arg12[%c1, %c1_14, %c0_15] : memref<18x18x128xbf16, #tpu.memory_space<vmem>>, vector<16x16x128xbf16>
    tpu.vector_store %arg12[%c1, %c1_14, %c0_15], %16 {strides = array<i32>} : memref<18x18x128xbf16, #tpu.memory_space<vmem>>, vector<16x16x128xbf16>,
    %c0_16 = arith.constant 0 : index
    %c0_17 = arith.constant 0 : index
    %c0_18 = arith.constant 0 : index
    %18 = vector.load %arg12[%c0_16, %c0_17, %c0_18] : memref<18x18x128xbf16, #tpu.memory_space<vmem>>, vector<16x16x128xbf16>
    %19 = vector.shape_cast %18 : vector<16x16x128xbf16> to vector<256x128xbf16>
    %c0_19 = arith.constant 0 : index
    %c1_20 = arith.constant 1 : index
    %c0_21 = arith.constant 0 : index
    %20 = vector.load %arg12[%c0_19, %c1_20, %c0_21] : memref<18x18x128xbf16, #tpu.memory_space<vmem>>, vector<16x16x128xbf16>
    %21 = vector.shape_cast %20 : vector<16x16x128xbf16> to vector<256x128xbf16>
    %c0_22 = arith.constant 0 : index
    %c2 = arith.constant 2 : index
    %c0_23 = arith.constant 0 : index
    %22 = vector.load %arg12[%c0_22, %c2, %c0_23] : memref<18x18x128xbf16, #tpu.memory_space<vmem>>, vector<16x16x128xbf16>
    %23 = vector.shape_cast %22 : vector<16x16x128xbf16> to vector<256x128xbf16>
    %c1_24 = arith.constant 1 : index
    %c0_25 = arith.constant 0 : index
    %c0_26 = arith.constant 0 : index
    %24 = vector.load %arg12[%c1_24, %c0_25, %c0_26] : memref<18x18x128xbf16, #tpu.memory_space<vmem>>, vector<16x16x128xbf16>
    %25 = vector.shape_cast %24 : vector<16x16x128xbf16> to vector<256x128xbf16>
    %c1_27 = arith.constant 1 : index
    %c1_28 = arith.constant 1 : index
    %c0_29 = arith.constant 0 : index
    %26 = vector.load %arg12[%c1_27, %c1_28, %c0_29] : memref<18x18x128xbf16, #tpu.memory_space<vmem>>, vector<16x16x128xbf16>
    %27 = vector.shape_cast %26 : vector<16x16x128xbf16> to vector<256x128xbf16>
    %c1_30 = arith.constant 1 : index
    %c2_31 = arith.constant 2 : index
    %c0_32 = arith.constant 0 : index
    %28 = vector.load %arg12[%c1_30, %c2_31, %c0_32] : memref<18x18x128xbf16, #tpu.memory_space<vmem>>, vector<16x16x128xbf16>
    %29 = vector.shape_cast %28 : vector<16x16x128xbf16> to vector<256x128xbf16>
    %c2_33 = arith.constant 2 : index
    %c0_34 = arith.constant 0 : index
    %c0_35 = arith.constant 0 : index
    %30 = vector.load %arg12[%c2_33, %c0_34, %c0_35] : memref<18x18x128xbf16, #tpu.memory_space<vmem>>, vector<16x16x128xbf16>
    %31 = vector.shape_cast %30 : vector<16x16x128xbf16> to vector<256x128xbf16>
    %c2_36 = arith.constant 2 : index
    %c1_37 = arith.constant 1 : index
    %c0_38 = arith.constant 0 : index
    %32 = vector.load %arg12[%c2_36, %c1_37, %c0_38] : memref<18x18x128xbf16, #tpu.memory_space<vmem>>, vector<16x16x128xbf16>
    %33 = vector.shape_cast %32 : vector<16x16x128xbf16> to vector<256x128xbf16>
    %c2_39 = arith.constant 2 : index
    %c2_40 = arith.constant 2 : index
    %c0_41 = arith.constant 0 : index
    %34 = vector.load %arg12[%c2_39, %c2_40, %c0_41] : memref<18x18x128xbf16, #tpu.memory_space<vmem>>, vector<16x16x128xbf16>
    %35 = vector.shape_cast %34 : vector<16x16x128xbf16> to vector<256x128xbf16>
    %36 = tpu.concatenate %19, %21, %23, %25, %27, %29, %31, %33, %35 in 1 : vector<256x128xbf16>, vector<256x128xbf16>, vector<256x128xbf16>, vector<256x128xbf16>, vector<256x128xbf16>, vector<256x128xbf16>, vector<256x128xbf16>, vector<256x128xbf16>, vector<256x128xbf16> -> vector<256x1152xbf16>
    %c0_42 = arith.constant 0 : index
    %c0_43 = arith.constant 0 : index
    %37 = vector.load %arg3[%c0_42, %c0_43] : memref<1152x128xbf16, #tpu.memory_space<vmem>>, vector<1152x128xbf16>
    %cst_44 = arith.constant dense<0.000000e+00> : vector<256x128xf32>
    %38 = tpu.matmul %36, %37, %cst_44 {dimension_numbers = #tpu.dot_dimension_numbers<[1], [0], [0], [1], [0, 0, 1, 1], [], []>} : vector<256x1152xbf16>, vector<1152x128xbf16>, vector<256x128xf32> -> vector<256x128xf32>
    %c0_45 = arith.constant 0 : index
    %c0_46 = arith.constant 0 : index
    %39 = vector.load %arg7[%c0_45, %c0_46] : memref<1x128xf32, #tpu.memory_space<vmem>>, vector<1x128xf32>
    %40 = vector.broadcast %39 : vector<1x128xf32> to vector<256x128xf32>
    %41 = arith.mulf %38, %40 : vector<256x128xf32>
    %c0_47 = arith.constant 0 : index
    %c0_48 = arith.constant 0 : index
    %42 = vector.load %arg8[%c0_47, %c0_48] : memref<1x128xf32, #tpu.memory_space<vmem>>, vector<1x128xf32>
    %43 = vector.broadcast %42 : vector<1x128xf32> to vector<256x128xf32>
    %44 = arith.addf %41, %43 : vector<256x128xf32>
    %cst_49 = arith.constant 0.000000e+00 : f32
    %45 = vector.broadcast %cst_49 : f32 to vector<256x128xf32>
    %46 = arith.maximumf %44, %45 : vector<256x128xf32>
    %47 = arith.truncf %46 : vector<256x128xf32> to vector<256x128xbf16>
    %c0_50 = arith.constant 0 : index
    %c0_51 = arith.constant 0 : index
    %48 = vector.load %arg4[%c0_50, %c0_51] : memref<128x128xbf16, #tpu.memory_space<vmem>>, vector<128x128xbf16>
    %cst_52 = arith.constant dense<0.000000e+00> : vector<256x128xf32>
    %49 = tpu.matmul %47, %48, %cst_52 {dimension_numbers = #tpu.dot_dimension_numbers<[1], [0], [0], [1], [0, 0, 1, 1], [], []>} : vector<256x128xbf16>, vector<128x128xbf16>, vector<256x128xf32> -> vector<256x128xf32>
    %50 = arith.extf %2 : vector<256x128xbf16> to vector<256x128xf32>
    %c0_53 = arith.constant 0 : index
    %c0_54 = arith.constant 0 : index
    %51 = vector.load %arg9[%c0_53, %c0_54] : memref<1x128xf32, #tpu.memory_space<vmem>>, vector<1x128xf32>
    %52 = vector.broadcast %51 : vector<1x128xf32> to vector<256x128xf32>
    %53 = arith.mulf %49, %52 : vector<256x128xf32>
    %c0_55 = arith.constant 0 : index
    %c0_56 = arith.constant 0 : index
    %54 = vector.load %arg10[%c0_55, %c0_56] : memref<1x128xf32, #tpu.memory_space<vmem>>, vector<1x128xf32>
    %55 = vector.broadcast %54 : vector<1x128xf32> to vector<256x128xf32>
    %56 = arith.addf %53, %55 : vector<256x128xf32>
    %57 = arith.addf %56, %50 : vector<256x128xf32>
    %cst_57 = arith.constant 0.000000e+00 : f32
    %58 = vector.broadcast %cst_57 : f32 to vector<256x128xf32>
    %59 = arith.maximumf %57, %58 : vector<256x128xf32>
    %60 = vector.shape_cast %59 : vector<256x128xf32> to vector<16x16x128xf32>
    %c0_58 = arith.constant 0 : index
    %c0_59 = arith.constant 0 : index
    %c0_60 = arith.constant 0 : index
    %c0_61 = arith.constant 0 : index
    %61 = vector.load %arg11[%c0_58, %c0_59, %c0_60, %c0_61] : memref<1x16x16x128xf32, #tpu.memory_space<vmem>>, vector<1x16x16x128xf32>
    %62 = vector.shape_cast %61 : vector<1x16x16x128xf32> to vector<16x16x128xf32>
    %63 = vector.shape_cast %60 : vector<16x16x128xf32> to vector<1x16x16x128xf32>
    tpu.vector_store %arg11[%c0_58, %c0_59, %c0_60, %c0_61], %63 {strides = array<i32>} : memref<1x16x16x128xf32, #tpu.memory_space<vmem>>, vector<1x16x16x128xf32>,
    return
  }
  func.func @transform_0(%arg0: i32) -> (i32, i32, i32, i32) {
    %c0_i32 = arith.constant 0 : i32
    %c0_i32_0 = arith.constant 0 : i32
    %c0_i32_1 = arith.constant 0 : i32
    %c0_i32_2 = arith.constant 0 : i32
    return %arg0, %c0_i32, %c0_i32_0, %c0_i32_1 : i32, i32, i32, i32
  }
  func.func @transform_1(%arg0: i32) -> (i32, i32) {
    %c0_i32 = arith.constant 0 : i32
    %c0_i32_0 = arith.constant 0 : i32
    %c0_i32_1 = arith.constant 0 : i32
    return %c0_i32, %c0_i32_0 : i32, i32
  }
  func.func @transform_2(%arg0: i32) -> (i32, i32) {
    %c0_i32 = arith.constant 0 : i32
    %c0_i32_0 = arith.constant 0 : i32
    %c0_i32_1 = arith.constant 0 : i32
    return %c0_i32, %c0_i32_0 : i32, i32
  }
  func.func @transform_3(%arg0: i32) -> (i32, i32) {
    %c0_i32 = arith.constant 0 : i32
    %c0_i32_0 = arith.constant 0 : i32
    %c0_i32_1 = arith.constant 0 : i32
    return %c0_i32, %c0_i32_0 : i32, i32
  }
  func.func @transform_4(%arg0: i32) -> (i32, i32) {
    %c0_i32 = arith.constant 0 : i32
    %c0_i32_0 = arith.constant 0 : i32
    %c0_i32_1 = arith.constant 0 : i32
    return %c0_i32, %c0_i32_0 : i32, i32
  }
  func.func @transform_5(%arg0: i32) -> (i32, i32) {
    %c0_i32 = arith.constant 0 : i32
    %c0_i32_0 = arith.constant 0 : i32
    %c0_i32_1 = arith.constant 0 : i32
    return %c0_i32, %c0_i32_0 : i32, i32
  }
  func.func @transform_6(%arg0: i32) -> (i32, i32) {
    %c0_i32 = arith.constant 0 : i32
    %c0_i32_0 = arith.constant 0 : i32
    %c0_i32_1 = arith.constant 0 : i32
    return %c0_i32, %c0_i32_0 : i32, i32
  }
  func.func @transform_7(%arg0: i32) -> (i32, i32) {
    %c0_i32 = arith.constant 0 : i32
    %c0_i32_0 = arith.constant 0 : i32
    %c0_i32_1 = arith.constant 0 : i32
    return %c0_i32, %c0_i32_0 : i32, i32
  }
  func.func @transform_8(%arg0: i32) -> (i32, i32) {
    %c0_i32 = arith.constant 0 : i32
    %c0_i32_0 = arith.constant 0 : i32
    %c0_i32_1 = arith.constant 0 : i32
    return %c0_i32, %c0_i32_0 : i32, i32
  }
  func.func @transform_9(%arg0: i32) -> (i32, i32) {
    %c0_i32 = arith.constant 0 : i32
    %c0_i32_0 = arith.constant 0 : i32
    %c0_i32_1 = arith.constant 0 : i32
    return %c0_i32, %c0_i32_0 : i32, i32
  }
  func.func @transform_10(%arg0: i32) -> (i32, i32, i32, i32) {
    %c0_i32 = arith.constant 0 : i32
    %c0_i32_0 = arith.constant 0 : i32
    %c0_i32_1 = arith.constant 0 : i32
    %c0_i32_2 = arith.constant 0 : i32
    return %arg0, %c0_i32, %c0_i32_0, %c0_i32_1 : i32, i32, i32, i32
  }
}

</mosaic_0001>

<bundles_post_ra>
// kernel: tpu_custom_call.1
= control target key start
LH: loop header
LB: loop body
LE: loop exit
PB: predicated region body
PF: predicated region fallthrough
CT: control target
= control target key end

     0   :  { %s9916_s0 = inlined_call_operand.hbm [shape: bf16[2,16,16,128], index: 0, kind: input, shape index: {}]   ;;  %s9917_s1 = inlined_call_operand.hbm [shape: bf16[128,128], index: 1, kind: input, shape index: {}]   ;;  %s9918_s2 = inlined_call_operand.hbm [shape: bf16[1152,128], index: 2, kind: input, shape index: {}]   ;;  %s9919_s3 = inlined_call_operand.hbm [shape: bf16[128,128], index: 3, kind: input, shape index: {}]   ;;  %s9920_s4 = inlined_call_operand.vmem [shape: f32[1,128], index: 4, kind: input, shape index: {}]   ;;  %s9921_s5 = inlined_call_operand.vmem [shape: f32[1,128], index: 5, kind: input, shape index: {}]   ;;  %s9922_s6 = inlined_call_operand.vmem [shape: f32[1,128], index: 6, kind: input, shape index: {}]   ;;  %s9923_s7 = inlined_call_operand.vmem [shape: f32[1,128], index: 7, kind: input, shape index: {}]   ;;  %s9924_s8 = inlined_call_operand.vmem [shape: f32[1,128], index: 8, kind: input, shape index: {}]   ;;  %s9925_s9 = inlined_call_operand.vmem [shape: f32[1,128], index: 9, kind: input, shape index: {}]   ;;  %s9926_s10 = inlined_call_operand.hbm [shape: f32[2,16,16,128], index: 10, kind: output, shape index: {}]  }
   0x1   :  { %9949 = sst [smem:[#allocation47_spill]] %s9925_s9 }
   0x2   :  { %9950 = sst [smem:[#allocation48_spill]] %s9926_s10 }
   0x3   :  { %15 = vsyncpa [#allocation4], 0 }
   0x4   :  { %17 = vsyncpa [#allocation4 + $0x1], 0 }
   0x5   :  { %18 = vsyncpa [#allocation7], 0 }
   0x6   :  { %19 = vsyncpa [#allocation10], 0 }
   0x7   :  { %20 = vsyncpa [#allocation5], 0 }
   0x8   :  { %22 = vsyncpa [#allocation5 + $0x1], 0  ;;  %s7618_s13 = smov 0   ;;  %s7620_s14 = smov 0  }
   0x9   :  { %s7622_s15 = smov 0   ;;  %s7624_s16 = smov 0  }
   0xa LB: > { %9951 = sst [smem:[#allocation16_spill]] %s7539_s13  ;;  %s7639_s17 = sadd.s32 4294967295, %s7551_s16   ;;  %s7551_s16 = sphi %s7624_s16, %s10104_s16   ;;  %s7547_s15 = sphi %s7622_s15, %s10103_s15   ;;  %s7543_s14 = sphi %s7620_s14, %s10102_s14   ;;  %s7539_s13 = sphi %s7618_s13, %s10101_s13  }
   0xb   : > { %s5986_s18 = sadd.s32 4294967294, %s7551_s16   ;;  %p48_p0 = scmp.ne.s32.totalorder %s7543_s14, %s7539_s13 }
   0xc   : > { %p9927_p1 = scmp.eq.s32.totalorder %s7639_s17, 0  ;;  %p267_p3 = scmp.eq.s32.totalorder %s5986_s18, 1 }
   0xd   : > { %p5987_p5 = scmp.ge.s32.totalorder %s7551_s16, 1  ;;  %p274_p7 = scmp.lt.s32.totalorder %s7551_s16, 3 }
   0xe   : > { %p7648_p4 = por %p9927_p1, %p48_p0  ;;  %p7653_p6 = por %p267_p3, %p48_p0 }
   0xf   : > { %p7658_p8 = pnand %p5987_p5, %p274_p7  ;;  %s7553_s22 = smov [#allocation6]  }
  0x10   : > { %s9952_s19 = scalar_select %p7648_p4, 1, 0 }
  0x11   : > { %s9953_s20 = scalar_select %p7653_p6, 1, 0 }
  0x12   : > { %s9955_s21 = scalar_select %p7658_p8, 1, 0 }
  0x13   : > { %9954 = sst [smem:[#allocation17_spill]] %s9953_s20  ;;  %s286_s23 = sshll.u32 %s7553_s22, 4  ;;  %s7662_s23 = int_to_ptr.vmem [resolvable:$true] %s286_s23 }
  0x14   : > { %p7070_p9 = pneg %p7658_p8  ;;  %s7554_s25 = smov [#allocation8]  }
  0x15   : > { %s299_s26 = sshll.u32 %s7554_s25, 4  ;;  %s7555_s27 = smov [#allocation9]   ;;  %s7673_s26 = int_to_ptr.vmem [resolvable:$true] %s299_s26 }
  0x16   : > { %p7669_p11 = pnand %p7070_p9, %p9927_p1  ;;  %s7675_s28 = sshll.u32 %s7555_s27, 4  ;;  %s313_s28 = int_to_ptr.vmem [resolvable:$true] %s7675_s28 }
  0x17   : > { %s7363_s11 = scalar_lea.hbm %s9917_s1, 1024 }
  0x18   : > { %p7364_p12 = scmp.ne.s32.totalorder %s9917_s1, %s7363_s11  ;;  %p7685_p13 = pneg %p7669_p11 }
  0x19   : > { %p7370_p5 = scmp.lt.u32.totalorder %s7363_s11, %s9917_s1 }
  0x1a   : > { %p7366_p0 = pnand %p7685_p13, %p7364_p12 }
  0x1c   : > { %p7367_p3 = pneg %p7366_p0 }
  0x1e   : > { %p7372_p7 = pnand %p7370_p5, %p7367_p3 }
  0x20   : > { %7375 = shalt.err (!%p7372_p7)
}
  0x21   : > { %s7376_s29 = scalar_lea.vmem %s7662_s23, 1024  ;;  %p7384_p2 = scmp.lt.s32.totalorder %s7662_s23, %s7662_s23 }
  0x22   : > { %p7377_p9 = scmp.ne.s32.totalorder %s7662_s23, %s7376_s29  ;;  %p7385_p6 = scmp.lt.s32.totalorder %s7376_s29, %s7376_s29 }
  0x24   : > { %p7379_p10 = pnand %p7377_p9, %p7685_p13  ;;  %p7386_p12 = por %p7385_p6, %p7384_p2 }
  0x26   : > { %p7380_p1 = pneg %p7379_p10 }
  0x28   : > { %p7387_p0 = pnand %p7386_p12, %p7380_p1 }
  0x2a   : > { %7390 = shalt.err (!%p7387_p0)
}
  0x2b   : > { %s7556_s30 = smov 64   ;;  %s7557_s11 = smov 4  }
  0x2c   : > { %7073 = dma.hbm_to_vmem [thread:$0]  (!%p7669_p11), %s9917_s1, 1024, %s7662_s23, [#allocation7], %s7556_s30, %s7556_s30, %s7557_s11  }
  0x2d   : > { %s7391_s29 = scalar_lea.hbm %s9918_s2, 9216 }
  0x2e   : > { %p7392_p1 = scmp.ne.s32.totalorder %s9918_s2, %s7391_s29  ;;  %p7398_p10 = scmp.lt.u32.totalorder %s7391_s29, %s9918_s2 }
  0x30   : > { %p7394_p2 = pnand %p7392_p1, %p7685_p13 }
  0x32   : > { %p7395_p6 = pneg %p7394_p2 }
  0x34   : > { %p7400_p3 = pnand %p7398_p10, %p7395_p6 }
  0x36   : > { %7403 = shalt.err (!%p7400_p3)
}
  0x37   : > { %s7404_s23 = scalar_lea.vmem %s7673_s26, 9216  ;;  %p7412_p12 = scmp.lt.s32.totalorder %s7673_s26, %s7673_s26 }
  0x38   : > { %p7405_p5 = scmp.ne.s32.totalorder %s7673_s26, %s7404_s23  ;;  %p7413_p0 = scmp.lt.s32.totalorder %s7404_s23, %s7404_s23 }
  0x3a   : > { %p7407_p7 = pnand %p7405_p5, %p7685_p13  ;;  %p7414_p1 = por %p7413_p0, %p7412_p12 }
  0x3c   : > { %p7408_p9 = pneg %p7407_p7 }
  0x3e   : > { %p7415_p2 = pnand %p7414_p1, %p7408_p9 }
  0x40   : > { %7418 = shalt.err (!%p7415_p2)
}
  0x41   : > { %7076 = dma.hbm_to_vmem [thread:$0]  (!%p7669_p11), %s9918_s2, 9216, %s7673_s26, [#allocation7], %s7556_s30, %s7556_s30, %s7557_s11  }
  0x42   : > { %s7419_s12 = scalar_lea.hbm %s9919_s3, 1024 }
  0x43   : > { %p7420_p6 = scmp.ne.s32.totalorder %s9919_s3, %s7419_s12  ;;  %p7426_p5 = scmp.lt.u32.totalorder %s7419_s12, %s9919_s3 }
  0x45   : > { %p7422_p10 = pnand %p7420_p6, %p7685_p13 }
  0x47   : > { %p7423_p3 = pneg %p7422_p10 }
  0x49   : > { %p7428_p7 = pnand %p7426_p5, %p7423_p3 }
  0x4b   : > { %7431 = shalt.err (!%p7428_p7)
}
  0x4c   : > { %s7432_s23 = scalar_lea.vmem %s313_s28, 1024  ;;  %p7440_p1 = scmp.lt.s32.totalorder %s313_s28, %s313_s28 }
  0x4d   : > { %p7433_p9 = scmp.ne.s32.totalorder %s313_s28, %s7432_s23  ;;  %p7441_p2 = scmp.lt.s32.totalorder %s7432_s23, %s7432_s23 }
  0x4f   : > { %p7435_p12 = pnand %p7433_p9, %p7685_p13  ;;  %p7442_p4 = por %p7441_p2, %p7440_p1 }
  0x51   : > { %p7436_p0 = pneg %p7435_p12 }
  0x53   : > { %p7443_p8 = pnand %p7442_p4, %p7436_p0 }
  0x55   : > { %7446 = shalt.err (!%p7443_p8)
}
  0x56   : > { %7079 = dma.hbm_to_vmem [thread:$0]  (!%p7669_p11), %s9919_s3, 1024, %s313_s28, [#allocation10], %s7556_s30, %s7556_s30, %s7557_s11  }
  0x57   : > { %s7758_s22 = sadd.s32 1, %s7551_s16   ;;  %s35_s10 = sadd.s32 1, %s7547_s15 }
  0x58   : > { %s32_s24 = ssub.s32 %s7551_s16, %s7758_s22  ;;  %p42_p8 = scmp.ne.s32.totalorder %s7547_s15, %s7543_s14 }
  0x59   : > { %p33_p4 = scmp.eq.s32.totalorder %s32_s24, 0  ;;  %p43_p13 = scmp.eq.s32.totalorder %s7551_s16, 0 }
  0x5a   : > { %p7091_p6 = scmp.lt.s32.totalorder %s7551_s16, 2  ;;  %p9958_p3 = scmp.eq.s32.totalorder %s7639_s17, 1 }
  0x5b   : > { %s7768_s13 = scalar_select %p33_p4, %s7547_s15, %s35_s10  }
  0x5c   : > { %p44_p10 = por %p43_p13, %p42_p8  ;;  %p7772_p5 = por %p9958_p3, %p42_p8 }
  0x5d   : > { %s344_s12 = sand.u32 1, %s7547_s15   ;;  %s6340_s18 = sshll.u32 %s7551_s16, 11 }
  0x5e   : > { %s5992_s28 = sshll.u32 %s344_s12, 7  ;;  %s7781_s29 = scalar_lea.hbm %s9916_s0, %s6340_s18 }
  0x5f   : > { %s348_s23 = scalar_lea.vmem [#allocation3], %s5992_s28  ;;  %p7783_p11 = pnand %p7091_p6, %p44_p10 }
  0x60   : > { %s355_s26 = sshll.u32 %s348_s23, 4  ;;  %s7789_s24 = scalar_lea.sflag [#allocation4], %s344_s12  ;;  %s7787_s26 = int_to_ptr.vmem [resolvable:$true] %s355_s26 }
  0x61   : > { %s7447_s10 = scalar_lea.hbm %s7781_s29, 2048  ;;  %p7449_p9 = pneg %p7783_p11 }
  0x62   : > { %p7448_p7 = scmp.ne.s32.totalorder %s7781_s29, %s7447_s10  ;;  %s7452_s25 = scalar_lea.hbm %s9916_s0, 4096 }
  0x63   : > { %p7453_p1 = scmp.lt.u32.totalorder %s7781_s29, %s9916_s0  ;;  %p7454_p2 = scmp.lt.u32.totalorder %s7452_s25, %s7447_s10 }
  0x64   : > { %p7450_p12 = pnand %p7449_p9, %p7448_p7  ;;  %p7456_p8 = scmp.lt.u32.totalorder %s7447_s10, %s7781_s29 }
  0x65   : > { %p7455_p4 = por %p7454_p2, %p7453_p1 }
  0x66   : > { %p7451_p0 = pneg %p7450_p12 }
  0x67   : > { %p7457_p13 = por %p7456_p8, %p7455_p4 }
  0x69   : > { %p7458_p6 = pnand %p7457_p13, %p7451_p0 }
  0x6b   : > { %7461 = shalt.err (!%p7458_p6)
}
  0x6c   : > { %s7462_s12 = scalar_lea.vmem %s7787_s26, 2048  ;;  %s7558_s18 = smov [#allocation3]  }
  0x6d   : > { %p7463_p10 = scmp.ne.s32.totalorder %s7787_s26, %s7462_s12  ;;  %s7467_s28 = sshll.u32 %s7558_s18, 4  ;;  %s7468_s28 = int_to_ptr.vmem [resolvable:$false] %s7467_s28 }
  0x6e   : > { %s7469_s27 = scalar_lea.vmem %s7468_s28, 4096  ;;  %p7470_p12 = scmp.lt.s32.totalorder %s7787_s26, %s7468_s28 }
  0x6f   : > { %p7465_p3 = pnand %p7463_p10, %p7449_p9  ;;  %p7471_p1 = scmp.lt.s32.totalorder %s7469_s27, %s7462_s12 }
  0x71   : > { %p7466_p7 = pneg %p7465_p3  ;;  %p7472_p2 = por %p7471_p1, %p7470_p12 }
  0x73   : > { %p7473_p4 = pnand %p7472_p2, %p7466_p7 }
  0x75   : > { %7476 = shalt.err (!%p7473_p4)
}
  0x76   : > { %7083 = dma.hbm_to_vmem [thread:$0]  (!%p7783_p11), %s7781_s29, 2048, %s7787_s26, %s7789_s24, %s7556_s30, %s7556_s30, %s7557_s11  }
  0x77   : > { %p9961_p9 = scmp.ne.s32.totalorder %s9955_s21, 0 }
  0x79   : > { %367 = sbr.rel (%p9961_p9) target bundleno = 1277 (0x4fd), region = 60 }
  0x80   : > { %s7823_s10 = sand.u32 1, %s7543_s14   ;;  %p9962_p0 = scmp.ne.s32.totalorder %s9952_s19, 0 }
  0x81   : > { %s5996_s25 = sshll.u32 %s7823_s10, 7  ;;  %s370_s23 = scalar_lea.sflag [#allocation4], %s7823_s10 }
  0x82   : > { %s7827_s12 = scalar_lea.vmem [#allocation3], %s5996_s25 }
  0x83   : > { %7522 = dma.done.wait (%p9962_p0), %s370_s23, 2048  }
  0x84   : > { %7524 = vsyncadd (%p9962_p0), %s370_s23, 4294965248  ;;  %p9963_p11 = scmp.eq.s32.totalorder %s7639_s17, 0 }
  0x86   : > { %7526 = dma.done.wait (%p9963_p11), [#allocation7], 10240   ;;  %p9964_p8 = pmov %p9963_p11 }
  0x88   : > { %7528 = vsyncadd (%p9964_p8), [#allocation7], 4294957056  ;;  %p9965_p13 = pmov %p9964_p8 }
  0x89   : > { %p9966_p6 = pmov %p9964_p8 }
  0x8a   : > { %7530 = dma.done.wait (%p9965_p13), [#allocation10], 1024  }
  0x8b   : > { %7532 = vsyncadd (%p9966_p6), [#allocation10], 4294966272  ;;  %v7136_v0 = vld [vmem:[#allocation6] sm:$0xff]   ;;  %v7137_v1 = vld [vmem:[#allocation6 + $0x8] sm:$0xff]   ;;  %v7559_v36 = vmov 0   ;;  %vm1976_vm3 = vcmask 1042432  }
  0x8c   : > { %6894 = vmatprep.subr.bf16.mxu0 %v7136_v0  ;;  %7038 = vmatprep.subr.bf16.mxu1 %v7136_v0  ;;  %v7138_v2 = vld [vmem:[#allocation6 + $0x10] sm:$0xff]   ;;  %v7139_v3 = vld [vmem:[#allocation6 + $0x18] sm:$0xff]   ;;  %v423_v4 = vld [vmem:[%s7827_s12] sm:$0xff]   ;;  %892 = vst [vmem:[#allocation2 + $0x18] sm:$0xf] %v7559_v36  ;;  %vm1977_vm4 = vcmask 1046532  }
  0x8d   : > { %6895 = vmatpush3.bf16.msra.mxu0 %v7136_v0  ;;  %7046 = vmatpush3.bf16.msra.mxu1 %v7136_v0  ;;  %v7140_v5 = vld [vmem:[#allocation6 + $0x20] sm:$0xff]   ;;  %v7141_v7 = vld [vmem:[#allocation6 + $0x28] sm:$0xff]   ;;  %v7142_v8 = vld [vmem:[#allocation6 + $0x30] sm:$0xff]   ;;  %886 = vst [vmem:[#allocation2] sm:$0xf] %v7559_v36  ;;  %vm1360_vm6 = vcmask 1043456  }
  0x8e   : > { %6896 = vmatprep.subr.bf16.mxu0 %v7137_v1  ;;  %7039 = vmatprep.subr.bf16.mxu1 %v7137_v1  ;;  %v439_v6 = vld [vmem:[%s7827_s12 + $0x40] sm:$0xff]   ;;  %v7143_v9 = vld [vmem:[#allocation6 + $0x38] sm:$0xff]   ;;  %v425_v10 = vld [vmem:[%s7827_s12 + $0x8] sm:$0xff]   ;;  %887 = vst [vmem:[#allocation2 + $0x4] sm:$0xf] %v7559_v36  ;;  %vm1367_vm10 = vcmask 1040384  }
  0x8f   : > { %6910 = vmatprep.mubr.bf16.mxu0 %v423_v4  ;;  %6926 = vmatprep.mubr.bf16.mxu1 %v439_v6  ;;  %v427_v11 = vld [vmem:[%s7827_s12 + $0x10] sm:$0xff]   ;;  %v441_v12 = vld [vmem:[%s7827_s12 + $0x48] sm:$0xff]   ;;  %v7162_v13 = vld [vmem:[#allocation8 + $0xc0] sm:$0xff]   ;;  %888 = vst [vmem:[#allocation2 + $0x8] sm:$0x1] %v7559_v36  ;;  %s10094_s11 = sld [smem:[#allocation47_spill]] }
  0x90   : > { %v443_v14 = vld [vmem:[%s7827_s12 + $0x50] sm:$0xff]   ;;  %v7160_v15 = vld [vmem:[#allocation8 + $0x40] sm:$0xff]   ;;  %v429_v18 = vld [vmem:[%s7827_s12 + $0x18] sm:$0xff]   ;;  %889 = vst [vmem:[#allocation2 + $0xc] sm:$0xf] %v7559_v36  ;;  %s6000_s29 = sshll.u32 %s7823_s10, 8 }
  0x91   : > { %6897 = vmatpush3.bf16.msra.mxu0 %v7137_v1  ;;  %7047 = vmatpush3.bf16.msra.mxu1 %v7137_v1  ;;  %v7161_v16 = vld [vmem:[#allocation8] sm:$0xff]   ;;  %v445_v20 = vld [vmem:[%s7827_s12 + $0x58] sm:$0xff]   ;;  %v433_v22 = vld [vmem:[%s7827_s12 + $0x28] sm:$0xff]   ;;  %890 = vst [vmem:[#allocation2 + $0x10] sm:$0xf] %v7559_v36  ;;  %s9762_s26 = scalar_lea.vmem [#allocation11], %s6000_s29 }
  0x92   : > { %6898 = vmatprep.subr.bf16.mxu0 %v7138_v2  ;;  %7040 = vmatprep.subr.bf16.mxu1 %v7138_v2  ;;  %v7163_v17 = vld [vmem:[#allocation8 + $0x80] sm:$0xff]   ;;  %v435_v23 = vld [vmem:[%s7827_s12 + $0x30] sm:$0xff]   ;;  %v449_v24 = vld [vmem:[%s7827_s12 + $0x68] sm:$0xff]   ;;  %891 = vst [vmem:[#allocation2 + $0x14] sm:$0x1] %v7559_v36  ;;  %s5884_s9 = sshll.u32 %s9762_s26, 4  ;;  %s9869_s9 = int_to_ptr.vmem [resolvable:$true] %s5884_s9 }
  0x93   : > { %v431_v19 = vld [vmem:[%s7827_s12 + $0x20] sm:$0xff]   ;;  %v451_v25 = vld [vmem:[%s7827_s12 + $0x70] sm:$0xff]   ;;  %v437_v26 = vld [vmem:[%s7827_s12 + $0x38] sm:$0xff]   ;;  %893 = vst [vmem:[#allocation2 + $0x1c] sm:$0xf] %v7559_v36  ;;  %s10095_s28 = sld [smem:[#allocation48_spill]] }
  0x94   : > { %v447_v21 = vld [vmem:[%s7827_s12 + $0x60] sm:$0xff]   ;;  %v453_v27 = vld [vmem:[%s7827_s12 + $0x78] sm:$0xff]   ;;  %v7164_v28 = vld [vmem:[#allocation8 + $0x48] sm:$0xff]   ;;  %894 = vst [vmem:[#allocation2 + $0x20] sm:$0x1] %v7559_v36  ;;  %s7477_s25 = scalar_lea.vmem %s9869_s9, 4096 }
  0x95   : > { %6899 = vmatpush3.bf16.msra.mxu0 %v7138_v2  ;;  %7048 = vmatpush3.bf16.msra.mxu1 %v7138_v2  ;;  %v7165_v29 = vld [vmem:[#allocation8 + $0x8] sm:$0xff]   ;;  %v7168_v32 = vld [vmem:[#allocation8 + $0x50] sm:$0xff]   ;;  %895 = vst [vmem:[#allocation2 + $0x24] sm:$0xf] %v7559_v36  ;;  %896 = vst [vmem:[#allocation2 + $0x28] sm:$0xf] %v7559_v36  ;;  %p7478_p10 = scmp.ne.s32.totalorder %s9869_s9, %s7477_s25 }
  0x96   : > { %6900 = vmatprep.subr.bf16.mxu0 %v7139_v3  ;;  %7041 = vmatprep.subr.bf16.mxu1 %v7139_v3  ;;  %v7166_v30 = vld [vmem:[#allocation8 + $0xc8] sm:$0xff]   ;;  %v7169_v33 = vld [vmem:[#allocation8 + $0x10] sm:$0xff]   ;;  %897 = vst [vmem:[#allocation2 + $0x2c] sm:$0x1] %v7559_v36  ;;  %898 = vst [vmem:[#allocation2 + $0x30] sm:$0xf] %v7559_v36 }
  0x97   : > { %v7167_v31 = vld [vmem:[#allocation8 + $0x88] sm:$0xff]   ;;  %v7170_v34 = vld [vmem:[#allocation8 + $0xd0] sm:$0xff]   ;;  %899 = vst [vmem:[#allocation2 + $0x34] sm:$0xf] %v7559_v36  ;;  %900 = vst [vmem:[#allocation2 + $0x38] sm:$0x1] %v7559_v36  ;;  %p7479_p3 = pnand %p7478_p10, %p7772_p5 }
  0x98   : > { %v7171_v35 = vld [vmem:[#allocation8 + $0x90] sm:$0xff]   ;;  %901 = vst [vmem:[#allocation2 + $0x3c] sm:$0xf] %v7559_v36  ;;  %902 = vst [vmem:[#allocation2 + $0x40] sm:$0xf] %v7559_v36  ;;  %v7172_v37 = vld [vmem:[#allocation8 + $0x58] sm:$0xff]  }
  0x99   : > { %6901 = vmatpush3.bf16.msra.mxu0 %v7139_v3  ;;  %7049 = vmatpush3.bf16.msra.mxu1 %v7139_v3  ;;  %903 = vst [vmem:[#allocation2 + $0x44] sm:$0x1] %v7559_v36  ;;  %904 = vst [vmem:[#allocation2 + $0x48] sm:$0xf] %v7559_v36  ;;  %v7173_v38 = vld [vmem:[#allocation8 + $0x18] sm:$0xff]   ;;  %v7176_v41 = vld [vmem:[#allocation8 + $0x60] sm:$0xff]   ;;  %p7480_p7 = pneg %p7479_p3 }
  0x9a   : > { %6902 = vmatprep.subr.bf16.mxu0 %v7140_v5  ;;  %7042 = vmatprep.subr.bf16.mxu1 %v7140_v5  ;;  %905 = vst [vmem:[#allocation2 + $0x4c] sm:$0xf] %v7559_v36  ;;  %906 = vst [vmem:[#allocation2 + $0x50] sm:$0x1] %v7559_v36  ;;  %v7174_v39 = vld [vmem:[#allocation8 + $0xd8] sm:$0xff]   ;;  %v7177_v42 = vld [vmem:[#allocation8 + $0x20] sm:$0xff]  }
  0x9b   : > { %907 = vst [vmem:[#allocation2 + $0x54] sm:$0xf] %v7559_v36  ;;  %908 = vst [vmem:[#allocation2 + $0x58] sm:$0xf] %v7559_v36  ;;  %v7175_v40 = vld [vmem:[#allocation8 + $0x98] sm:$0xff]   ;;  %v7178_v43 = vld [vmem:[#allocation8 + $0xe0] sm:$0xff]  }
  0x9c   : > { %909 = vst [vmem:[#allocation2 + $0x5c] sm:$0x1] %v7559_v36  ;;  %910 = vst [vmem:[#allocation2 + $0x60] sm:$0xf] %v7559_v36  ;;  %v7179_v44 = vld [vmem:[#allocation8 + $0xa0] sm:$0xff]   ;;  %v7180_v45 = vld [vmem:[#allocation8 + $0x68] sm:$0xff]  }
  0x9d   : > { %6903 = vmatpush3.bf16.msra.mxu0 %v7140_v5  ;;  %7050 = vmatpush3.bf16.msra.mxu1 %v7140_v5  ;;  %911 = vst [vmem:[#allocation2 + $0x64] sm:$0xf] %v7559_v36  ;;  %912 = vst [vmem:[#allocation2 + $0x68] sm:$0x1] %v7559_v36  ;;  %v7181_v46 = vld [vmem:[#allocation8 + $0x28] sm:$0xff]   ;;  %v7184_v55 = vld [vmem:[#allocation8 + $0x70] sm:$0xff]  }
  0x9e   : > { %6904 = vmatprep.subr.bf16.mxu0 %v7141_v7  ;;  %7043 = vmatprep.subr.bf16.mxu1 %v7141_v7  ;;  %913 = vst [vmem:[#allocation2 + $0x6c] sm:$0xf] %v7559_v36  ;;  %914 = vst [vmem:[#allocation2 + $0x70] sm:$0xf] %v7559_v36  ;;  %v1477_v47 = vld [vmem:[#allocation2] sm:$0xf] }
  0x9f   : > { %915 = vst [vmem:[#allocation2 + $0x74] sm:$0x1] %v7559_v36  ;;  %916 = vst [vmem:[#allocation2 + $0x78] sm:$0xf] %v7559_v36  ;;  %v1478_v48 = vld [vmem:[#allocation2 + $0x4] sm:$0xf] }
  0xa0   : > { %917 = vst [vmem:[#allocation2 + $0x7c] sm:$0xf] %v7559_v36  ;;  %918 = vst [vmem:[#allocation2 + $0x80] sm:$0x1] %v7559_v36  ;;  %v7182_v49 = vld [vmem:[#allocation8 + $0xe8] sm:$0xff]   ;;  %v1529_v50 = vshrl.u32 %v1477_v47, 16 }
  0xa1   : > { %6905 = vmatpush3.bf16.msra.mxu0 %v7141_v7  ;;  %7051 = vmatpush3.bf16.msra.mxu1 %v7141_v7  ;;  %919 = vst [vmem:[#allocation2 + $0x84] sm:$0xf] %v7559_v36  ;;  %920 = vst [vmem:[#allocation2 + $0x88] sm:$0xf] %v7559_v36  ;;  %v1532_v51 = vshll.u32 %v1477_v47, 16  ;;  %v1538_v52 = vshll.u32 %v1478_v48, 16 }
  0xa2   : > { %6906 = vmatprep.subr.bf16.mxu0 %v7142_v8  ;;  %7044 = vmatprep.subr.bf16.mxu1 %v7142_v8  ;;  %921 = vst [vmem:[#allocation2 + $0x8c] sm:$0x1] %v7559_v36  ;;  %922 = vst [vmem:[#allocation2 + $0x90] sm:$0xf] %v7559_v36  ;;  %v7183_v53 = vld [vmem:[#allocation8 + $0xa8] sm:$0xff]   ;;  %v1542_v54 = vshrl.u32 %v1478_v48, 16 }
  0xa3   : > { %923 = vst [vmem:[#allocation2 + $0x94] sm:$0xf] %v7559_v36  ;;  %924 = vst [vmem:[#allocation2 + $0x98] sm:$0x1] %v7559_v36  ;;  %v1531_v56 = vrot.slane %v1529_v50, 4  ;;  %v1534_v57 = vrot.slane %v1532_v51, 5 }
  0xa4   : > { %925 = vst [vmem:[#allocation2 + $0x9c] sm:$0xf] %v7559_v36  ;;  %926 = vst [vmem:[#allocation2 + $0xa0] sm:$0xf] %v7559_v36  ;;  %v1540_v58 = vrot.slane %v1538_v52, 5  ;;  %v7185_v59 = vld [vmem:[#allocation8 + $0x30] sm:$0xff]  }
  0xa5   : > { %6907 = vmatpush3.bf16.msra.mxu0 %v7142_v8  ;;  %7052 = vmatpush3.bf16.msra.mxu1 %v7142_v8  ;;  %927 = vst [vmem:[#allocation2 + $0xa4] sm:$0x1] %v7559_v36  ;;  %928 = vst [vmem:[#allocation2 + $0xa8] sm:$0xf] %v7559_v36  ;;  %v1509_v60 = vld [vmem:[#allocation2 + $0x8] sm:$0x1]  ;;  %v1535_v63 = vor.u32 %v1534_v57, %v1531_v56 }
  0xa6   : > { %6908 = vmatprep.subr.bf16.mxu0 %v7143_v9  ;;  %7045 = vmatprep.subr.bf16.mxu1 %v7143_v9  ;;  %929 = vst [vmem:[#allocation2 + $0xac] sm:$0xf] %v7559_v36  ;;  %930 = vst [vmem:[#allocation2 + $0xb0] sm:$0x1] %v7559_v36  ;;  %v1544_v61 = vrot.slane %v1542_v54, 4  ;;  %v7186_v62 = vld [vmem:[#allocation8 + $0xf0] sm:$0xff]  }
  0xa7   : > { %931 = vst [vmem:[#allocation2 + $0xb4] sm:$0xf] %v7559_v36  ;;  %932 = vst [vmem:[#allocation2 + $0xb8] sm:$0xf] %v7559_v36  ;;  %v1548_v0 = vshll.u32 %v1509_v60, 16  ;;  %v7187_v1 = vld [vmem:[#allocation8 + $0xb0] sm:$0xff]  }
  0xa8   : > { %933 = vst [vmem:[#allocation2 + $0xbc] sm:$0x1] %v7559_v36  ;;  %934 = vst [vmem:[#allocation2 + $0xc0] sm:$0xf] %v7559_v36  ;;  %v1545_v2 = vor.u32 %v1544_v61, %v1540_v58  ;;  %v7188_v3 = vld [vmem:[#allocation8 + $0x78] sm:$0xff]   ;;  %v1536_v4 = vrot.slane %v1535_v63, 4 }
  0xa9   : > { %6909 = vmatpush3.bf16.msra.mxu0 %v7143_v9  ;;  %7053 = vmatpush3.bf16.msra.mxu1 %v7143_v9  ;;  %935 = vst [vmem:[#allocation2 + $0xc4] sm:$0xf] %v7559_v36  ;;  %936 = vst [vmem:[#allocation2 + $0xc8] sm:$0x1] %v7559_v36  ;;  %vm1525_vm0 = vsmask.f32 3328 }
  0xaa   : > { %6510 = vmatprep.subr.bf16.mxu0 %v7162_v13  ;;  %6398 = vmatprep.subr.bf16.mxu1 %v7160_v15  ;;  %937 = vst [vmem:[#allocation2 + $0xcc] sm:$0xf] %v7559_v36  ;;  %938 = vst [vmem:[#allocation2 + $0xd0] sm:$0xf] %v7559_v36  ;;  %vm1526_vm1 = vsmask.f32 7440 }
  0xab   : > { %939 = vst [vmem:[#allocation2 + $0xd4] sm:$0x1] %v7559_v36  ;;  %v7189_v5 = vld [vmem:[#allocation8 + $0x38] sm:$0xff]   ;;  %vm7857_vm2 = vmor %vm1525_vm0, %vm1526_vm1  ;;  %v1546_v7 = vrot.slane %v1545_v2, 4  ;;  %v1550_v8 = vrot.slane %v1548_v0, 5  ;;  %v1984_v13 = vrot.slane %v1509_v60, 5 }
  0xac   : > { %6911 = vmatmul.mubr.bf16.vlgmr.msra.gmra.mrb[0].mxu0 %v425_v10  ;;  %6927 = vmatmul.mubr.bf16.vlgmr.msra.gmra.mrb[0].mxu1 %v441_v12  ;;  %v7190_v9 = vld [vmem:[#allocation8 + $0xf8] sm:$0xff]   ;;  %v1541_v10 = vsel %vm7857_vm2, %v1536_v4, %v1540_v58  ;;  %v1912_v15 = vld [vmem:[#allocation2] sm:$0xe]  ;;  %vm7865_vm5 = vmor %vm1976_vm3, %vm1977_vm4  ;;  %vm1361_vm7 = vsmask.f32 7938  ;;  %s7560_s23 = smov [#allocation11]  }
  0xad   : > { %6914 = vmatprep.mubr.bf16.mxu0 %v427_v11  ;;  %6930 = vmatprep.mubr.bf16.mxu1 %v443_v14  ;;  %v1981_v11 = vrot.slane %v1478_v48, 5  ;;  %v1551_v12 = vsel %vm7857_vm2, %v1546_v7, %v1550_v8  ;;  %v7191_v14 = vld [vmem:[#allocation8 + $0xb8] sm:$0xff]   ;;  %vm1036_vm8 = vsmask.f32 256  ;;  %vm1037_vm9 = vsmask.f32 4368  ;;  %vm7925_vm11 = vmand %vm1360_vm6, %vm1361_vm7 }
  0xae   : > { %6399 = vmatpush3.bf16.msra.mxu1 %v7161_v16  ;;  %6511 = vmatpush3.bf16.msra.mxu0 %v7163_v17  ;;  %v6123_v16 = vcombine.low %v1541_v10, %v1551_v12  ;;  %v6107_v17 = vcombine.low %v1477_v47, %v1478_v48  ;;  %vm7934_vm12 = vmor %vm1036_vm8, %vm1037_vm9  ;;  %s7481_s19 = sshll.u32 %s7560_s23, 4  ;;  %s7482_s19 = int_to_ptr.vmem [resolvable:$false] %s7481_s19 }
  0xaf   : > { %6400 = vmatprep.subr.bf16.mxu1 %v7164_v28  ;;  %6512 = vmatprep.subr.bf16.mxu0 %v7166_v30  ;;  %v7205_v28 = vld [vmem:[#allocation8 + $0x150] sm:$0xff]   ;;  %v7211_v30 = vld [vmem:[#allocation8 + $0x158] sm:$0xff]   ;;  %vm7940_vm13 = vmand %vm1367_vm10, %vm1036_vm8  ;;  %s7483_s21 = scalar_lea.vmem %s7482_s19, 8192  ;;  %p7484_p12 = scmp.lt.s32.totalorder %s9869_s9, %s7482_s19 }
  0xb0   : > { %p7485_p1 = scmp.lt.s32.totalorder %s7483_s21, %s7477_s25 }
  0xb2   : > { %6401 = vmatpush3.bf16.msra.mxu1 %v7165_v29  ;;  %6513 = vmatpush3.bf16.msra.mxu0 %v7167_v31  ;;  %v7208_v29 = vld [vmem:[#allocation8 + $0x110] sm:$0xff]   ;;  %v7214_v31 = vld [vmem:[#allocation8 + $0x118] sm:$0xff]   ;;  %p7486_p2 = por %p7485_p1, %p7484_p12 }
  0xb3   : > { %6402 = vmatprep.subr.bf16.mxu1 %v7168_v32  ;;  %6514 = vmatprep.subr.bf16.mxu0 %v7170_v34  ;;  %v7882_v32 = vld [vmem:[%s9920_s4] ss:$0 sm:$0xff] }
  0xb4   : > { %6915 = vmatmul.mubr.bf16.gmra.mrb[4].mxu0 %v429_v18  ;;  %6931 = vmatmul.mubr.bf16.gmra.mrb[4].mxu1 %v445_v20  ;;  %v6059_v18 = vrot.slane %v1912_v15, 9  ;;  %v7887_v34 = vld [vmem:[%s9921_s5] ss:$0 sm:$0xff]  ;;  %p7487_p4 = pnand %p7486_p2, %p7480_p7 }
  0xb5   : > { %6918 = vmatprep.mubr.bf16.mxu0 %v431_v19  ;;  %6934 = vmatprep.mubr.bf16.mxu1 %v447_v21  ;;  %v1983_v19 = vrot.slane %v1981_v11, 4 }
  0xb6   : > { %6403 = vmatpush3.bf16.msra.mxu1 %v7169_v33  ;;  %6515 = vmatpush3.bf16.msra.mxu0 %v7171_v35  ;;  %v7871_v21 = vsel %vm7865_vm5, %v6059_v18, %v1981_v11 }
  0xb7   : > { %6404 = vmatprep.subr.bf16.mxu1 %v7172_v37  ;;  %6516 = vmatprep.subr.bf16.mxu0 %v7174_v39 }
  0xba   : > { %6405 = vmatpush3.bf16.msra.mxu1 %v7173_v38  ;;  %6517 = vmatpush3.bf16.msra.mxu0 %v7175_v40 }
  0xbb   : > { %6406 = vmatprep.subr.bf16.mxu1 %v7176_v41  ;;  %6518 = vmatprep.subr.bf16.mxu0 %v7178_v43 }
  0xbc   : > { %6919 = vmatmul.mubr.bf16.gmra.mrb[8].mxu0 %v433_v22  ;;  %6935 = vmatmul.mubr.bf16.gmra.mrb[8].mxu1 %v449_v24  ;;  %v7875_v22 = vsel %vm7865_vm5, %v1983_v19, %v1984_v13  ;;  %v7194_v24 = vld [vmem:[#allocation8 + $0x140] sm:$0xff]  }
  0xbd   : > { %6922 = vmatprep.mubr.bf16.mxu0 %v435_v23  ;;  %6938 = vmatprep.mubr.bf16.mxu1 %v451_v25  ;;  %v6139_v23 = vcombine.low %v7871_v21, %v7875_v22  ;;  %v7196_v25 = vld [vmem:[#allocation8 + $0x100] sm:$0xff]  }
  0xbe   : > { %6407 = vmatpush3.bf16.msra.mxu1 %v7177_v42  ;;  %6519 = vmatpush3.bf16.msra.mxu0 %v7179_v44 }
  0xbf   : > { %6408 = vmatprep.subr.bf16.mxu1 %v7180_v45  ;;  %6520 = vmatprep.subr.bf16.mxu0 %v7182_v49 }
  0xc2   : > { %6409 = vmatpush3.bf16.msra.mxu1 %v7181_v46  ;;  %6521 = vmatpush3.bf16.msra.mxu0 %v7183_v53 }
  0xc3   : > { %6410 = vmatprep.subr.bf16.mxu1 %v7184_v55  ;;  %6522 = vmatprep.subr.bf16.mxu0 %v7186_v62 }
  0xc4   : > { %6923 = vmatmul.mubr.bf16.gmra.mrb[12].mxu0 %v437_v26  ;;  %6939 = vmatmul.mubr.bf16.gmra.mrb[12].mxu1 %v453_v27  ;;  %v7199_v26 = vld [vmem:[#allocation8 + $0x148] sm:$0xff]  }
  0xc5   : > { %4540 = vmatprep.mubr.bf16.mxu1 %v6123_v16  ;;  %v7202_v27 = vld [vmem:[#allocation8 + $0x108] sm:$0xff]  }
  0xc6   : > { %6411 = vmatpush3.bf16.msra.mxu1 %v7185_v59  ;;  %6523 = vmatpush3.bf16.msra.mxu0 %v7187_v1 }
  0xc7   : > { %6412 = vmatprep.subr.bf16.mxu1 %v7188_v3  ;;  %6524 = vmatprep.subr.bf16.mxu0 %v7190_v9 }
  0xca   : > { %6413 = vmatpush3.bf16.msra.mxu1 %v7189_v5  ;;  %6525 = vmatpush3.bf16.msra.mxu0 %v7191_v14 }
  0xcb   : > { %6622 = vmatprep.subr.bf16.mxu1 %v7194_v24 }
  0xcd   : > { %4541 = vmatmul.mubr.bf16.vlgmr.msra.gmra.mrb[16].mxu1 %v6107_v17 }
  0xce   : > { %6623 = vmatpush3.bf16.msra.mxu1 %v7196_v25 }
  0xcf   : > { %6624 = vmatprep.subr.bf16.mxu1 %v7199_v26 }
  0xd2   : > { %6625 = vmatpush3.bf16.msra.mxu1 %v7202_v27 }
  0xd3   : > { %6626 = vmatprep.subr.bf16.mxu1 %v7205_v28  ;;  %v1372_v28 = vld [vmem:[#allocation2 + $0x18] sm:$0xf] }
  0xd6   : > { %6627 = vmatpush3.bf16.msra.mxu1 %v7208_v29 }
  0xd7   : > { %6628 = vmatprep.subr.bf16.mxu1 %v7211_v30 }
  0xda   : > { %6629 = vmatpush3.bf16.msra.mxu1 %v7214_v31 }
 0x17f   : > { %v6912_v33 = vpop.f32.mrb[0].mxu0  ;;  %v6928_v37 = vpop.f32.mrb[0].mxu1 }
 0x180   : > { %v785_v35 = vmul.f32 %v6912_v33, %v7882_v32  ;;  %v649_v36 = vpop.f32.mrb[1].mxu0  ;;  %v801_v40 = vmul.f32 %v6928_v37, %v7882_v32  ;;  %v713_v41 = vpop.f32.mrb[1].mxu1 }
 0x181   : > { %v783_v38 = vmul.f32 %v7882_v32, %v649_v36  ;;  %v6913_v39 = vpop.f32.mrb[2].mxu0  ;;  %v799_v45 = vmul.f32 %v7882_v32, %v713_v41  ;;  %v6929_v46 = vpop.f32.mrb[2].mxu1 }
 0x182   : > { %v824_v42 = vadd.f32 %v7887_v34, %v785_v35  ;;  %v786_v43 = vmul.f32 %v6913_v39, %v7882_v32  ;;  %v652_v44 = vpop.f32.mrb[3].mxu0  ;;  %v840_v49 = vadd.f32 %v7887_v34, %v801_v40  ;;  %v802_v50 = vmul.f32 %v6929_v46, %v7882_v32  ;;  %v716_v51 = vpop.f32.mrb[3].mxu1 }
 0x183   : > { %v822_v47 = vadd.f32 %v7887_v34, %v783_v38  ;;  %v784_v48 = vmul.f32 %v7882_v32, %v652_v44  ;;  %v7901_v54 = vadd.f32 %v7887_v34, %v799_v45  ;;  %v800_v55 = vmul.f32 %v7882_v32, %v716_v51  ;;  %v1363_v38 = vld [vmem:[#allocation2 + $0xc] sm:$0xf]  ;;  %v1376_v45 = vld [vmem:[#allocation2 + $0x20] sm:$0x1]  ;;  %v1369_v51 = vld [vmem:[#allocation2 + $0x14] sm:$0x1] }
 0x184   : > { %v856_v52 = vmax.f32 %v824_v42, 0.0  ;;  %v825_v53 = vadd.f32 %v7887_v34, %v786_v43  ;;  %v872_v58 = vmax.f32 %v840_v49, 0.0  ;;  %v7907_v62 = vadd.f32 %v7887_v34, %v802_v50 }
 0x185   : > { %v854_v56 = vmax.f32 %v822_v47, 0.0  ;;  %v823_v57 = vadd.f32 %v7887_v34, %v784_v48  ;;  %v7912_v3 = vadd.f32 %v7887_v34, %v800_v55 }
 0x186   : > { %v6343_v59 = vpack.c.bf16 %v856_v52, %v856_v52  ;;  %v857_v60 = vmax.f32 %v825_v53, 0.0  ;;  %v7909_v2 = vpack.c.bf16 %v872_v58, %v872_v58 }
 0x187   : > { %v6341_v63 = vpack.c.bf16 %v854_v56, %v854_v56  ;;  %v855_v0 = vmax.f32 %v823_v57, 0.0  ;;  %v6916_v1 = vpop.f32.mrb[4].mxu0  ;;  %v7915_v10 = vpop.f32.mrb[4].mxu1 }
 0x188   : > { %v1057_v4 = vshrl.u32 %v6343_v59, 16  ;;  %v1060_v5 = vshll.u32 %v6343_v59, 16  ;;  %v6344_v7 = vpack.c.bf16 %v857_v60, %v857_v60  ;;  %v789_v8 = vmul.f32 %v6916_v1, %v7882_v32  ;;  %v665_v9 = vpop.f32.mrb[5].mxu0  ;;  %v7918_v16 = vpop.f32.mrb[5].mxu1 }
 0x189   : > { %v1040_v11 = vshrl.u32 %v6341_v63, 16  ;;  %v1043_v12 = vshll.u32 %v6341_v63, 16  ;;  %v6342_v13 = vpack.c.bf16 %v855_v0, %v855_v0  ;;  %v787_v14 = vmul.f32 %v7882_v32, %v665_v9  ;;  %v6917_v15 = vpop.f32.mrb[6].mxu0  ;;  %v7921_v26 = vpop.f32.mrb[6].mxu1 }
 0x18a   : > { %v1059_v17 = vrot.slane %v1057_v4, 7  ;;  %v1065_v18 = vshrl.u32 %v6344_v7, 16  ;;  %v1068_v19 = vshll.u32 %v6344_v7, 16  ;;  %v828_v24 = vadd.f32 %v7887_v34, %v789_v8  ;;  %v668_v25 = vpop.f32.mrb[7].mxu0  ;;  %v7930_v35 = vpop.f32.mrb[7].mxu1 }
 0x18b   : > { %v1042_v29 = vrot.slane %v1040_v11, 7  ;;  %v1048_v30 = vshrl.u32 %v6342_v13, 16  ;;  %v1051_v31 = vshll.u32 %v6342_v13, 16  ;;  %v826_v33 = vadd.f32 %v7887_v34, %v787_v14 }
 0x18c   : > { %v1062_v36 = vor.u32 %v1060_v5, %v1059_v17  ;;  %v1063_v37 = vrot.slane %v1059_v17, 4  ;;  %v1067_v40 = vrot.slane %v1065_v18, 7  ;;  %v860_v41 = vmax.f32 %v828_v24, 0.0 }
 0x18d   : > { %v1045_v42 = vor.u32 %v1043_v12, %v1042_v29  ;;  %v1046_v43 = vrot.slane %v1042_v29, 4  ;;  %v1050_v46 = vrot.slane %v1048_v30, 7  ;;  %v858_v47 = vmax.f32 %v826_v33, 0.0  ;;  %v1386_v29 = vld [vmem:[#allocation2 + $0x30] sm:$0xf] }
 0x18e   : > { %v1373_v48 = vsel %vm7925_vm11, %v1062_v36, %v1372_v28  ;;  %v1070_v49 = vor.u32 %v1068_v19, %v1067_v40  ;;  %v1072_v50 = vrot.slane %v1067_v40, 4  ;;  %v6347_v52 = vpack.c.bf16 %v860_v41, %v860_v41  ;;  %v7217_v28 = vld [vmem:[#allocation8 + $0x1c0] sm:$0xff]   ;;  %v1379_v41 = vld [vmem:[#allocation2 + $0x24] sm:$0xf] }
 0x18f   : > { %1374 = vst [vmem:[#allocation2 + $0x18] sm:$0xf] %v1373_v48  ;;  %v1364_v53 = vsel %vm7925_vm11, %v1045_v42, %v1363_v38  ;;  %v1053_v55 = vor.u32 %v1051_v31, %v1050_v46  ;;  %v1055_v56 = vrot.slane %v1050_v46, 4  ;;  %v6345_v57 = vpack.c.bf16 %v858_v47, %v858_v47  ;;  %v6920_v58 = vpop.f32.mrb[8].mxu0  ;;  %v7952_v4 = vpop.f32.mrb[8].mxu1  ;;  %v7222_v38 = vld [vmem:[#allocation8 + $0x120] sm:$0xff]   ;;  %6734 = vmatprep.subr.bf16.mxu0 %v7217_v28 }
 0x190   : > { %1365 = vst [vmem:[#allocation2 + $0xc] sm:$0xf] %v1364_v53  ;;  %v1071_v59 = vsel %vm7934_vm12, %v1063_v37, %v1070_v49  ;;  %v1377_v60 = vsel %vm7940_vm13, %v1072_v50, %v1376_v45  ;;  %v1091_v63 = vshrl.u32 %v6347_v52, 16  ;;  %v1094_v0 = vshll.u32 %v6347_v52, 16  ;;  %v681_v1 = vpop.f32.mrb[9].mxu0  ;;  %v7958_v12 = vpop.f32.mrb[9].mxu1 }
 0x191   : > { %1375 = vst [vmem:[#allocation2 + $0x1c] sm:$0xf] %v1071_v59  ;;  %1378 = vst [vmem:[#allocation2 + $0x20] sm:$0x1] %v1377_v60  ;;  %v1054_v5 = vsel %vm7934_vm12, %v1046_v43, %v1053_v55  ;;  %v1370_v7 = vsel %vm7940_vm13, %v1055_v56, %v1369_v51  ;;  %v1074_v8 = vshrl.u32 %v6345_v57, 16  ;;  %v1077_v9 = vshll.u32 %v6345_v57, 16 }
 0x192   : > { %v6921_v11 = vpop.f32.mrb[10].mxu0  ;;  %1366 = vst [vmem:[#allocation2 + $0x10] sm:$0xf] %v1054_v5  ;;  %1371 = vst [vmem:[#allocation2 + $0x14] sm:$0x1] %v1370_v7  ;;  %v7960_v13 = vrot.slane %v1091_v63, 7  ;;  %v790_v14 = vmul.f32 %v6917_v15, %v7882_v32  ;;  %v788_v17 = vmul.f32 %v7882_v32, %v668_v25  ;;  %v793_v18 = vmul.f32 %v6920_v58, %v7882_v32 }
 0x193   : > { %v684_v19 = vpop.f32.mrb[11].mxu0  ;;  %v7965_v24 = vpop.f32.mrb[10].mxu1  ;;  %v7967_v30 = vrot.slane %v1074_v8, 7  ;;  %v791_v31 = vmul.f32 %v7882_v32, %v681_v1  ;;  %v794_v33 = vmul.f32 %v6921_v11, %v7882_v32  ;;  %v7219_v15 = vld [vmem:[#allocation8 + $0x160] sm:$0xff]  }
 0x194   : > { %v792_v36 = vmul.f32 %v7882_v32, %v684_v19  ;;  %v7972_v37 = vpop.f32.mrb[11].mxu1  ;;  %v1096_v25 = vor.u32 %v1094_v0, %v7960_v13  ;;  %v1097_v40 = vrot.slane %v7960_v13, 4  ;;  %v829_v42 = vadd.f32 %v7887_v34, %v790_v14  ;;  %6630 = vmatprep.subr.bf16.mxu1 %v7219_v15 }
 0x195   : > { %v827_v43 = vadd.f32 %v7887_v34, %v788_v17  ;;  %v1079_v45 = vor.u32 %v1077_v9, %v7967_v30  ;;  %v1080_v46 = vrot.slane %v7967_v30, 4  ;;  %v832_v47 = vadd.f32 %v7887_v34, %v793_v18  ;;  %6631 = vmatpush3.bf16.msra.mxu1 %v7222_v38  ;;  %v1390_v18 = vld [vmem:[#allocation2 + $0x38] sm:$0x1]  ;;  %v1383_v38 = vld [vmem:[#allocation2 + $0x2c] sm:$0x1] }
 0x196   : > { %v830_v48 = vadd.f32 %v7887_v34, %v791_v31  ;;  %v1387_v49 = vsel %vm7925_vm11, %v1096_v25, %v1386_v29  ;;  %v861_v50 = vmax.f32 %v829_v42, 0.0  ;;  %v833_v52 = vadd.f32 %v7887_v34, %v794_v33 }
 0x197   : > { %v859_v51 = vmax.f32 %v827_v43, 0.0  ;;  %1388 = vst [vmem:[#allocation2 + $0x30] sm:$0xf] %v1387_v49  ;;  %v1380_v53 = vsel %vm7925_vm11, %v1079_v45, %v1379_v41  ;;  %v864_v55 = vmax.f32 %v832_v47, 0.0  ;;  %v831_v57 = vadd.f32 %v7887_v34, %v792_v36  ;;  %v7988_v58 = vld [vmem:[#allocation2 + $0xc] sm:$0xf] }
 0x198   : > { %v862_v56 = vmax.f32 %v830_v48, 0.0  ;;  %1381 = vst [vmem:[#allocation2 + $0x24] sm:$0xf] %v1380_v53  ;;  %v6348_v59 = vpack.c.bf16 %v861_v50, %v861_v50  ;;  %v865_v63 = vmax.f32 %v833_v52, 0.0  ;;  %v2140_v0 = vshrl.u32 %v7988_v58, 16  ;;  %v7992_v31 = vpop.f32.mrb[12].mxu0 }
 0x199   : > { %v6346_v60 = vpack.c.bf16 %v859_v51, %v859_v51  ;;  %v6351_v1 = vpack.c.bf16 %v864_v55, %v864_v55  ;;  %v863_v7 = vmax.f32 %v831_v57, 0.0  ;;  %v2143_v8 = vshll.u32 %v7988_v58, 16  ;;  %v7994_v33 = vpop.f32.mrb[12].mxu1  ;;  %v7996_v42 = vpop.f32.mrb[13].mxu0  ;;  %v1400_v45 = vld [vmem:[#allocation2 + $0x48] sm:$0xf] }
 0x19a   : > { %v6349_v5 = vpack.c.bf16 %v862_v56, %v862_v56  ;;  %v1099_v9 = vshrl.u32 %v6348_v59, 16  ;;  %v1102_v11 = vshll.u32 %v6348_v59, 16  ;;  %v6352_v25 = vpack.c.bf16 %v865_v63, %v865_v63  ;;  %v1393_v55 = vld [vmem:[#allocation2 + $0x3c] sm:$0xf]  ;;  %v8002_v56 = vpop.f32.mrb[14].mxu0 }
 0x19b   : > { %v1082_v14 = vshrl.u32 %v6346_v60, 16  ;;  %v1085_v17 = vshll.u32 %v6346_v60, 16  ;;  %v1125_v19 = vshrl.u32 %v6351_v1, 16  ;;  %v1128_v28 = vshll.u32 %v6351_v1, 16  ;;  %v2092_v63 = vld [vmem:[#allocation2 + $0x10] sm:$0xf] }
 0x19c   : > { %v1108_v29 = vshrl.u32 %v6349_v5, 16  ;;  %v1111_v30 = vshll.u32 %v6349_v5, 16  ;;  %v1101_v36 = vrot.slane %v1099_v9, 7  ;;  %v6350_v41 = vpack.c.bf16 %v863_v7, %v863_v7  ;;  %v8007_v1 = vpop.f32.mrb[15].mxu0 }
 0x19d   : > { %v1084_v15 = vrot.slane %v1082_v14, 7  ;;  %v7998_v43 = vrot.slane %v1125_v19, 7  ;;  %v2142_v48 = vrot.slane %v2140_v0, 4  ;;  %v2145_v49 = vrot.slane %v2143_v8, 5 }
 0x19e   : > { %v8000_v47 = vrot.slane %v1108_v29, 7  ;;  %v1104_v50 = vor.u32 %v1102_v11, %v1101_v36  ;;  %v1106_v51 = vrot.slane %v1101_v36, 4  ;;  %v2093_v11 = vld [vmem:[#allocation2 + $0x18] sm:$0xf]  ;;  %v1133_v14 = vshrl.u32 %v6352_v25, 16  ;;  %v8024_v36 = vpop.f32.mrb[13].mxu1 }
 0x19f   : > { %v1087_v52 = vor.u32 %v1085_v17, %v1084_v15  ;;  %v1089_v53 = vrot.slane %v1084_v15, 4  ;;  %v1130_v57 = vor.u32 %v1128_v28, %v7998_v43  ;;  %v1131_v59 = vrot.slane %v7998_v43, 4 }
 0x1a0   : > { %v1113_v60 = vor.u32 %v1111_v30, %v8000_v47  ;;  %v1105_v0 = vsel %vm7934_vm12, %v1097_v40, %v1104_v50  ;;  %v1391_v7 = vsel %vm7940_vm13, %v1106_v51, %v1390_v18  ;;  %v1136_v17 = vshll.u32 %v6352_v25, 16  ;;  %v1404_v18 = vld [vmem:[#allocation2 + $0x50] sm:$0x1]  ;;  %v7218_v30 = vld [vmem:[#allocation8 + $0x180] sm:$0xff]   ;;  %v8027_v51 = vld [vmem:[#allocation2 + $0xc] sm:$0xf] }
 0x1a1   : > { %v1088_v8 = vsel %vm7934_vm12, %v1080_v46, %v1087_v52  ;;  %v1384_v9 = vsel %vm7940_vm13, %v1089_v53, %v1383_v38  ;;  %1389 = vst [vmem:[#allocation2 + $0x34] sm:$0xf] %v1105_v0  ;;  %1392 = vst [vmem:[#allocation2 + $0x38] sm:$0x1] %v1391_v7  ;;  %v1401_v13 = vsel %vm7925_vm11, %v1130_v57, %v1400_v45  ;;  %v1116_v46 = vshrl.u32 %v6350_v41, 16  ;;  %v8029_v52 = vpop.f32.mrb[14].mxu1 }
 0x1a2   : > { %1382 = vst [vmem:[#allocation2 + $0x28] sm:$0xf] %v1088_v8  ;;  %1385 = vst [vmem:[#allocation2 + $0x2c] sm:$0x1] %v1384_v9  ;;  %v1394_v40 = vsel %vm7925_vm11, %v1113_v60, %v1393_v55  ;;  %v1119_v19 = vshll.u32 %v6350_v41, 16  ;;  %v2146_v28 = vor.u32 %v2145_v49, %v2142_v48  ;;  %v2149_v29 = vshll.u32 %v2092_v63, 16 }
 0x1a3   : > { %1402 = vst [vmem:[#allocation2 + $0x48] sm:$0xf] %v1401_v13  ;;  %1395 = vst [vmem:[#allocation2 + $0x3c] sm:$0xf] %v1394_v40  ;;  %v1135_v15 = vrot.slane %v1133_v14, 7  ;;  %v2153_v43 = vshrl.u32 %v2092_v63, 16  ;;  %v6155_v45 = vcombine.low %v7988_v58, %v2092_v63 }
 0x1a4   : > { %v1397_v38 = vld [vmem:[#allocation2 + $0x44] sm:$0x1]  ;;  %v2164_v50 = vshrl.u32 %v2093_v11, 16  ;;  %v1114_v25 = vrot.slane %v8000_v47, 4  ;;  %v1118_v53 = vrot.slane %v1116_v46, 7  ;;  %v8032_v55 = vrot.slane %v2149_v29, 5 }
 0x1a5   : > { %v8034_v41 = vld [vmem:[#allocation2 + $0x1c] sm:$0xf]  ;;  %v2167_v48 = vshll.u32 %v2093_v11, 16  ;;  %v1138_v49 = vor.u32 %v1136_v17, %v1135_v15  ;;  %v1140_v57 = vrot.slane %v1135_v15, 4  ;;  %v8036_v60 = vrot.slane %v2146_v28, 4  ;;  %4701 = vmatprep.mubr.bf16.mxu0 %v6155_v45 }
 0x1a6   : > { %v2155_v0 = vrot.slane %v2153_v43, 4  ;;  %v8038_v58 = vld [vmem:[#allocation2 + $0x10] sm:$0xf]  ;;  %v1121_v63 = vor.u32 %v1119_v19, %v1118_v53  ;;  %v1123_v7 = vrot.slane %v1118_v53, 4  ;;  %4702 = vmatmul.mubr.bf16.vlgmr.msra.gmra.mrb[16].mxu0 %v6139_v23  ;;  %v8043_v47 = vrot.slane %v2164_v50, 4 }
 0x1a7   : > { %v8045_v8 = vrot.slane %v2167_v48, 5  ;;  %v1510_v9 = vld [vmem:[#allocation2 + $0x14] sm:$0x1]  ;;  %v1139_v13 = vsel %vm7934_vm12, %v1131_v59, %v1138_v49  ;;  %v1405_v40 = vsel %vm7940_vm13, %v1140_v57, %v1404_v18  ;;  %v6156_v17 = vcombine.low %v2093_v11, %v8034_v41  ;;  %6735 = vmatpush3.bf16.msra.mxu0 %v7218_v30  ;;  %v1913_v46 = vld [vmem:[#allocation2 + $0xc] sm:$0xe] }
 0x1a8   : > { %v2156_v14 = vor.u32 %v2155_v0, %v8032_v55  ;;  %1403 = vst [vmem:[#allocation2 + $0x4c] sm:$0xf] %v1139_v13  ;;  %1406 = vst [vmem:[#allocation2 + $0x50] sm:$0x1] %v1405_v40  ;;  %v1122_v21 = vsel %vm7934_vm12, %v1114_v25, %v1121_v63  ;;  %v1398_v22 = vsel %vm7940_vm13, %v1123_v7, %v1397_v38  ;;  %v1553_v23 = vshrl.u32 %v8027_v51, 16  ;;  %v8069_v63 = vpop.f32.mrb[15].mxu1 }
 0x1a9   : > { %v1556_v59 = vshll.u32 %v8027_v51, 16  ;;  %1396 = vst [vmem:[#allocation2 + $0x40] sm:$0xf] %v1122_v21  ;;  %1399 = vst [vmem:[#allocation2 + $0x44] sm:$0x1] %v1398_v22  ;;  %4709 = vmatprep.mubr.bf16.mxu0 %v6156_v17  ;;  %v1562_v11 = vshll.u32 %v8038_v58, 16  ;;  %v797_v0 = vmul.f32 %v7992_v31, %v7882_v32  ;;  %v795_v40 = vmul.f32 %v7882_v32, %v7996_v42 }
 0x1aa   : > { %v1566_v19 = vshrl.u32 %v8038_v58, 16  ;;  %v1572_v28 = vshll.u32 %v1510_v9, 16  ;;  %v8062_v29 = vrot.slane %v2156_v14, 4  ;;  %v1555_v30 = vrot.slane %v1553_v23, 4  ;;  %v8065_v43 = vld [vmem:[#allocation2 + $0x18] sm:$0xf] }
 0x1ab   : > { %v1558_v15 = vrot.slane %v1556_v59, 5  ;;  %v1988_v38 = vrot.slane %v8038_v58, 5  ;;  %v1564_v45 = vrot.slane %v1562_v11, 5  ;;  %v6060_v53 = vrot.slane %v1913_v46, 9  ;;  %v8075_v14 = vld [vmem:[#allocation2 + $0x1c] sm:$0xf] }
 0x1ac   : > { %v1568_v50 = vrot.slane %v1566_v19, 4  ;;  %v1574_v25 = vrot.slane %v1572_v28, 5  ;;  %v1991_v57 = vrot.slane %v1510_v9, 5  ;;  %v1577_v17 = vshrl.u32 %v8065_v43, 16  ;;  %v7225_v21 = vld [vmem:[#allocation8 + $0x1c8] sm:$0xff]  }
 0x1ad   : > { %v1559_v48 = vor.u32 %v1558_v15, %v1555_v30  ;;  %v1990_v49 = vrot.slane %v1988_v38, 4  ;;  %v1989_v13 = vsel %vm7865_vm5, %v6060_v53, %v1988_v38  ;;  %v836_v31 = vadd.f32 %v7887_v34, %v797_v0  ;;  %v8081_v23 = vld [vmem:[#allocation2 + $0x20] sm:$0x1]  ;;  %6736 = vmatprep.subr.bf16.mxu0 %v7225_v21 }
 0x1ae   : > { %v1569_v7 = vor.u32 %v1568_v50, %v1564_v45  ;;  %v1580_v59 = vshll.u32 %v8065_v43, 16  ;;  %v834_v19 = vadd.f32 %v7887_v34, %v795_v40  ;;  %v1579_v42 = vrot.slane %v1577_v17, 4  ;;  %v2095_v50 = vld [vmem:[#allocation2 + $0x24] sm:$0xf] }
 0x1af   : > { %v1560_v22 = vrot.slane %v1559_v48, 4  ;;  %v1992_v9 = vsel %vm7865_vm5, %v1990_v49, %v1991_v57  ;;  %v868_v30 = vmax.f32 %v836_v31, 0.0  ;;  %v1586_v38 = vshll.u32 %v8075_v14, 16  ;;  %v7226_v53 = vld [vmem:[#allocation8 + $0x188] sm:$0xff]  }
 0x1b0   : > { %v1570_v46 = vrot.slane %v1569_v7, 4  ;;  %v6140_v11 = vcombine.low %v1989_v13, %v1992_v9  ;;  %v1582_v15 = vrot.slane %v1580_v59, 5  ;;  %v866_v49 = vmax.f32 %v834_v19, 0.0  ;;  %v7227_v7 = vld [vmem:[#allocation8 + $0x168] sm:$0xff]   ;;  %6737 = vmatpush3.bf16.msra.mxu0 %v7226_v53 }
 0x1b1   : > { %v1565_v28 = vsel %vm7857_vm2, %v1560_v22, %v1564_v45  ;;  %v1590_v57 = vshrl.u32 %v8075_v14, 16  ;;  %v1596_v0 = vshll.u32 %v8081_v23, 16  ;;  %v6355_v40 = vpack.c.bf16 %v868_v30, %v868_v30  ;;  %v7230_v21 = vld [vmem:[#allocation8 + $0x128] sm:$0xff]   ;;  %6632 = vmatprep.subr.bf16.mxu1 %v7227_v7 }
 0x1b2   : > { %v1575_v48 = vsel %vm7857_vm2, %v1570_v46, %v1574_v25  ;;  %4710 = vmatmul.mubr.bf16.gmra.mrb[20].mxu0 %v6140_v11  ;;  %v1583_v17 = vor.u32 %v1582_v15, %v1579_v42  ;;  %v1588_v45 = vrot.slane %v1586_v38, 5  ;;  %v6108_v22 = vcombine.low %v8027_v51, %v8038_v58  ;;  %6633 = vmatpush3.bf16.msra.mxu1 %v7230_v21  ;;  %v8094_v38 = vld [vmem:[#allocation2 + $0x28] sm:$0xf] }
 0x1b3   : > { %v6124_v13 = vcombine.low %v1565_v28, %v1575_v48  ;;  %v6353_v9 = vpack.c.bf16 %v866_v49, %v866_v49  ;;  %v1592_v31 = vrot.slane %v1590_v57, 4  ;;  %v2188_v59 = vshrl.u32 %v2095_v50, 16  ;;  %v1914_v49 = vld [vmem:[#allocation2 + $0x18] sm:$0xe]  ;;  %v1414_v57 = vld [vmem:[#allocation2 + $0x60] sm:$0xf] }
 0x1b4   : > { %v1159_v25 = vshrl.u32 %v6355_v40, 16  ;;  %v1162_v46 = vshll.u32 %v6355_v40, 16  ;;  %v1584_v11 = vrot.slane %v1583_v17, 4  ;;  %v2191_v19 = vshll.u32 %v2095_v50, 16 }
 0x1b5   : > { %4548 = vmatprep.mubr.bf16.mxu1 %v6124_v13  ;;  %v1142_v28 = vshrl.u32 %v6353_v9, 16  ;;  %v1145_v30 = vshll.u32 %v6353_v9, 16  ;;  %v1593_v42 = vor.u32 %v1592_v31, %v1588_v45  ;;  %v1598_v15 = vrot.slane %v1596_v0, 5  ;;  %v7233_v31 = vld [vmem:[#allocation8 + $0x1d0] sm:$0xff]  }
 0x1b6   : > { %4549 = vmatmul.mubr.bf16.gmra.mrb[20].mxu1 %v6108_v22  ;;  %v8096_v53 = vrot.slane %v1159_v25, 7  ;;  %v1589_v51 = vsel %vm7857_vm2, %v1584_v11, %v1588_v45  ;;  %v8100_v58 = vrot.slane %v2188_v59, 4  ;;  %v8102_v48 = vrot.slane %v2191_v19, 5  ;;  %v1407_v22 = vld [vmem:[#allocation2 + $0x54] sm:$0xf]  ;;  %v7234_v59 = vld [vmem:[#allocation8 + $0x190] sm:$0xff]   ;;  %6738 = vmatprep.subr.bf16.mxu0 %v7233_v31 }
 0x1b7   : > { %v8104_v7 = vrot.slane %v1142_v28, 7  ;;  %v1594_v13 = vrot.slane %v1593_v42, 4  ;;  %v6157_v40 = vcombine.low %v2095_v50, %v8094_v38  ;;  %v798_v0 = vmul.f32 %v8002_v56, %v7882_v32  ;;  %6739 = vmatpush3.bf16.msra.mxu0 %v7234_v59  ;;  %v1418_v45 = vld [vmem:[#allocation2 + $0x68] sm:$0x1] }
 0x1b8   : > { %v1164_v17 = vor.u32 %v1162_v46, %v8096_v53  ;;  %v1165_v21 = vrot.slane %v8096_v53, 4  ;;  %v796_v9 = vmul.f32 %v7882_v32, %v8007_v1  ;;  %v6061_v11 = vrot.slane %v1914_v49, 9  ;;  %v8118_v46 = vld [vmem:[#allocation2 + $0x30] sm:$0xf]  ;;  %v8124_v1 = vld [vmem:[#allocation2 + $0x34] sm:$0xf] }
 0x1b9   : > { %v1147_v25 = vor.u32 %v1145_v30, %v8104_v7  ;;  %v1599_v50 = vsel %vm7857_vm2, %v1594_v13, %v1598_v15  ;;  %4717 = vmatprep.mubr.bf16.mxu0 %v6157_v40  ;;  %v837_v56 = vadd.f32 %v7887_v34, %v798_v0  ;;  %v1995_v32 = vrot.slane %v8075_v14, 5  ;;  %9977 = vst [vmem:[#allocation18_spill] sm:$0xff] %v8124_v1  ;;  %v7235_v30 = vld [vmem:[#allocation8 + $0x170] sm:$0xff]  }
 0x1ba   : > { %v1415_v19 = vsel %vm7925_vm11, %v1164_v17, %v1414_v57  ;;  %v6125_v28 = vcombine.low %v1589_v51, %v1599_v50  ;;  %v835_v42 = vadd.f32 %v7887_v34, %v796_v9  ;;  %v6109_v40 = vcombine.low %v8065_v43, %v8075_v14  ;;  %v8131_v57 = vld [vmem:[#allocation2 + $0x24] sm:$0xf]  ;;  %v7238_v34 = vld [vmem:[#allocation8 + $0x130] sm:$0xff]   ;;  %6634 = vmatprep.subr.bf16.mxu1 %v7235_v30 }
 0x1bb   : > { %1416 = vst [vmem:[#allocation2 + $0x60] sm:$0xf] %v1415_v19  ;;  %v1408_v49 = vsel %vm7925_vm11, %v1147_v25, %v1407_v22  ;;  %v869_v13 = vmax.f32 %v837_v56, 0.0  ;;  %v1997_v0 = vrot.slane %v1995_v32, 4  ;;  %v1998_v17 = vrot.slane %v8081_v23, 5  ;;  %6635 = vmatpush3.bf16.msra.mxu1 %v7238_v34 }
 0x1bc   : > { %1409 = vst [vmem:[#allocation2 + $0x54] sm:$0xf] %v1408_v49  ;;  %4556 = vmatprep.mubr.bf16.mxu1 %v6125_v28  ;;  %v867_v51 = vmax.f32 %v835_v42, 0.0  ;;  %v2212_v9 = vshrl.u32 %v8118_v46, 16  ;;  %v1996_v22 = vsel %vm7865_vm5, %v6061_v11, %v1995_v32  ;;  %v2215_v43 = vshll.u32 %v8118_v46, 16 }
 0x1bd   : > { %v6356_v31 = vpack.c.bf16 %v869_v13, %v869_v13  ;;  %v1999_v25 = vsel %vm7865_vm5, %v1997_v0, %v1998_v17  ;;  %v6158_v50 = vcombine.low %v8118_v46, %v8124_v1  ;;  %v8143_v23 = vld [vmem:[#allocation2 + $0x28] sm:$0xf]  ;;  %v1512_v56 = vld [vmem:[#allocation2 + $0x2c] sm:$0x1]  ;;  %v1601_v19 = vshrl.u32 %v8131_v57, 16 }
 0x1be   : > { %4557 = vmatmul.mubr.bf16.gmra.mrb[24].mxu1 %v6109_v40  ;;  %v6354_v59 = vpack.c.bf16 %v867_v51, %v867_v51  ;;  %v6141_v42 = vcombine.low %v1996_v22, %v1999_v25  ;;  %v8146_v32 = vrot.slane %v2212_v9, 4  ;;  %v1915_v30 = vld [vmem:[#allocation2 + $0x24] sm:$0xe]  ;;  %v1604_v51 = vshll.u32 %v8131_v57, 16 }
 0x1bf   : > { %v1167_v28 = vshrl.u32 %v6356_v31, 16  ;;  %v1170_v11 = vshll.u32 %v6356_v31, 16  ;;  %v1603_v40 = vrot.slane %v1601_v19, 4  ;;  %v1610_v46 = vshll.u32 %v8143_v23, 16 }
 0x1c0   : > { %v1150_v49 = vshrl.u32 %v6354_v59, 16  ;;  %v1153_v13 = vshll.u32 %v6354_v59, 16  ;;  %4718 = vmatmul.mubr.bf16.gmra.mrb[24].mxu0 %v6141_v42  ;;  %v1614_v17 = vshrl.u32 %v8143_v23, 16  ;;  %v1620_v14 = vshll.u32 %v1512_v56, 16  ;;  %v1411_v59 = vld [vmem:[#allocation2 + $0x5c] sm:$0x1] }
 0x1c1   : > { %v1169_v0 = vrot.slane %v1167_v28, 7  ;;  %4725 = vmatprep.mubr.bf16.mxu0 %v6158_v50  ;;  %v1606_v31 = vrot.slane %v1604_v51, 5  ;;  %v6062_v22 = vrot.slane %v1915_v30, 9  ;;  %v2002_v9 = vrot.slane %v8143_v23, 5 }
 0x1c2   : > { %v1152_v34 = vrot.slane %v1150_v49, 7  ;;  %v1612_v19 = vrot.slane %v1610_v46, 5  ;;  %v1616_v5 = vrot.slane %v1614_v17, 4  ;;  %v1622_v15 = vrot.slane %v1620_v14, 5  ;;  %v8160_v49 = vld [vmem:[#allocation2 + $0x30] sm:$0xf] }
 0x1c3   : > { %v1172_v25 = vor.u32 %v1170_v11, %v1169_v0  ;;  %v1174_v18 = vrot.slane %v1169_v0, 4  ;;  %v1607_v42 = vor.u32 %v1606_v31, %v1603_v40  ;;  %v2003_v11 = vsel %vm7865_vm5, %v6062_v22, %v2002_v9  ;;  %v7242_v0 = vld [vmem:[#allocation8 + $0x198] sm:$0xff]  }
 0x1c4   : > { %v1155_v61 = vor.u32 %v1153_v13, %v1152_v34  ;;  %v1157_v28 = vrot.slane %v1152_v34, 4  ;;  %v1617_v30 = vor.u32 %v1616_v5, %v1612_v19  ;;  %v9978_v13 = vrot.slane %v8104_v7, 4  ;;  %v1428_v7 = vld [vmem:[#allocation2 + $0x78] sm:$0xf] }
 0x1c5   : > { %v1173_v1 = vsel %vm7934_vm12, %v1165_v21, %v1172_v25  ;;  %v1419_v50 = vsel %vm7940_vm13, %v1174_v18, %v1418_v45  ;;  %v1608_v21 = vrot.slane %v1607_v42, 4  ;;  %v2004_v40 = vrot.slane %v2002_v9, 4  ;;  %v8186_v9 = vld [vmem:[#allocation2 + $0x38] sm:$0x1]  ;;  %v2099_v42 = vld [vmem:[#allocation2 + $0x3c] sm:$0xf] }
 0x1c6   : > { %1417 = vst [vmem:[#allocation2 + $0x64] sm:$0xf] %v1173_v1  ;;  %1420 = vst [vmem:[#allocation2 + $0x68] sm:$0x1] %v1419_v50  ;;  %v1156_v14 = vsel %vm7934_vm12, %v9978_v13, %v1155_v61  ;;  %v1412_v53 = vsel %vm7940_vm13, %v1157_v28, %v1411_v59  ;;  %v1618_v5 = vrot.slane %v1617_v30, 4  ;;  %v2005_v18 = vrot.slane %v1512_v56, 5 }
 0x1c7   : > { %1410 = vst [vmem:[#allocation2 + $0x58] sm:$0xf] %v1156_v14  ;;  %1413 = vst [vmem:[#allocation2 + $0x5c] sm:$0x1] %v1412_v53  ;;  %v1193_v45 = vshrl.u32 %v7909_v2, 16  ;;  %v1196_v51 = vshll.u32 %v7909_v2, 16  ;;  %v1613_v61 = vsel %vm7857_vm2, %v1608_v21, %v1612_v19  ;;  %v6110_v13 = vcombine.low %v8131_v57, %v8143_v23 }
 0x1c8   : > { %v7241_v1 = vld [vmem:[#allocation8 + $0x1d8] sm:$0xff]   ;;  %v8170_v46 = vrot.slane %v2215_v43, 5  ;;  %v9979_v17 = vmax.f32 %v7901_v54, 0.0  ;;  %v1625_v31 = vshrl.u32 %v8160_v49, 16  ;;  %v1623_v56 = vsel %vm7857_vm2, %v1618_v5, %v1622_v15  ;;  %v7244_v15 = vld [vmem:[#allocation8 + $0x1e0] sm:$0xff]  }
 0x1c9   : > { %v2006_v2 = vsel %vm7865_vm5, %v2004_v40, %v2005_v18  ;;  %v8182_v22 = vrot.slane %v1193_v45, 7  ;;  %v8184_v43 = vld [vmem:[#allocation2 + $0x34] sm:$0xf]  ;;  %v1628_v25 = vshll.u32 %v8160_v49, 16  ;;  %6740 = vmatprep.subr.bf16.mxu0 %v7241_v1  ;;  %v6126_v54 = vcombine.low %v1613_v61, %v1623_v56  ;;  %v7248_v40 = vld [vmem:[#allocation8 + $0x1a0] sm:$0xff]  }
 0x1ca   : > { %v6357_v34 = vpack.c.bf16 %v9979_v17, %v9979_v17  ;;  %v6142_v59 = vcombine.low %v2003_v11, %v2006_v2  ;;  %6741 = vmatpush3.bf16.msra.mxu0 %v7242_v0  ;;  %v7243_v50 = vld [vmem:[#allocation8 + $0x178] sm:$0xff]   ;;  %v1627_v14 = vrot.slane %v1625_v31, 4  ;;  %v1634_v11 = vshll.u32 %v8184_v43, 16  ;;  %v1421_v1 = vld [vmem:[#allocation2 + $0x6c] sm:$0xf] }
 0x1cb   : > { %v1198_v30 = vor.u32 %v1196_v51, %v8182_v22  ;;  %v1630_v53 = vrot.slane %v1628_v25, 5  ;;  %v7247_v21 = vld [vmem:[#allocation8 + $0x138] sm:$0xff]   ;;  %4564 = vmatprep.mubr.bf16.mxu1 %v6126_v54  ;;  %v1638_v18 = vshrl.u32 %v8184_v43, 16  ;;  %v1644_v45 = vshll.u32 %v8186_v9, 16  ;;  %6636 = vmatprep.subr.bf16.mxu1 %v7243_v50  ;;  %v8201_v2 = vld [vmem:[#allocation2 + $0x40] sm:$0xf] }
 0x1cc   : > { %v1176_v19 = vshrl.u32 %v6357_v34, 16  ;;  %v1179_v28 = vshll.u32 %v6357_v34, 16  ;;  %4726 = vmatmul.mubr.bf16.gmra.mrb[28].mxu0 %v6142_v59  ;;  %4565 = vmatmul.mubr.bf16.gmra.mrb[28].mxu1 %v6110_v13  ;;  %v2236_v23 = vshrl.u32 %v2099_v42, 16  ;;  %v2239_v0 = vshll.u32 %v2099_v42, 16  ;;  %v1916_v61 = vld [vmem:[#allocation2 + $0x30] sm:$0xe] }
 0x1cd   : > { %v1429_v51 = vsel %vm7925_vm11, %v1198_v30, %v1428_v7  ;;  %v1631_v57 = vor.u32 %v1630_v53, %v1627_v14  ;;  %v1199_v17 = vrot.slane %v8182_v22, 4  ;;  %v1636_v31 = vrot.slane %v1634_v11, 5  ;;  %6742 = vmatprep.subr.bf16.mxu0 %v7244_v15  ;;  %6637 = vmatpush3.bf16.msra.mxu1 %v7247_v21  ;;  %v2101_v13 = vld [vmem:[#allocation2 + $0x48] sm:$0xf]  ;;  %v8226_v15 = vld [vmem:[#allocation2 + $0x40] sm:$0xf] }
 0x1ce   : > { %v8192_v5 = vrot.slane %v1176_v19, 7  ;;  %1430 = vst [vmem:[#allocation2 + $0x78] sm:$0xf] %v1429_v51  ;;  %v1640_v56 = vrot.slane %v1638_v18, 4  ;;  %v1646_v54 = vrot.slane %v1644_v45, 5  ;;  %v8204_v59 = vrot.slane %v2236_v23, 4  ;;  %6743 = vmatpush3.bf16.msra.mxu0 %v7248_v40 }
 0x1cf   : > { %v1632_v25 = vrot.slane %v1631_v57, 4  ;;  %v8208_v30 = vrot.slane %v2239_v0, 5  ;;  %v9980_v14 = vmax.f32 %v7907_v62, 0.0  ;;  %v871_v21 = vmax.f32 %v7912_v3, 0.0  ;;  %v7249_v51 = vld [vmem:[#allocation8 + $0x1e8] sm:$0xff]   ;;  %v7251_v57 = vld [vmem:[#allocation8 + $0x1f0] sm:$0xff]  }
 0x1d0   : > { %v1181_v34 = vor.u32 %v1179_v28, %v8192_v5  ;;  %v1641_v50 = vor.u32 %v1640_v56, %v1636_v31  ;;  %v6159_v28 = vcombine.low %v2099_v42, %v8201_v2  ;;  %v6063_v11 = vrot.slane %v1916_v61, 9  ;;  %v1432_v61 = vld [vmem:[#allocation2 + $0x80] sm:$0x1]  ;;  %6744 = vmatprep.subr.bf16.mxu0 %v7249_v51  ;;  %v7254_v7 = vld [vmem:[#allocation8 + $0x1f8] sm:$0xff]   ;;  %v7257_v22 = vld [vmem:[#allocation8 + $0x200] sm:$0xff]  }
 0x1d1   : > { %v6360_v53 = vpack.c.bf16 %v9980_v14, %v9980_v14  ;;  %v1637_v40 = vsel %vm7857_vm2, %v1632_v25, %v1636_v31  ;;  %v2009_v45 = vrot.slane %v8184_v43, 5  ;;  %v2012_v42 = vrot.slane %v8186_v9, 5  ;;  %6942 = vmatprep.subr.bf16.mxu1 %v7257_v22 }
 0x1d2   : > { %v1422_v19 = vsel %vm7925_vm11, %v1181_v34, %v1421_v1  ;;  %v1642_v18 = vrot.slane %v1641_v50, 4  ;;  %4733 = vmatprep.mubr.bf16.mxu0 %v6159_v28  ;;  %v7250_v1 = vld [vmem:[#allocation8 + $0x1a8] sm:$0xff]   ;;  %v6358_v62 = vpack.c.bf16 %v871_v21, %v871_v21  ;;  %v2260_v34 = vshrl.u32 %v2101_v13, 16 }
 0x1d3   : > { %1423 = vst [vmem:[#allocation2 + $0x6c] sm:$0xf] %v1422_v19  ;;  %v1201_v23 = vshrl.u32 %v6360_v53, 16  ;;  %v1204_v0 = vshll.u32 %v6360_v53, 16  ;;  %v2010_v31 = vsel %vm7865_vm5, %v6063_v11, %v2009_v45  ;;  %v2011_v56 = vrot.slane %v2009_v45, 4  ;;  %6745 = vmatpush3.bf16.msra.mxu0 %v7250_v1 }
 0x1d4   : > { %v1647_v3 = vsel %vm7857_vm2, %v1642_v18, %v1646_v54  ;;  %v2263_v25 = vshll.u32 %v2101_v13, 16  ;;  %v8224_v19 = vld [vmem:[#allocation2 + $0x3c] sm:$0xf]  ;;  %v1184_v28 = vshrl.u32 %v6358_v62, 16  ;;  %v1187_v14 = vshll.u32 %v6358_v62, 16  ;;  %6746 = vmatprep.subr.bf16.mxu0 %v7251_v57 }
 0x1d5   : > { %v6127_v9 = vcombine.low %v1637_v40, %v1647_v3  ;;  %v1203_v50 = vrot.slane %v1201_v23, 7  ;;  %v1425_v53 = vld [vmem:[#allocation2 + $0x74] sm:$0x1]  ;;  %v2013_v54 = vsel %vm7865_vm5, %v2011_v56, %v2012_v42  ;;  %v6111_v21 = vcombine.low %v8160_v49, %v8184_v43  ;;  %v1917_v45 = vld [vmem:[#allocation2 + $0x3c] sm:$0xe]  ;;  %v7253_v40 = vld [vmem:[#allocation8 + $0x1b0] sm:$0xff]  }
 0x1d6   : > { %v8232_v11 = vrot.slane %v2260_v34, 4  ;;  %v8234_v18 = vrot.slane %v2263_v25, 5  ;;  %v1186_v62 = vrot.slane %v1184_v28, 7  ;;  %v6143_v3 = vcombine.low %v2010_v31, %v2013_v54  ;;  %v8236_v1 = vld [vmem:[#allocation2 + $0x4c] sm:$0xf]  ;;  %v7255_v54 = vld [vmem:[#allocation8 + $0x1b8] sm:$0xff]  }
 0x1d7   : > { %4572 = vmatprep.mubr.bf16.mxu1 %v6127_v9  ;;  %v1206_v51 = vor.u32 %v1204_v0, %v1203_v50  ;;  %v1208_v23 = vrot.slane %v1203_v50, 4  ;;  %9981 = vst [vmem:[#allocation19_spill] sm:$0xff] %v8236_v1  ;;  %v6160_v42 = vcombine.low %v2101_v13, %v8236_v1  ;;  %v1514_v56 = vld [vmem:[#allocation2 + $0x44] sm:$0x1]  ;;  %v1649_v49 = vshrl.u32 %v8224_v19, 16  ;;  %6747 = vmatpush3.bf16.msra.mxu0 %v7253_v40 }
 0x1d8   : > { %4573 = vmatmul.mubr.bf16.gmra.mrb[32].mxu1 %v6111_v21  ;;  %v1652_v43 = vshll.u32 %v8224_v19, 16  ;;  %v1658_v34 = vshll.u32 %v8226_v15, 16  ;;  %v1189_v31 = vor.u32 %v1187_v14, %v1186_v62  ;;  %v1191_v25 = vrot.slane %v1186_v62, 4  ;;  %4734 = vmatmul.mubr.bf16.gmra.mrb[32].mxu0 %v6143_v3 }
 0x1d9   : > { %v1207_v57 = vsel %vm7934_vm12, %v1199_v17, %v1206_v51  ;;  %v1433_v0 = vsel %vm7940_vm13, %v1208_v23, %v1432_v61  ;;  %4741 = vmatprep.mubr.bf16.mxu0 %v6160_v42  ;;  %v1651_v13 = vrot.slane %v1649_v49, 4  ;;  %v1662_v28 = vshrl.u32 %v8226_v15, 16  ;;  %6748 = vmatprep.subr.bf16.mxu0 %v7254_v7  ;;  %v8256_v42 = vld [vmem:[#allocation2 + $0x48] sm:$0xf]  ;;  %v8261_v49 = vld [vmem:[%s9920_s4] ss:$0 sm:$0xff] }
 0x1da   : > { %1431 = vst [vmem:[#allocation2 + $0x7c] sm:$0xf] %v1207_v57  ;;  %1434 = vst [vmem:[#allocation2 + $0x80] sm:$0x1] %v1433_v0  ;;  %v1654_v9 = vrot.slane %v1652_v43, 5  ;;  %v1660_v50 = vrot.slane %v1658_v34, 5  ;;  %v1426_v61 = vsel %vm7940_vm13, %v1191_v25, %v1425_v53  ;;  %v805_v53 = vmul.f32 %v8261_v49, %v7915_v10 }
 0x1db   : > { %v9982_v21 = vrot.slane %v8192_v5, 4  ;;  %v1668_v14 = vshll.u32 %v1514_v56, 16  ;;  %v6064_v51 = vrot.slane %v1917_v45, 9  ;;  %1427 = vst [vmem:[#allocation2 + $0x74] sm:$0x1] %v1426_v61  ;;  %v1664_v62 = vrot.slane %v1662_v28, 4  ;;  %6749 = vmatpush3.bf16.msra.mxu0 %v7255_v54 }
 0x1dc   : > { %v1655_v23 = vor.u32 %v1654_v9, %v1651_v13  ;;  %v2016_v3 = vrot.slane %v8226_v15, 5  ;;  %v2019_v40 = vrot.slane %v1514_v56, 5  ;;  %v6112_v7 = vcombine.low %v8224_v19, %v8226_v15  ;;  %v8269_v43 = vld [vmem:[#allocation2 + $0x4c] sm:$0xf]  ;;  %v8286_v28 = vld [vmem:[#allocation2 + $0x50] sm:$0x1] }
 0x1dd   : > { %v1190_v17 = vsel %vm7934_vm12, %v9982_v21, %v1189_v31  ;;  %v1670_v5 = vrot.slane %v1668_v14, 5  ;;  %v803_v45 = vmul.f32 %v8261_v49, %v7918_v16  ;;  %v1665_v34 = vor.u32 %v1664_v62, %v1660_v50  ;;  %v8276_v31 = vld [vmem:[%s9921_s5] ss:$0 sm:$0xff]  ;;  %v2103_v14 = vld [vmem:[#allocation2 + $0x54] sm:$0xf] }
 0x1de   : > { %1424 = vst [vmem:[#allocation2 + $0x70] sm:$0xf] %v1190_v17  ;;  %v1656_v56 = vrot.slane %v1655_v23, 4  ;;  %v2017_v57 = vsel %vm7865_vm5, %v6064_v51, %v2016_v3  ;;  %v2018_v0 = vrot.slane %v2016_v3, 4  ;;  %v844_v10 = vadd.f32 %v8276_v31, %v805_v53 }
 0x1df   : > { %v842_v15 = vadd.f32 %v8276_v31, %v803_v45  ;;  %v1673_v16 = vshrl.u32 %v8256_v42, 16  ;;  %v1676_v19 = vshll.u32 %v8256_v42, 16  ;;  %v1666_v13 = vrot.slane %v1665_v34, 4 }
 0x1e0   : > { %v1661_v25 = vsel %vm7857_vm2, %v1656_v56, %v1660_v50  ;;  %v2020_v9 = vsel %vm7865_vm5, %v2018_v0, %v2019_v40  ;;  %v1682_v54 = vshll.u32 %v8269_v43, 16  ;;  %v876_v21 = vmax.f32 %v844_v10, 0.0 }
 0x1e1   : > { %v6144_v22 = vcombine.low %v2017_v57, %v2020_v9  ;;  %v874_v17 = vmax.f32 %v842_v15, 0.0  ;;  %v1675_v61 = vrot.slane %v1673_v16, 4  ;;  %v1671_v51 = vsel %vm7857_vm2, %v1666_v13, %v1670_v5 }
 0x1e2   : > { %v1678_v23 = vrot.slane %v1676_v19, 5  ;;  %v1684_v62 = vrot.slane %v1682_v54, 5  ;;  %v1686_v50 = vshrl.u32 %v8269_v43, 16  ;;  %v6128_v3 = vcombine.low %v1661_v25, %v1671_v51  ;;  %v8294_v54 = vld [vmem:[#allocation2 + $0x58] sm:$0xf] }
 0x1e3   : > { %4742 = vmatmul.mubr.bf16.gmra.mrb[36].mxu0 %v6144_v22  ;;  %v6363_v53 = vpack.c.bf16 %v876_v21, %v876_v21  ;;  %v6361_v40 = vpack.c.bf16 %v874_v17, %v874_v17  ;;  %v1692_v45 = vshll.u32 %v8286_v28, 16  ;;  %v2284_v57 = vshrl.u32 %v2103_v14, 16  ;;  %9983 = vst [vmem:[#allocation20_spill] sm:$0xff] %v8294_v54  ;;  %v1918_v51 = vld [vmem:[#allocation2 + $0x48] sm:$0xe] }
 0x1e4   : > { %v1679_v56 = vor.u32 %v1678_v23, %v1675_v61  ;;  %v1688_v34 = vrot.slane %v1686_v50, 4  ;;  %v2287_v0 = vshll.u32 %v2103_v14, 16  ;;  %4580 = vmatprep.mubr.bf16.mxu1 %v6128_v3  ;;  %v1442_v23 = vld [vmem:[#allocation2 + $0x90] sm:$0xf]  ;;  %v1435_v50 = vld [vmem:[#allocation2 + $0x84] sm:$0xf] }
 0x1e5   : > { %v1227_v10 = vshrl.u32 %v6363_v53, 16  ;;  %v1230_v15 = vshll.u32 %v6363_v53, 16  ;;  %v1210_v16 = vshrl.u32 %v6361_v40, 16  ;;  %v1213_v9 = vshll.u32 %v6361_v40, 16  ;;  %4581 = vmatmul.mubr.bf16.gmra.mrb[36].mxu1 %v6112_v7 }
 0x1e6   : > { %v1680_v19 = vrot.slane %v1679_v56, 4  ;;  %v1689_v13 = vor.u32 %v1688_v34, %v1684_v62  ;;  %v1694_v25 = vrot.slane %v1692_v45, 5  ;;  %v8300_v17 = vrot.slane %v2284_v57, 4 }
 0x1e7   : > { %v8296_v22 = vrot.slane %v1227_v10, 7  ;;  %v8298_v21 = vrot.slane %v1210_v16, 7  ;;  %v8302_v61 = vrot.slane %v2287_v0, 5  ;;  %v6161_v53 = vcombine.low %v2103_v14, %v8294_v54  ;;  %v8318_v16 = vld [vmem:[#allocation2 + $0x60] sm:$0xf] }
 0x1e8   : > { %9984 = vst [vmem:[#allocation21_spill] sm:$0xff] %v8300_v17  ;;  %v1685_v3 = vsel %vm7857_vm2, %v1680_v19, %v1684_v62  ;;  %v1690_v7 = vrot.slane %v1689_v13, 4  ;;  %v806_v40 = vmul.f32 %v8261_v49, %v7921_v26  ;;  %v804_v14 = vmul.f32 %v8261_v49, %v7930_v35  ;;  %v8325_v13 = vld [vmem:[#allocation2 + $0x64] sm:$0xf]  ;;  %v1439_v54 = vld [vmem:[#allocation2 + $0x8c] sm:$0x1] }
 0x1e9   : > { %9985 = vst [vmem:[#allocation22_spill] sm:$0xff] %v8302_v61  ;;  %v1232_v45 = vor.u32 %v1230_v15, %v8296_v22  ;;  %v1215_v34 = vor.u32 %v1213_v9, %v8298_v21  ;;  %4749 = vmatprep.mubr.bf16.mxu0 %v6161_v53  ;;  %v6065_v10 = vrot.slane %v1918_v51, 9  ;;  %v2023_v19 = vrot.slane %v8269_v43, 5  ;;  %9986 = vst [vmem:[#allocation23_spill] sm:$0xff] %v8325_v13  ;;  %v8331_v53 = vld [vmem:[#allocation2 + $0x54] sm:$0xf] }
 0x1ea   : > { %v1695_v0 = vsel %vm7857_vm2, %v1690_v7, %v1694_v25  ;;  %v845_v62 = vadd.f32 %v8276_v31, %v806_v40  ;;  %v843_v7 = vadd.f32 %v8276_v31, %v804_v14  ;;  %v2026_v35 = vrot.slane %v8286_v28, 5  ;;  %v1516_v14 = vld [vmem:[#allocation2 + $0x5c] sm:$0x1] }
 0x1eb   : > { %v1443_v26 = vsel %vm7925_vm11, %v1232_v45, %v1442_v23  ;;  %v1436_v15 = vsel %vm7925_vm11, %v1215_v34, %v1435_v50  ;;  %v6129_v9 = vcombine.low %v1685_v3, %v1695_v0  ;;  %v6113_v51 = vcombine.low %v8256_v42, %v8269_v43  ;;  %v1446_v0 = vld [vmem:[#allocation2 + $0x98] sm:$0x1] }
 0x1ec   : > { %1444 = vst [vmem:[#allocation2 + $0x90] sm:$0xf] %v1443_v26  ;;  %1437 = vst [vmem:[#allocation2 + $0x84] sm:$0xf] %v1436_v15  ;;  %v877_v25 = vmax.f32 %v845_v62, 0.0  ;;  %v1216_v23 = vrot.slane %v8298_v21, 4  ;;  %v2024_v50 = vsel %vm7865_vm5, %v6065_v10, %v2023_v19  ;;  %v6162_v21 = vcombine.low %v8318_v16, %v8325_v13 }
 0x1ed   : > { %4588 = vmatprep.mubr.bf16.mxu1 %v6129_v9  ;;  %v2025_v3 = vrot.slane %v2023_v19, 4  ;;  %v2308_v40 = vshrl.u32 %v8318_v16, 16  ;;  %v875_v34 = vmax.f32 %v843_v7, 0.0  ;;  %v8339_v62 = vld [vmem:[#allocation2 + $0x58] sm:$0xf]  ;;  %v1697_v10 = vshrl.u32 %v8331_v53, 16 }
 0x1ee   : > { %v6364_v45 = vpack.c.bf16 %v877_v25, %v877_v25  ;;  %4589 = vmatmul.mubr.bf16.gmra.mrb[40].mxu1 %v6113_v51  ;;  %v1919_v25 = vld [vmem:[#allocation2 + $0x54] sm:$0xe]  ;;  %v1700_v51 = vshll.u32 %v8331_v53, 16  ;;  %v1706_v28 = vshll.u32 %v8339_v62, 16  ;;  %v1716_v5 = vshll.u32 %v1516_v14, 16 }
 0x1ef   : > { %v2027_v42 = vsel %vm7865_vm5, %v2025_v3, %v2026_v35  ;;  %v8343_v43 = vrot.slane %v2308_v40, 4  ;;  %v6362_v9 = vpack.c.bf16 %v875_v34, %v875_v34  ;;  %v1699_v7 = vrot.slane %v1697_v10, 4 }
 0x1f0   : > { %v1235_v26 = vshrl.u32 %v6364_v45, 16  ;;  %v1238_v15 = vshll.u32 %v6364_v45, 16  ;;  %v6145_v19 = vcombine.low %v2024_v50, %v2027_v42  ;;  %v1710_v35 = vshrl.u32 %v8339_v62, 16 }
 0x1f1   : > { %9987 = vst [vmem:[#allocation24_spill] sm:$0xff] %v8343_v43  ;;  %v1218_v40 = vshrl.u32 %v6362_v9, 16  ;;  %v1221_v57 = vshll.u32 %v6362_v9, 16  ;;  %v1702_v56 = vrot.slane %v1700_v51, 5  ;;  %v1708_v13 = vrot.slane %v1706_v28, 5 }
 0x1f2   : > { %v1237_v3 = vrot.slane %v1235_v26, 7  ;;  %4750 = vmatmul.mubr.bf16.gmra.mrb[40].mxu0 %v6145_v19  ;;  %v1712_v45 = vrot.slane %v1710_v35, 4  ;;  %v6066_v34 = vrot.slane %v1919_v25, 9  ;;  %v1718_v43 = vrot.slane %v1716_v5, 5  ;;  %v8360_v51 = vld [vmem:[#allocation2 + $0x60] sm:$0xf] }
 0x1f3   : > { %4757 = vmatprep.mubr.bf16.mxu0 %v6162_v21  ;;  %v1220_v10 = vrot.slane %v1218_v40, 7  ;;  %v1703_v61 = vor.u32 %v1702_v56, %v1699_v7  ;;  %v2030_v1 = vrot.slane %v8339_v62, 5  ;;  %v2033_v26 = vrot.slane %v1516_v14, 5  ;;  %v2107_v35 = vld [vmem:[#allocation2 + $0x6c] sm:$0xf] }
 0x1f4   : > { %v1240_v50 = vor.u32 %v1238_v15, %v1237_v3  ;;  %v1242_v42 = vrot.slane %v1237_v3, 4  ;;  %v1713_v17 = vor.u32 %v1712_v45, %v1708_v13  ;;  %v9988_v9 = vrot.slane %v8296_v22, 4 }
 0x1f5   : > { %v1223_v21 = vor.u32 %v1221_v57, %v1220_v10  ;;  %v1225_v25 = vrot.slane %v1220_v10, 4  ;;  %v1704_v15 = vrot.slane %v1703_v61, 4  ;;  %v2031_v56 = vsel %vm7865_vm5, %v6066_v34, %v2030_v1  ;;  %v8370_v61 = vld [vmem:[#allocation2 + $0x64] sm:$0xf] }
 0x1f6   : > { %v1241_v19 = vsel %vm7934_vm12, %v9988_v9, %v1240_v50  ;;  %v1447_v28 = vsel %vm7940_vm13, %v1242_v42, %v1446_v0  ;;  %v1714_v5 = vrot.slane %v1713_v17, 4  ;;  %v2032_v7 = vrot.slane %v2030_v1, 4 }
 0x1f7   : > { %1445 = vst [vmem:[#allocation2 + $0x94] sm:$0xf] %v1241_v19  ;;  %1448 = vst [vmem:[#allocation2 + $0x98] sm:$0x1] %v1447_v28  ;;  %v1224_v22 = vsel %vm7934_vm12, %v1216_v23, %v1223_v21  ;;  %v1440_v14 = vsel %vm7940_vm13, %v1225_v25, %v1439_v54  ;;  %v809_v57 = vmul.f32 %v8261_v49, %v7952_v4  ;;  %v8380_v4 = vld [vmem:[#allocation2 + $0x68] sm:$0x1] }
 0x1f8   : > { %v6114_v0 = vcombine.low %v8331_v53, %v8339_v62  ;;  %1438 = vst [vmem:[#allocation2 + $0x88] sm:$0xf] %v1224_v22  ;;  %1441 = vst [vmem:[#allocation2 + $0x8c] sm:$0x1] %v1440_v14  ;;  %v1709_v1 = vsel %vm7857_vm2, %v1704_v15, %v1708_v13  ;;  %v1719_v17 = vsel %vm7857_vm2, %v1714_v5, %v1718_v43  ;;  %v1721_v40 = vshrl.u32 %v8360_v51, 16 }
 0x1f9   : > { %v2034_v23 = vsel %vm7865_vm5, %v2032_v7, %v2033_v26  ;;  %v807_v54 = vmul.f32 %v8261_v49, %v7958_v12  ;;  %v6130_v53 = vcombine.low %v1709_v1, %v1719_v17  ;;  %v848_v3 = vadd.f32 %v8276_v31, %v809_v57  ;;  %v8389_v21 = vld [vmem:[#allocation2 + $0x70] sm:$0xf]  ;;  %v1920_v17 = vld [vmem:[#allocation2 + $0x60] sm:$0xe] }
 0x1fa   : > { %v6146_v62 = vcombine.low %v2031_v56, %v2034_v23  ;;  %v1724_v45 = vshll.u32 %v8360_v51, 16  ;;  %v1730_v43 = vshll.u32 %v8370_v61, 16  ;;  %v1734_v34 = vshrl.u32 %v8370_v61, 16 }
 0x1fb   : > { %v846_v13 = vadd.f32 %v8276_v31, %v807_v54  ;;  %4596 = vmatprep.mubr.bf16.mxu1 %v6130_v53  ;;  %v880_v12 = vmax.f32 %v848_v3, 0.0  ;;  %v1723_v50 = vrot.slane %v1721_v40, 4  ;;  %v1740_v42 = vshll.u32 %v8380_v4, 16 }
 0x1fc   : > { %4758 = vmatmul.mubr.bf16.gmra.mrb[44].mxu0 %v6146_v62  ;;  %v2332_v10 = vshrl.u32 %v2107_v35, 16  ;;  %4597 = vmatmul.mubr.bf16.gmra.mrb[44].mxu1 %v6114_v0  ;;  %v1726_v9 = vrot.slane %v1724_v45, 5  ;;  %v1732_v19 = vrot.slane %v1730_v43, 5  ;;  %v1736_v28 = vrot.slane %v1734_v34, 4 }
 0x1fd   : > { %v878_v26 = vmax.f32 %v846_v13, 0.0  ;;  %v9989_v25 = vshll.u32 %v8318_v16, 16  ;;  %v6367_v5 = vpack.c.bf16 %v880_v12, %v880_v12  ;;  %v1742_v56 = vrot.slane %v1740_v42, 5  ;;  %v1456_v12 = vld [vmem:[#allocation2 + $0xa8] sm:$0xf] }
 0x1fe   : > { %v8395_v7 = vrot.slane %v2332_v10, 4  ;;  %v1727_v14 = vor.u32 %v1726_v9, %v1723_v50  ;;  %v1737_v57 = vor.u32 %v1736_v28, %v1732_v19  ;;  %v2335_v1 = vshll.u32 %v2107_v35, 16  ;;  %v1449_v9 = vld [vmem:[#allocation2 + $0x9c] sm:$0xf] }
 0x1ff   : > { %v8393_v15 = vrot.slane %v9989_v25, 5  ;;  %v6365_v22 = vpack.c.bf16 %v878_v26, %v878_v26  ;;  %v1261_v0 = vshrl.u32 %v6367_v5, 16  ;;  %v1264_v23 = vshll.u32 %v6367_v5, 16  ;;  %v8416_v25 = vld [vmem:[#allocation2 + $0x78] sm:$0xf] }
 0x200   : > { %v6163_v53 = vcombine.low %v2107_v35, %v8389_v21  ;;  %v1728_v16 = vrot.slane %v1727_v14, 4  ;;  %v1738_v40 = vrot.slane %v1737_v57, 4  ;;  %v810_v45 = vmul.f32 %v8261_v49, %v7965_v24 }
 0x201   : > { %v1244_v62 = vshrl.u32 %v6365_v22, 16  ;;  %v1247_v3 = vshll.u32 %v6365_v22, 16  ;;  %v8399_v13 = vrot.slane %v1261_v0, 7  ;;  %v808_v43 = vmul.f32 %v8261_v49, %v7972_v37  ;;  %v8426_v0 = vld [vmem:[#allocation2 + $0x7c] sm:$0xf] }
 0x202   : > { %4765 = vmatprep.mubr.bf16.mxu0 %v6163_v53  ;;  %v6067_v34 = vrot.slane %v1920_v17, 9  ;;  %v1733_v35 = vsel %vm7857_vm2, %v1728_v16, %v1732_v19  ;;  %v1743_v42 = vsel %vm7857_vm2, %v1738_v40, %v1742_v56  ;;  %v2037_v10 = vrot.slane %v8370_v61, 5  ;;  %9990 = vst [vmem:[#allocation25_spill] sm:$0xff] %v8426_v0  ;;  %v8433_v16 = vld [vmem:[#allocation2 + $0x6c] sm:$0xf] }
 0x203   : > { %v8405_v50 = vrot.slane %v1244_v62, 7  ;;  %v1266_v26 = vor.u32 %v1264_v23, %v8399_v13  ;;  %v6131_v28 = vcombine.low %v1733_v35, %v1743_v42  ;;  %v8413_v24 = vrot.slane %v2335_v1, 5 }
 0x204   : > { %v849_v37 = vadd.f32 %v8276_v31, %v810_v45  ;;  %v1267_v5 = vrot.slane %v8399_v13, 4  ;;  %v847_v19 = vadd.f32 %v8276_v31, %v808_v43  ;;  %v2038_v56 = vsel %vm7865_vm5, %v6067_v34, %v2037_v10  ;;  %v8439_v43 = vld [vmem:[#allocation2 + $0x70] sm:$0xf] }
 0x205   : > { %v1249_v22 = vor.u32 %v1247_v3, %v8405_v50  ;;  %v1457_v14 = vsel %vm7925_vm11, %v1266_v26, %v1456_v12  ;;  %4604 = vmatprep.mubr.bf16.mxu1 %v6131_v28  ;;  %v2039_v1 = vrot.slane %v2037_v10, 4  ;;  %v2040_v17 = vrot.slane %v8380_v4, 5 }
 0x206   : > { %v881_v57 = vmax.f32 %v849_v37, 0.0  ;;  %1458 = vst [vmem:[#allocation2 + $0xa8] sm:$0xf] %v1457_v14  ;;  %v879_v53 = vmax.f32 %v847_v19, 0.0  ;;  %v6115_v62 = vcombine.low %v8360_v51, %v8370_v61  ;;  %v2356_v3 = vshrl.u32 %v8416_v25, 16 }
 0x207   : > { %v1450_v23 = vsel %vm7925_vm11, %v1249_v22, %v1449_v9  ;;  %v1250_v40 = vrot.slane %v8405_v50, 4  ;;  %v2041_v4 = vsel %vm7865_vm5, %v2039_v1, %v2040_v17  ;;  %v1518_v61 = vld [vmem:[#allocation2 + $0x74] sm:$0x1]  ;;  %v6164_v50 = vcombine.low %v8416_v25, %v8426_v0  ;;  %v1921_v9 = vld [vmem:[#allocation2 + $0x6c] sm:$0xe] }
 0x208   : > { %1451 = vst [vmem:[#allocation2 + $0x9c] sm:$0xf] %v1450_v23  ;;  %v6368_v13 = vpack.c.bf16 %v881_v57, %v881_v57  ;;  %v6366_v34 = vpack.c.bf16 %v879_v53, %v879_v53  ;;  %v6147_v12 = vcombine.low %v2038_v56, %v2041_v4  ;;  %4605 = vmatmul.mubr.bf16.gmra.mrb[48].mxu1 %v6115_v62  ;;  %v8441_v35 = vrot.slane %v2356_v3, 4  ;;  %v1460_v17 = vld [vmem:[#allocation2 + $0xb0] sm:$0x1] }
 0x209   : > { %v1745_v26 = vshrl.u32 %v8433_v16, 16  ;;  %v1748_v22 = vshll.u32 %v8433_v16, 16  ;;  %v1754_v19 = vshll.u32 %v8439_v43, 16  ;;  %v1758_v57 = vshrl.u32 %v8439_v43, 16  ;;  %v1453_v51 = vld [vmem:[#allocation2 + $0xa4] sm:$0x1] }
 0x20a   : > { %v1269_v42 = vshrl.u32 %v6368_v13, 16  ;;  %v1272_v10 = vshll.u32 %v6368_v13, 16  ;;  %v1252_v28 = vshrl.u32 %v6366_v34, 16  ;;  %v1255_v37 = vshll.u32 %v6366_v34, 16  ;;  %4766 = vmatmul.mubr.bf16.gmra.mrb[48].mxu0 %v6147_v12 }
 0x20b   : > { %4773 = vmatprep.mubr.bf16.mxu0 %v6164_v50  ;;  %v1747_v14 = vrot.slane %v1745_v26, 4  ;;  %v1764_v1 = vshll.u32 %v1518_v61, 16  ;;  %v1750_v53 = vrot.slane %v1748_v22, 5  ;;  %v1756_v62 = vrot.slane %v1754_v19, 5  ;;  %v8455_v19 = vld [vmem:[#allocation2 + $0x78] sm:$0xf] }
 0x20c   : > { %v1271_v56 = vrot.slane %v1269_v42, 7  ;;  %v1254_v23 = vrot.slane %v1252_v28, 7  ;;  %v6068_v3 = vrot.slane %v1921_v9, 9  ;;  %v1760_v34 = vrot.slane %v1758_v57, 4 }
 0x20d   : > { %v1766_v12 = vrot.slane %v1764_v1, 5  ;;  %v1751_v0 = vor.u32 %v1750_v53, %v1747_v14  ;;  %v2044_v42 = vrot.slane %v8439_v43, 5  ;;  %v2047_v22 = vrot.slane %v1518_v61, 5 }
 0x20e   : > { %v1274_v13 = vor.u32 %v1272_v10, %v1271_v56  ;;  %v1276_v4 = vrot.slane %v1271_v56, 4  ;;  %v1257_v54 = vor.u32 %v1255_v37, %v1254_v23  ;;  %v1259_v45 = vrot.slane %v1254_v23, 4  ;;  %v8480_v23 = vld [vmem:[#allocation2 + $0x80] sm:$0x1] }
 0x20f   : > { %v1761_v28 = vor.u32 %v1760_v34, %v1756_v62  ;;  %v1752_v37 = vrot.slane %v1751_v0, 4  ;;  %v2045_v56 = vsel %vm7865_vm5, %v6068_v3, %v2044_v42  ;;  %v2046_v61 = vrot.slane %v2044_v42, 4  ;;  %v8485_v42 = vld [vmem:[#allocation2 + $0x88] sm:$0xf] }
 0x210   : > { %v1275_v50 = vsel %vm7934_vm12, %v1267_v5, %v1274_v13  ;;  %v1461_v26 = vsel %vm7940_vm13, %v1276_v4, %v1460_v17  ;;  %v1258_v10 = vsel %vm7934_vm12, %v1250_v40, %v1257_v54  ;;  %v1454_v9 = vsel %vm7940_vm13, %v1259_v45, %v1453_v51  ;;  %v8463_v5 = vld [vmem:[#allocation2 + $0x7c] sm:$0xf] }
 0x211   : > { %1459 = vst [vmem:[#allocation2 + $0xac] sm:$0xf] %v1275_v50  ;;  %1462 = vst [vmem:[#allocation2 + $0xb0] sm:$0x1] %v1461_v26  ;;  %v1762_v14 = vrot.slane %v1761_v28, 4  ;;  %v813_v57 = vmul.f32 %v8261_v49, %v7994_v33  ;;  %v6116_v1 = vcombine.low %v8433_v16, %v8439_v43  ;;  %v1757_v54 = vsel %vm7857_vm2, %v1752_v37, %v1756_v62 }
 0x212   : > { %1452 = vst [vmem:[#allocation2 + $0xa0] sm:$0xf] %v1258_v10  ;;  %1455 = vst [vmem:[#allocation2 + $0xa4] sm:$0x1] %v1454_v9  ;;  %v811_v0 = vmul.f32 %v8261_v49, %v8024_v36  ;;  %v1769_v40 = vshrl.u32 %v8455_v19, 16  ;;  %v1772_v45 = vshll.u32 %v8455_v19, 16  ;;  %v2048_v17 = vsel %vm7865_vm5, %v2046_v61, %v2047_v22 }
 0x213   : > { %v1767_v51 = vsel %vm7857_vm2, %v1762_v14, %v1766_v12  ;;  %v852_v33 = vadd.f32 %v8276_v31, %v813_v57  ;;  %v1778_v16 = vshll.u32 %v8463_v5, 16  ;;  %v2111_v43 = vld [vmem:[#allocation2 + $0x84] sm:$0xf]  ;;  %v6148_v62 = vcombine.low %v2045_v56, %v2048_v17  ;;  %v1922_v17 = vld [vmem:[#allocation2 + $0x78] sm:$0xe] }
 0x214   : > { %v6132_v53 = vcombine.low %v1757_v54, %v1767_v51  ;;  %v850_v36 = vadd.f32 %v8276_v31, %v811_v0  ;;  %v1771_v3 = vrot.slane %v1769_v40, 4  ;;  %v1774_v4 = vrot.slane %v1772_v45, 5  ;;  %v8551_v0 = vld [vmem:[#allocation2 + $0x90] sm:$0xf] }
 0x215   : > { %v884_v13 = vmax.f32 %v852_v33, 0.0  ;;  %v1780_v34 = vrot.slane %v1778_v16, 5  ;;  %v1782_v12 = vshrl.u32 %v8463_v5, 16  ;;  %v9991_v50 = vshll.u32 %v8416_v25, 16  ;;  %4774 = vmatmul.mubr.bf16.gmra.mrb[52].mxu0 %v6148_v62 }
 0x216   : > { %4612 = vmatprep.mubr.bf16.mxu1 %v6132_v53  ;;  %v882_v28 = vmax.f32 %v850_v36, 0.0  ;;  %v1788_v22 = vshll.u32 %v8480_v23, 16  ;;  %v2380_v10 = vshrl.u32 %v2111_v43, 16  ;;  %v1775_v37 = vor.u32 %v1774_v4, %v1771_v3  ;;  %v1470_v4 = vld [vmem:[#allocation2 + $0xc0] sm:$0xf] }
 0x217   : > { %v8489_v26 = vrot.slane %v9991_v50, 5  ;;  %v6371_v9 = vpack.c.bf16 %v884_v13, %v884_v13  ;;  %4613 = vmatmul.mubr.bf16.gmra.mrb[52].mxu1 %v6116_v1  ;;  %v1784_v56 = vrot.slane %v1782_v12, 4  ;;  %v2383_v14 = vshll.u32 %v2111_v43, 16 }
 0x218   : > { %v6369_v61 = vpack.c.bf16 %v882_v28, %v882_v28  ;;  %v1790_v57 = vrot.slane %v1788_v22, 5  ;;  %v8492_v54 = vrot.slane %v2380_v10, 4  ;;  %v1776_v45 = vrot.slane %v1775_v37, 4  ;;  %v1463_v22 = vld [vmem:[#allocation2 + $0xb4] sm:$0xf] }
 0x219   : > { %v1295_v25 = vshrl.u32 %v6371_v9, 16  ;;  %v1298_v40 = vshll.u32 %v6371_v9, 16  ;;  %v1785_v51 = vor.u32 %v1784_v56, %v1780_v34  ;;  %v6165_v53 = vcombine.low %v2111_v43, %v8485_v42 }
 0x21a   : > { %v1278_v33 = vshrl.u32 %v6369_v61, 16  ;;  %v1281_v16 = vshll.u32 %v6369_v61, 16  ;;  %v814_v1 = vmul.f32 %v8261_v49, %v8029_v52  ;;  %v1781_v36 = vsel %vm7857_vm2, %v1776_v45, %v1780_v34  ;;  %v8516_v61 = vld [vmem:[#allocation2 + $0x90] sm:$0xf] }
 0x21b   : > { %v8498_v62 = vrot.slane %v1295_v25, 7  ;;  %v1786_v3 = vrot.slane %v1785_v51, 4  ;;  %v812_v13 = vmul.f32 %v8261_v49, %v8069_v63  ;;  %4781 = vmatprep.mubr.bf16.mxu0 %v6165_v53  ;;  %v6069_v28 = vrot.slane %v1922_v17, 9 }
 0x21c   : > { %v8504_v12 = vrot.slane %v1278_v33, 7  ;;  %v853_v50 = vadd.f32 %v8276_v31, %v814_v1  ;;  %v2051_v43 = vrot.slane %v8463_v5, 5  ;;  %v8511_v34 = vrot.slane %v2383_v14, 5  ;;  %v8522_v14 = vld [vmem:[#allocation2 + $0x94] sm:$0xf] }
 0x21d   : > { %v1300_v52 = vor.u32 %v1298_v40, %v8498_v62  ;;  %v1791_v10 = vsel %vm7857_vm2, %v1786_v3, %v1790_v57  ;;  %v851_v9 = vadd.f32 %v8276_v31, %v812_v13  ;;  %v1301_v63 = vrot.slane %v8498_v62, 4  ;;  %9992 = vst [vmem:[#allocation26_spill] sm:$0xff] %v8522_v14  ;;  %v8534_v3 = vld [vmem:[#allocation2 + $0x88] sm:$0xf] }
 0x21e   : > { %v1283_v49 = vor.u32 %v1281_v16, %v8504_v12  ;;  %v6133_v37 = vcombine.low %v1781_v36, %v1791_v10  ;;  %v885_v56 = vmax.f32 %v853_v50, 0.0  ;;  %v2052_v45 = vsel %vm7865_vm5, %v6069_v28, %v2051_v43  ;;  %v8529_v16 = vld [vmem:[#allocation2 + $0x84] sm:$0xf] }
 0x21f   : > { %v1471_v25 = vsel %vm7925_vm11, %v1300_v52, %v1470_v4  ;;  %v883_v40 = vmax.f32 %v851_v9, 0.0  ;;  %v2053_v57 = vrot.slane %v2051_v43, 4  ;;  %v2054_v17 = vrot.slane %v8480_v23, 5  ;;  %v1474_v52 = vld [vmem:[#allocation2 + $0xc8] sm:$0x1] }
 0x220   : > { %1472 = vst [vmem:[#allocation2 + $0xc0] sm:$0xf] %v1471_v25  ;;  %v1464_v31 = vsel %vm7925_vm11, %v1283_v49, %v1463_v22  ;;  %4620 = vmatprep.mubr.bf16.mxu1 %v6133_v37  ;;  %v6372_v51 = vpack.c.bf16 %v885_v56, %v885_v56  ;;  %v6117_v33 = vcombine.low %v8455_v19, %v8463_v5  ;;  %v1284_v53 = vrot.slane %v8504_v12, 4  ;;  %v1520_v5 = vld [vmem:[#allocation2 + $0x8c] sm:$0x1] }
 0x221   : > { %1465 = vst [vmem:[#allocation2 + $0xb4] sm:$0xf] %v1464_v31  ;;  %v6370_v1 = vpack.c.bf16 %v883_v40, %v883_v40  ;;  %v2404_v62 = vshrl.u32 %v8516_v61, 16  ;;  %v2407_v36 = vshll.u32 %v8516_v61, 16  ;;  %v2055_v23 = vsel %vm7865_vm5, %v2053_v57, %v2054_v17  ;;  %v1467_v37 = vld [vmem:[#allocation2 + $0xbc] sm:$0x1] }
 0x222   : > { %v1303_v27 = vshrl.u32 %v6372_v51, 16  ;;  %v1306_v13 = vshll.u32 %v6372_v51, 16  ;;  %4621 = vmatmul.mubr.bf16.gmra.mrb[56].mxu1 %v6117_v33  ;;  %v6149_v12 = vcombine.low %v2052_v45, %v2055_v23  ;;  %v6166_v28 = vcombine.low %v8516_v61, %v8522_v14  ;;  %v1923_v17 = vld [vmem:[#allocation2 + $0x84] sm:$0xe] }
 0x223   : > { %v1286_v4 = vshrl.u32 %v6370_v1, 16  ;;  %v1289_v50 = vshll.u32 %v6370_v1, 16  ;;  %v8541_v22 = vrot.slane %v2404_v62, 4  ;;  %v1793_v10 = vshrl.u32 %v8529_v16, 16 }
 0x224   : > { %v1305_v43 = vrot.slane %v1303_v27, 7  ;;  %v1796_v9 = vshll.u32 %v8529_v16, 16  ;;  %4782 = vmatmul.mubr.bf16.gmra.mrb[56].mxu0 %v6149_v12  ;;  %v1802_v56 = vshll.u32 %v8534_v3, 16  ;;  %v1806_v25 = vshrl.u32 %v8534_v3, 16 }
 0x225   : > { %v1288_v49 = vrot.slane %v1286_v4, 7  ;;  %v1812_v40 = vshll.u32 %v1520_v5, 16  ;;  %4789 = vmatprep.mubr.bf16.mxu0 %v6166_v28  ;;  %v1795_v31 = vrot.slane %v1793_v10, 4  ;;  %v6070_v10 = vrot.slane %v1923_v17, 9 }
 0x226   : > { %v1308_v45 = vor.u32 %v1306_v13, %v1305_v43  ;;  %v1310_v57 = vrot.slane %v1305_v43, 4  ;;  %v1798_v51 = vrot.slane %v1796_v9, 5  ;;  %v1804_v62 = vrot.slane %v1802_v56, 5  ;;  %v8553_v13 = vld [vmem:[#allocation2 + $0x94] sm:$0xf] }
 0x227   : > { %v1291_v33 = vor.u32 %v1289_v50, %v1288_v49  ;;  %v1293_v1 = vrot.slane %v1288_v49, 4  ;;  %v1808_v27 = vrot.slane %v1806_v25, 4  ;;  %v1814_v19 = vrot.slane %v1812_v40, 5  ;;  %v1521_v25 = vld [vmem:[#allocation2 + $0x98] sm:$0x1] }
 0x228   : > { %v1309_v23 = vsel %vm7934_vm12, %v1301_v63, %v1308_v45  ;;  %v1475_v4 = vsel %vm7940_vm13, %v1310_v57, %v1474_v52  ;;  %v1799_v12 = vor.u32 %v1798_v51, %v1795_v31  ;;  %v2058_v52 = vrot.slane %v8534_v3, 5  ;;  %v2115_v57 = vld [vmem:[#allocation2 + $0x9c] sm:$0xf] }
 0x229   : > { %1473 = vst [vmem:[#allocation2 + $0xc4] sm:$0xf] %v1309_v23  ;;  %1476 = vst [vmem:[#allocation2 + $0xc8] sm:$0x1] %v1475_v4  ;;  %v1292_v50 = vsel %vm7934_vm12, %v1284_v53, %v1291_v33  ;;  %v1468_v28 = vsel %vm7940_vm13, %v1293_v1, %v1467_v37  ;;  %v1809_v43 = vor.u32 %v1808_v27, %v1804_v62  ;;  %v2061_v9 = vrot.slane %v1520_v5, 5 }
 0x22a   : > { %1466 = vst [vmem:[#allocation2 + $0xb8] sm:$0xf] %v1292_v50  ;;  %1469 = vst [vmem:[#allocation2 + $0xbc] sm:$0x1] %v1468_v28  ;;  %v1800_v63 = vrot.slane %v1799_v12, 4  ;;  %v6118_v49 = vcombine.low %v8529_v16, %v8534_v3  ;;  %v1817_v40 = vshrl.u32 %v8551_v0, 16  ;;  %v2059_v37 = vsel %vm7865_vm5, %v6070_v10, %v2058_v52 }
 0x22b   : > { %v1810_v56 = vrot.slane %v1809_v43, 4  ;;  %v1820_v39 = vshll.u32 %v8551_v0, 16  ;;  %v1826_v44 = vshll.u32 %v8553_v13, 16  ;;  %v2060_v45 = vrot.slane %v2058_v52, 4  ;;  %v1924_v23 = vld [vmem:[#allocation2 + $0x90] sm:$0xe] }
 0x22c   : > { %v1805_v53 = vsel %vm7857_vm2, %v1800_v63, %v1804_v62  ;;  %v1830_v5 = vshrl.u32 %v8553_v13, 16  ;;  %v1819_v3 = vrot.slane %v1817_v40, 4  ;;  %v1836_v27 = vshll.u32 %v1521_v25, 16  ;;  %v8574_v62 = vld [vmem:[#allocation2 + $0xa0] sm:$0xf] }
 0x22d   : > { %v1815_v16 = vsel %vm7857_vm2, %v1810_v56, %v1814_v19  ;;  %v1822_v31 = vrot.slane %v1820_v39, 5  ;;  %v1828_v51 = vrot.slane %v1826_v44, 5  ;;  %v2062_v33 = vsel %vm7865_vm5, %v2060_v45, %v2061_v9  ;;  %9993 = vst [vmem:[#allocation27_spill] sm:$0xff] %v8574_v62  ;;  %v2117_v52 = vld [vmem:[#allocation2 + $0xa8] sm:$0xf] }
 0x22e   : > { %v6134_v17 = vcombine.low %v1805_v53, %v1815_v16  ;;  %v1832_v1 = vrot.slane %v1830_v5, 4  ;;  %v6150_v4 = vcombine.low %v2059_v37, %v2062_v33  ;;  %v2428_v50 = vshrl.u32 %v2115_v57, 16  ;;  %v8584_v44 = vld [vmem:[#allocation2 + $0xac] sm:$0xf]  ;;  %v8589_v45 = vld [vmem:[#allocation2 + $0x9c] sm:$0xf] }
 0x22f   : > { %v1823_v12 = vor.u32 %v1822_v31, %v1819_v3  ;;  %v2431_v28 = vshll.u32 %v2115_v57, 16  ;;  %v8578_v43 = vrot.slane %v2407_v36, 5  ;;  %v1838_v10 = vrot.slane %v1836_v27, 5  ;;  %9996 = vst [vmem:[#allocation30_spill] sm:$0xff] %v8584_v44  ;;  %v8595_v3 = vld [vmem:[#allocation2 + $0xa0] sm:$0xf] }
 0x230   : > { %4628 = vmatprep.mubr.bf16.mxu1 %v6134_v17  ;;  %v1833_v19 = vor.u32 %v1832_v1, %v1828_v51  ;;  %v6167_v63 = vcombine.low %v2115_v57, %v8574_v62  ;;  %4790 = vmatmul.mubr.bf16.gmra.mrb[60].mxu0 %v6150_v4  ;;  %v8581_v56 = vrot.slane %v2428_v50, 4  ;;  %v6071_v39 = vrot.slane %v1924_v23, 9  ;;  %v1925_v31 = vld [vmem:[#allocation2 + $0x9c] sm:$0xe]  ;;  %v1522_v27 = vld [vmem:[#allocation2 + $0xa4] sm:$0x1] }
 0x231   : > { %9994 = vst [vmem:[#allocation28_spill] sm:$0xff] %v8578_v43  ;;  %4629 = vmatmul.mubr.bf16.gmra.mrb[60].mxu1 %v6118_v49  ;;  %v1824_v9 = vrot.slane %v1823_v12, 4  ;;  %v8586_v61 = vrot.slane %v2431_v28, 5  ;;  %v2065_v36 = vrot.slane %v8553_v13, 5  ;;  %v2068_v37 = vrot.slane %v1521_v25, 5  ;;  %v8602_v23 = vpop.f32.mrb[16].mxu1 }
 0x232   : > { %9995 = vst [vmem:[#allocation29_spill] sm:$0xff] %v8581_v56  ;;  %v1834_v53 = vrot.slane %v1833_v19, 4  ;;  %4797 = vmatprep.mubr.bf16.mxu0 %v6167_v63  ;;  %v6119_v5 = vcombine.low %v8551_v0, %v8553_v13  ;;  %v2452_v57 = vshrl.u32 %v2117_v52, 16  ;;  %v2455_v16 = vshll.u32 %v2117_v52, 16  ;;  %v8620_v40 = vld [vmem:[#allocation2 + $0xb0] sm:$0x1] }
 0x233   : > { %9997 = vst [vmem:[#allocation31_spill] sm:$0xff] %v8586_v61  ;;  %v1829_v49 = vsel %vm7857_vm2, %v1824_v9, %v1828_v51  ;;  %v2066_v33 = vsel %vm7865_vm5, %v6071_v39, %v2065_v36  ;;  %v2067_v25 = vrot.slane %v2065_v36, 4  ;;  %v6168_v0 = vcombine.low %v2117_v52, %v8584_v44  ;;  %v2121_v43 = vld [vmem:[#allocation2 + $0xc0] sm:$0xf] }
 0x234   : > { %v1839_v17 = vsel %vm7857_vm2, %v1834_v53, %v1838_v10  ;;  %v8604_v4 = vrot.slane %v2452_v57, 4  ;;  %v1841_v13 = vshrl.u32 %v8589_v45, 16  ;;  %v1844_v50 = vshll.u32 %v8589_v45, 16  ;;  %v8613_v10 = vld [vmem:[#allocation2 + $0xa8] sm:$0xf] }
 0x235   : > { %v6135_v51 = vcombine.low %v1829_v49, %v1839_v17  ;;  %v2069_v12 = vsel %vm7865_vm5, %v2067_v25, %v2068_v37  ;;  %v1850_v28 = vshll.u32 %v8595_v3, 16  ;;  %v1854_v19 = vshrl.u32 %v8595_v3, 16  ;;  %v8616_v17 = vld [vmem:[#allocation2 + $0xac] sm:$0xf] }
 0x236   : > { %9998 = vst [vmem:[#allocation32_spill] sm:$0xff] %v8604_v4  ;;  %v6151_v63 = vcombine.low %v2066_v33, %v2069_v12  ;;  %v1843_v9 = vrot.slane %v1841_v13, 4  ;;  %v1860_v39 = vshll.u32 %v1522_v27, 16  ;;  %v6072_v53 = vrot.slane %v1925_v31, 9 }
 0x237   : > { %4636 = vmatprep.mubr.bf16.mxu1 %v6135_v51  ;;  %v1846_v36 = vrot.slane %v1844_v50, 5  ;;  %v1852_v52 = vrot.slane %v1850_v28, 5  ;;  %v1856_v49 = vrot.slane %v1854_v19, 4  ;;  %v2072_v57 = vrot.slane %v8595_v3, 5  ;;  %v2119_v50 = vld [vmem:[#allocation2 + $0xb4] sm:$0xf] }
 0x238   : > { %4798 = vmatmul.mubr.bf16.gmra.mrb[64].mxu0 %v6151_v63  ;;  %v8618_v37 = vrot.slane %v2455_v16, 5  ;;  %v1862_v25 = vrot.slane %v1860_v39, 5  ;;  %v2075_v1 = vrot.slane %v1522_v27, 5  ;;  %v1865_v33 = vshrl.u32 %v8613_v10, 16  ;;  %v8625_v28 = vpop.f32.mrb[17].mxu1 }
 0x239   : > { %4637 = vmatmul.mubr.bf16.gmra.mrb[64].mxu1 %v6119_v5  ;;  %4805 = vmatprep.mubr.bf16.mxu0 %v6168_v0  ;;  %v1847_v51 = vor.u32 %v1846_v36, %v1843_v9  ;;  %v1857_v31 = vor.u32 %v1856_v49, %v1852_v52  ;;  %v2073_v13 = vsel %vm7865_vm5, %v6072_v53, %v2072_v57  ;;  %v2074_v12 = vrot.slane %v2072_v57, 4  ;;  %v8630_v63 = vpop.f32.mrb[18].mxu1 }
 0x23a   : > { %9999 = vst [vmem:[#allocation33_spill] sm:$0xff] %v8618_v37  ;;  %v1867_v19 = vrot.slane %v1865_v33, 4  ;;  %v1868_v5 = vshll.u32 %v8613_v10, 16  ;;  %v1874_v16 = vshll.u32 %v8616_v17, 16  ;;  %v1878_v27 = vshrl.u32 %v8616_v17, 16  ;;  %v8635_v36 = vpop.f32.mrb[19].mxu1 }
 0x23b   : > { %v1848_v39 = vrot.slane %v1847_v51, 4  ;;  %v1858_v0 = vrot.slane %v1857_v31, 4  ;;  %v2076_v9 = vsel %vm7865_vm5, %v2074_v12, %v2075_v1  ;;  %v1884_v53 = vshll.u32 %v8620_v40, 16  ;;  %v1926_v37 = vld [vmem:[#allocation2 + $0xa8] sm:$0xe] }
 0x23c   : > { %v6152_v49 = vcombine.low %v2073_v13, %v2076_v9  ;;  %v1870_v57 = vrot.slane %v1868_v5, 5  ;;  %v1876_v33 = vrot.slane %v1874_v16, 5  ;;  %v1880_v44 = vrot.slane %v1878_v27, 4  ;;  %v8641_v31 = vld [vmem:[#allocation2 + $0xb8] sm:$0xf] }
 0x23d   : > { %v1853_v4 = vsel %vm7857_vm2, %v1848_v39, %v1852_v52  ;;  %v1863_v62 = vsel %vm7857_vm2, %v1858_v0, %v1862_v25  ;;  %v1886_v51 = vrot.slane %v1884_v53, 5  ;;  %10000 = vst [vmem:[#allocation34_spill] sm:$0xff] %v8641_v31  ;;  %v2476_v61 = vshrl.u32 %v2119_v50, 16  ;;  %v8663_v9 = vld [vmem:[#allocation2 + $0xb8] sm:$0xf] }
 0x23e   : > { %v6136_v1 = vcombine.low %v1853_v4, %v1863_v62  ;;  %v1871_v12 = vor.u32 %v1870_v57, %v1867_v19  ;;  %v1881_v56 = vor.u32 %v1880_v44, %v1876_v33  ;;  %v2479_v14 = vshll.u32 %v2119_v50, 16  ;;  %v8650_v4 = vld [vmem:[#allocation2 + $0xb4] sm:$0xf] }
 0x23f   : > { %v6120_v13 = vcombine.low %v8589_v45, %v8595_v3  ;;  %v8645_v5 = vrot.slane %v2476_v61, 4  ;;  %v6169_v16 = vcombine.low %v2119_v50, %v8641_v31  ;;  %v6073_v52 = vrot.slane %v1926_v37, 9  ;;  %v8655_v45 = vld [vmem:[#allocation2 + $0xc4] sm:$0xf] }
 0x240   : > { %4644 = vmatprep.mubr.bf16.mxu1 %v6136_v1  ;;  %4806 = vmatmul.mubr.bf16.gmra.mrb[68].mxu0 %v6152_v49  ;;  %v1872_v25 = vrot.slane %v1871_v12, 4  ;;  %v1882_v27 = vrot.slane %v1881_v56, 4  ;;  %v2079_v62 = vrot.slane %v8616_v17, 5  ;;  %v8652_v44 = vrot.slane %v2479_v14, 5  ;;  %10003 = vst [vmem:[#allocation37_spill] sm:$0xff] %v8655_v45 }
 0x241   : > { %10001 = vst [vmem:[#allocation35_spill] sm:$0xff] %v8645_v5  ;;  %4645 = vmatmul.mubr.bf16.gmra.mrb[68].mxu1 %v6120_v13  ;;  %4813 = vmatprep.mubr.bf16.mxu0 %v6169_v16  ;;  %v2082_v61 = vrot.slane %v8620_v40, 5  ;;  %v2500_v3 = vshrl.u32 %v2121_v43, 16  ;;  %v2503_v37 = vshll.u32 %v2121_v43, 16  ;;  %v1524_v14 = vld [vmem:[#allocation2 + $0xbc] sm:$0x1]  ;;  %v6121_v40 = vcombine.low %v8613_v10, %v8616_v17 }
 0x242   : > { %10002 = vst [vmem:[#allocation36_spill] sm:$0xff] %v8652_v44  ;;  %v1877_v50 = vsel %vm7857_vm2, %v1872_v25, %v1876_v33  ;;  %v1887_v56 = vsel %vm7857_vm2, %v1882_v27, %v1886_v51  ;;  %v2080_v19 = vsel %vm7865_vm5, %v6073_v52, %v2079_v62  ;;  %v2081_v0 = vrot.slane %v2079_v62, 4  ;;  %v1927_v1 = vld [vmem:[#allocation2 + $0xb4] sm:$0xe]  ;;  %v8678_v25 = vld [vmem:[#allocation2 + $0x18] sm:$0xf] }
 0x243   : > { %v6137_v53 = vcombine.low %v1877_v50, %v1887_v56  ;;  %v8667_v49 = vrot.slane %v2500_v3, 4  ;;  %v8669_v57 = vrot.slane %v2503_v37, 5  ;;  %v1889_v12 = vshrl.u32 %v8650_v4, 16  ;;  %v8681_v37 = vld [vmem:[#allocation2 + $0x1c] sm:$0xf] }
 0x244   : > { %v2083_v33 = vsel %vm7865_vm5, %v2081_v0, %v2082_v61  ;;  %v1892_v13 = vshll.u32 %v8650_v4, 16  ;;  %v1898_v52 = vshll.u32 %v8663_v9, 16  ;;  %v1902_v10 = vshrl.u32 %v8663_v9, 16  ;;  %v8698_v31 = vld [vmem:[#allocation2 + $0x24] sm:$0xf] }
 0x245   : > { %10004 = vst [vmem:[#allocation38_spill] sm:$0xff] %v8667_v49  ;;  %10005 = vst [vmem:[#allocation39_spill] sm:$0xff] %v8669_v57  ;;  %4652 = vmatprep.mubr.bf16.mxu1 %v6137_v53  ;;  %v6153_v16 = vcombine.low %v2080_v19, %v2083_v33  ;;  %v1908_v17 = vshll.u32 %v1524_v14, 16  ;;  %v1891_v27 = vrot.slane %v1889_v12, 4  ;;  %v6074_v3 = vrot.slane %v1927_v1, 9 }
 0x246   : > { %v1894_v62 = vrot.slane %v1892_v13, 5  ;;  %v2086_v61 = vrot.slane %v8663_v9, 5  ;;  %v6170_v50 = vcombine.low %v2121_v43, %v8655_v45  ;;  %v1900_v56 = vrot.slane %v1898_v52, 5  ;;  %v2732_v19 = vld [vmem:[#allocation2 + $0x20] sm:$0x1] }
 0x247   : > { %v1904_v0 = vrot.slane %v1902_v10, 4  ;;  %v2089_v53 = vrot.slane %v1524_v14, 5  ;;  %v1910_v51 = vrot.slane %v1908_v17, 5  ;;  %v2749_v12 = vshrl.u32 %v8678_v25, 16  ;;  %v2123_v17 = vld [vmem:[#allocation2 + $0x14] sm:$0x1] }
 0x248   : > { %4814 = vmatmul.mubr.bf16.gmra.mrb[72].mxu0 %v6153_v16  ;;  %v1895_v33 = vor.u32 %v1894_v62, %v1891_v27  ;;  %v2087_v39 = vsel %vm7865_vm5, %v6074_v3, %v2086_v61  ;;  %v2088_v57 = vrot.slane %v2086_v61, 4  ;;  %v2752_v13 = vshll.u32 %v8678_v25, 16  ;;  %v2523_v61 = vld [vmem:[#allocation2 + $0xc] sm:$0xe] }
 0x249   : > { %4653 = vmatmul.mubr.bf16.gmra.mrb[72].mxu1 %v6121_v40  ;;  %4821 = vmatprep.mubr.bf16.mxu0 %v6170_v50  ;;  %v1905_v1 = vor.u32 %v1904_v0, %v1900_v56  ;;  %v2758_v43 = vshll.u32 %v8681_v37, 16  ;;  %v2762_v16 = vshrl.u32 %v8681_v37, 16  ;;  %v2768_v10 = vshll.u32 %v2732_v19, 16 }
 0x24a   : > { %v1896_v52 = vrot.slane %v1895_v33, 4  ;;  %v2090_v14 = vsel %vm7865_vm5, %v2088_v57, %v2089_v53  ;;  %v6122_v40 = vcombine.low %v8650_v4, %v8663_v9  ;;  %v2751_v62 = vrot.slane %v2749_v12, 4  ;;  %v7306_v9 = vld [vmem:[#allocation2 + $0x10] sm:$0xf] }
 0x24b   : > { %v1906_v27 = vrot.slane %v1905_v1, 4  ;;  %v2754_v3 = vrot.slane %v2752_v13, 5  ;;  %v6154_v0 = vcombine.low %v2087_v39, %v2090_v14  ;;  %v2760_v45 = vrot.slane %v2758_v43, 5  ;;  %v8700_v13 = vld [vmem:[#allocation2 + $0x28] sm:$0xf] }
 0x24c   : > { %v1901_v50 = vsel %vm7857_vm2, %v1896_v52, %v1900_v56  ;;  %v2764_v33 = vrot.slane %v2762_v16, 4  ;;  %v2770_v49 = vrot.slane %v2768_v10, 5  ;;  %v2159_v19 = vshll.u32 %v2123_v17, 16 }
 0x24d   : > { %v1911_v57 = vsel %vm7857_vm2, %v1906_v27, %v1910_v51  ;;  %v2755_v53 = vor.u32 %v2754_v3, %v2751_v62  ;;  %v6075_v4 = vrot.slane %v2523_v61, 9  ;;  %v2589_v12 = vrot.slane %v7306_v9, 5  ;;  %v2524_v27 = vld [vmem:[#allocation2 + $0x18] sm:$0xe]  ;;  %v2124_v3 = vld [vmem:[#allocation2 + $0x20] sm:$0x1] }
 0x24e   : > { %v6138_v1 = vcombine.low %v1901_v50, %v1911_v57  ;;  %v2765_v44 = vor.u32 %v2764_v33, %v2760_v45  ;;  %v2161_v56 = vrot.slane %v2159_v19, 5  ;;  %v2592_v39 = vrot.slane %v2123_v17, 5 }
 0x24f   : > { %v2756_v5 = vrot.slane %v2755_v53, 4  ;;  %v6203_v43 = vcombine.low %v8678_v25, %v8681_v37  ;;  %v2591_v52 = vrot.slane %v2589_v12, 4  ;;  %v2152_v14 = vsel %vm7857_vm2, %v8036_v60, %v8032_v55  ;;  %v2733_v25 = vld [vmem:[#allocation2 + $0x2c] sm:$0x1] }
 0x250   : > { %4660 = vmatprep.mubr.bf16.mxu1 %v6138_v1  ;;  %4822 = vmatmul.mubr.bf16.gmra.mrb[76].mxu0 %v6154_v0  ;;  %v2766_v51 = vrot.slane %v2765_v44, 4  ;;  %v2773_v16 = vshrl.u32 %v8698_v31, 16  ;;  %v2590_v10 = vsel %vm7865_vm5, %v6075_v4, %v2589_v12  ;;  %v2162_v17 = vsel %vm7857_vm2, %v8062_v29, %v2161_v56 }
 0x251   : > { %4661 = vmatmul.mubr.bf16.gmra.mrb[76].mxu1 %v6122_v40  ;;  %v2776_v37 = vshll.u32 %v8698_v31, 16  ;;  %v2782_v44 = vshll.u32 %v8700_v13, 16  ;;  %v2761_v62 = vsel %vm7857_vm2, %v2756_v5, %v2760_v45  ;;  %v2593_v60 = vsel %vm7865_vm5, %v2591_v52, %v2592_v39  ;;  %v7307_v45 = vld [vmem:[#allocation2 + $0x1c] sm:$0xf] }
 0x252   : > { %v2771_v55 = vsel %vm7857_vm2, %v2766_v51, %v2770_v49  ;;  %v2775_v40 = vrot.slane %v2773_v16, 4  ;;  %v6187_v50 = vcombine.low %v2590_v10, %v2593_v60  ;;  %v6171_v29 = vcombine.low %v2152_v14, %v2162_v17  ;;  %v8727_v51 = vld [vmem:[#allocation2 + $0x30] sm:$0xf] }
 0x253   : > { %v6219_v61 = vcombine.low %v2761_v62, %v2771_v55  ;;  %v2778_v0 = vrot.slane %v2776_v37, 5  ;;  %v2784_v33 = vrot.slane %v2782_v44, 5  ;;  %v2786_v57 = vshrl.u32 %v8700_v13, 16  ;;  %v2734_v62 = vld [vmem:[#allocation2 + $0x38] sm:$0x1] }
 0x254   : > { %v2792_v53 = vshll.u32 %v2733_v25, 16  ;;  %v6076_v19 = vrot.slane %v2524_v27, 9  ;;  %4862 = vmatprep.mubr.bf16.mxu1 %v6187_v50  ;;  %v2596_v1 = vrot.slane %v7307_v45, 5  ;;  %v2599_v49 = vrot.slane %v2124_v3, 5  ;;  %v7260_v25 = vld [vmem:[#allocation8 + $0x208] sm:$0xff]  }
 0x255   : > { %5023 = vmatprep.mubr.bf16.mxu0 %v6219_v61  ;;  %v2779_v5 = vor.u32 %v2778_v0, %v2775_v40  ;;  %v6204_v4 = vcombine.low %v8698_v31, %v8700_v13  ;;  %v2788_v9 = vrot.slane %v2786_v57, 4  ;;  %v2170_v56 = vor.u32 %v8045_v8, %v8043_v47  ;;  %v8733_v27 = vld [vmem:[#allocation2 + $0x34] sm:$0xf]  ;;  %v2525_v50 = vld [vmem:[#allocation2 + $0x24] sm:$0xe] }
 0x256   : > { %v2794_v12 = vrot.slane %v2792_v53, 5  ;;  %v2173_v39 = vshll.u32 %v7307_v45, 16  ;;  %v2597_v14 = vsel %vm7865_vm5, %v6076_v19, %v2596_v1  ;;  %v2598_v16 = vrot.slane %v2596_v1, 4  ;;  %v7263_v53 = vld [vmem:[#allocation8 + $0x210] sm:$0xff]  }
 0x257   : > { %v2780_v52 = vrot.slane %v2779_v5, 4  ;;  %v10006_v10 = vshrl.u32 %v8034_v41, 16  ;;  %v2789_v37 = vor.u32 %v2788_v9, %v2784_v33  ;;  %v2171_v31 = vrot.slane %v2170_v56, 4 }
 0x258   : > { %5024 = vmatmul.mubr.bf16.vlgmr.msra.gmra.mrb[80].mxu0 %v6203_v43  ;;  %v2175_v13 = vrot.slane %v2173_v39, 5  ;;  %v2183_v44 = vshll.u32 %v2124_v3, 16  ;;  %v2600_v8 = vsel %vm7865_vm5, %v2598_v16, %v2599_v49  ;;  %v2797_v55 = vshrl.u32 %v8727_v51, 16  ;;  %v7308_v43 = vld [vmem:[#allocation8 + $0x200] sm:$0xff]   ;;  %v2125_v49 = vld [vmem:[#allocation2 + $0x2c] sm:$0x1] }
 0x259   : > { %v2179_v17 = vrot.slane %v10006_v10, 4  ;;  %4863 = vmatmul.mubr.bf16.vlgmr.msra.gmra.mrb[80].mxu1 %v6171_v29  ;;  %v2785_v47 = vsel %vm7857_vm2, %v2780_v52, %v2784_v33  ;;  %v2800_v41 = vshll.u32 %v8727_v51, 16  ;;  %v2790_v60 = vrot.slane %v2789_v37, 4 }
 0x25a   : > { %6943 = vmatpush3.bf16.msra.mxu1 %v7308_v43  ;;  %v6188_v40 = vcombine.low %v2597_v14, %v2600_v8  ;;  %v2176_v3 = vsel %vm7857_vm2, %v2171_v31, %v2175_v13  ;;  %v2185_v29 = vrot.slane %v2183_v44, 5  ;;  %v2799_v0 = vrot.slane %v2797_v55, 4  ;;  %v8751_v8 = vld [vmem:[#allocation2 + $0x3c] sm:$0xf] }
 0x25b   : > { %v2180_v61 = vor.u32 %v2179_v17, %v2175_v13  ;;  %v2802_v33 = vrot.slane %v2800_v41, 5  ;;  %v2806_v57 = vshll.u32 %v8733_v27, 16  ;;  %6944 = vmatprep.subr.bf16.mxu1 %v7260_v25  ;;  %v2795_v19 = vsel %vm7857_vm2, %v2790_v60, %v2794_v12  ;;  %v7309_v17 = vld [vmem:[#allocation2 + $0x28] sm:$0xf] }
 0x25c   : > { %4870 = vmatprep.mubr.bf16.mxu1 %v6188_v40  ;;  %v2810_v45 = vshrl.u32 %v8733_v27, 16  ;;  %v2816_v1 = vshll.u32 %v2734_v62, 16  ;;  %v6220_v9 = vcombine.low %v2785_v47, %v2795_v19  ;;  %v6077_v52 = vrot.slane %v2525_v50, 9  ;;  %v7266_v47 = vld [vmem:[#allocation8 + $0x218] sm:$0xff]  }
 0x25d   : > { %v2181_v5 = vrot.slane %v2180_v61, 4  ;;  %v2803_v56 = vor.u32 %v2802_v33, %v2799_v0  ;;  %v2808_v39 = vrot.slane %v2806_v57, 5  ;;  %v2603_v37 = vrot.slane %v7309_v17, 5  ;;  %v2526_v0 = vld [vmem:[#allocation2 + $0x30] sm:$0xe] }
 0x25e   : > { %v2812_v16 = vrot.slane %v2810_v45, 4  ;;  %v2818_v10 = vrot.slane %v2816_v1, 5  ;;  %6945 = vmatpush3.bf16.msra.mxu1 %v7260_v25  ;;  %5031 = vmatprep.mubr.bf16.mxu0 %v6220_v9  ;;  %v2606_v13 = vrot.slane %v2125_v49, 5  ;;  %v6205_v44 = vcombine.low %v8727_v51, %v8733_v27  ;;  %v2735_v57 = vld [vmem:[#allocation2 + $0x44] sm:$0x1] }
 0x25f   : > { %v2186_v14 = vsel %vm7857_vm2, %v2181_v5, %v2185_v29  ;;  %v2804_v31 = vrot.slane %v2803_v56, 4  ;;  %6946 = vmatprep.subr.bf16.mxu1 %v7263_v53  ;;  %v2604_v55 = vsel %vm7865_vm5, %v6077_v52, %v2603_v37  ;;  %v2605_v41 = vrot.slane %v2603_v37, 4  ;;  %v2126_v9 = vld [vmem:[#allocation2 + $0x38] sm:$0x1] }
 0x260   : > { %v6172_v12 = vcombine.low %v2176_v3, %v2186_v14  ;;  %5032 = vmatmul.mubr.bf16.gmra.mrb[84].mxu0 %v6204_v4  ;;  %v2813_v62 = vor.u32 %v2812_v16, %v2808_v39  ;;  %v2194_v25 = vor.u32 %v8102_v48, %v8100_v58  ;;  %v2197_v43 = vshll.u32 %v7309_v17, 16  ;;  %v8761_v3 = vld [vmem:[#allocation2 + $0x40] sm:$0xf] }
 0x261   : > { %v2809_v60 = vsel %vm7857_vm2, %v2804_v31, %v2808_v39  ;;  %v10007_v51 = vshrl.u32 %v8094_v38, 16  ;;  %v2207_v40 = vshll.u32 %v2125_v49, 16  ;;  %v2607_v61 = vsel %vm7865_vm5, %v2605_v41, %v2606_v13  ;;  %v7269_v38 = vld [vmem:[#allocation8 + $0x220] sm:$0xff]   ;;  %v7310_v31 = vld [vmem:[#allocation2 + $0x34] sm:$0xf] }
 0x262   : > { %4871 = vmatmul.mubr.bf16.gmra.mrb[84].mxu1 %v6172_v12  ;;  %v2814_v4 = vrot.slane %v2813_v62, 4  ;;  %v2195_v50 = vrot.slane %v2194_v25, 4  ;;  %v2821_v29 = vshrl.u32 %v8751_v8, 16  ;;  %v6189_v58 = vcombine.low %v2604_v55, %v2607_v61  ;;  %v7272_v55 = vld [vmem:[#allocation8 + $0x228] sm:$0xff]  }
 0x263   : > { %v2203_v27 = vrot.slane %v10007_v51, 4  ;;  %6947 = vmatpush3.bf16.msra.mxu1 %v7263_v53  ;;  %v2199_v48 = vrot.slane %v2197_v43, 5  ;;  %v2209_v33 = vrot.slane %v2207_v40, 5  ;;  %v2824_v19 = vshll.u32 %v8751_v8, 16 }
 0x264   : > { %6948 = vmatprep.subr.bf16.mxu1 %v7266_v47  ;;  %v2819_v5 = vsel %vm7857_vm2, %v2814_v4, %v2818_v10  ;;  %v2823_v45 = vrot.slane %v2821_v29, 4  ;;  %v2830_v1 = vshll.u32 %v8761_v3, 16  ;;  %v2834_v49 = vshrl.u32 %v8761_v3, 16  ;;  %4878 = vmatprep.mubr.bf16.mxu1 %v6189_v58  ;;  %v8781_v4 = vld [vmem:[#allocation2 + $0x48] sm:$0xf] }
 0x265   : > { %v6221_v56 = vcombine.low %v2809_v60, %v2819_v5  ;;  %v2200_v53 = vsel %vm7857_vm2, %v2195_v50, %v2199_v48  ;;  %v2204_v39 = vor.u32 %v2203_v27, %v2199_v48  ;;  %v2826_v52 = vrot.slane %v2824_v19, 5 }
 0x266   : > { %v2832_v14 = vrot.slane %v2830_v1, 5  ;;  %v2836_v16 = vrot.slane %v2834_v49, 4  ;;  %v2840_v17 = vshll.u32 %v2735_v57, 16  ;;  %v6078_v37 = vrot.slane %v2526_v0, 9  ;;  %v8783_v0 = vld [vmem:[#allocation2 + $0x4c] sm:$0xf] }
 0x267   : > { %6949 = vmatpush3.bf16.msra.mxu1 %v7266_v47  ;;  %5039 = vmatprep.mubr.bf16.mxu0 %v6221_v56  ;;  %v2205_v10 = vrot.slane %v2204_v39, 4  ;;  %v2827_v12 = vor.u32 %v2826_v52, %v2823_v45  ;;  %v2610_v13 = vrot.slane %v7310_v31, 5  ;;  %v2613_v62 = vrot.slane %v2126_v9, 5  ;;  %v2736_v45 = vld [vmem:[#allocation2 + $0x50] sm:$0x1] }
 0x268   : > { %6950 = vmatprep.subr.bf16.mxu1 %v7269_v38  ;;  %5040 = vmatmul.mubr.bf16.gmra.mrb[88].mxu0 %v6205_v44  ;;  %v2837_v41 = vor.u32 %v2836_v16, %v2832_v14  ;;  %v2842_v25 = vrot.slane %v2840_v17, 5  ;;  %v6206_v60 = vcombine.low %v8751_v8, %v8761_v3  ;;  %v2218_v43 = vor.u32 %v8170_v46, %v8146_v32  ;;  %v10008_v8 = vld [vmem:[#allocation18_spill] sm:$0xff]  ;;  %v2127_v52 = vld [vmem:[#allocation2 + $0x44] sm:$0x1] }
 0x269   : > { %v2210_v47 = vsel %vm7857_vm2, %v2205_v10, %v2209_v33  ;;  %v2828_v51 = vrot.slane %v2827_v12, 4  ;;  %v2611_v27 = vsel %vm7865_vm5, %v6078_v37, %v2610_v13  ;;  %v2612_v40 = vrot.slane %v2610_v13, 4  ;;  %v7275_v33 = vld [vmem:[#allocation8 + $0x230] sm:$0xff]   ;;  %v2527_v1 = vld [vmem:[#allocation2 + $0x3c] sm:$0xe]  ;;  %v7278_v13 = vld [vmem:[#allocation8 + $0x238] sm:$0xff]  }
 0x26a   : > { %v6173_v61 = vcombine.low %v2200_v53, %v2210_v47  ;;  %v2838_v44 = vrot.slane %v2837_v41, 4  ;;  %v2219_v50 = vrot.slane %v2218_v43, 4  ;;  %v2221_v29 = vshll.u32 %v7310_v31, 16 }
 0x26b   : > { %6951 = vmatpush3.bf16.msra.mxu1 %v7269_v38  ;;  %v2833_v32 = vsel %vm7857_vm2, %v2828_v51, %v2832_v14  ;;  %v2614_v46 = vsel %vm7865_vm5, %v2612_v40, %v2613_v62  ;;  %v10009_v3 = vshrl.u32 %v10008_v8, 16  ;;  %v2231_v48 = vshll.u32 %v2126_v9, 16 }
 0x26c   : > { %6952 = vmatprep.subr.bf16.mxu1 %v7272_v55  ;;  %4879 = vmatmul.mubr.bf16.gmra.mrb[88].mxu1 %v6173_v61  ;;  %v2843_v57 = vsel %vm7857_vm2, %v2838_v44, %v2842_v25  ;;  %v6190_v19 = vcombine.low %v2611_v27, %v2614_v46  ;;  %v2223_v5 = vrot.slane %v2221_v29, 5  ;;  %v2845_v38 = vshrl.u32 %v8781_v4, 16  ;;  %v7311_v25 = vld [vmem:[#allocation2 + $0x40] sm:$0xf]  ;;  %v8807_v29 = vld [vmem:[#allocation2 + $0x54] sm:$0xf] }
 0x26d   : > { %v2227_v58 = vrot.slane %v10009_v3, 4  ;;  %v6222_v49 = vcombine.low %v2833_v32, %v2843_v57  ;;  %v2233_v56 = vrot.slane %v2231_v48, 5  ;;  %v2848_v53 = vshll.u32 %v8781_v4, 16 }
 0x26e   : > { %v2854_v39 = vshll.u32 %v8783_v0, 16  ;;  %4886 = vmatprep.mubr.bf16.mxu1 %v6190_v19  ;;  %v2224_v9 = vsel %vm7857_vm2, %v2219_v50, %v2223_v5  ;;  %v2847_v16 = vrot.slane %v2845_v38, 4  ;;  %v2858_v17 = vshrl.u32 %v8783_v0, 16  ;;  %v2128_v38 = vld [vmem:[#allocation2 + $0x50] sm:$0x1] }
 0x26f   : > { %v2228_v14 = vor.u32 %v2227_v58, %v2223_v5  ;;  %6953 = vmatpush3.bf16.msra.mxu1 %v7272_v55  ;;  %5047 = vmatprep.mubr.bf16.mxu0 %v6222_v49  ;;  %v2850_v37 = vrot.slane %v2848_v53, 5  ;;  %v2864_v12 = vshll.u32 %v2736_v45, 16  ;;  %v6079_v31 = vrot.slane %v2527_v1, 9  ;;  %v8809_v58 = vld [vmem:[#allocation2 + $0x58] sm:$0xf] }
 0x270   : > { %v2856_v10 = vrot.slane %v2854_v39, 5  ;;  %6954 = vmatprep.subr.bf16.mxu1 %v7275_v33  ;;  %5048 = vmatmul.mubr.bf16.gmra.mrb[92].mxu0 %v6206_v60  ;;  %v2860_v41 = vrot.slane %v2858_v17, 4  ;;  %v2617_v43 = vrot.slane %v7311_v25, 5  ;;  %v2620_v47 = vrot.slane %v2127_v52, 5  ;;  %v2737_v5 = vld [vmem:[#allocation2 + $0x5c] sm:$0x1] }
 0x271   : > { %v2229_v62 = vrot.slane %v2228_v14, 4  ;;  %v2851_v51 = vor.u32 %v2850_v37, %v2847_v16  ;;  %v2866_v27 = vrot.slane %v2864_v12, 5  ;;  %v6207_v40 = vcombine.low %v8781_v4, %v8783_v0  ;;  %v2528_v53 = vld [vmem:[#allocation2 + $0x48] sm:$0xe] }
 0x272   : > { %v2242_v55 = vor.u32 %v8208_v30, %v8204_v59  ;;  %v2861_v44 = vor.u32 %v2860_v41, %v2856_v10  ;;  %v2618_v60 = vsel %vm7865_vm5, %v6079_v31, %v2617_v43  ;;  %v2619_v50 = vrot.slane %v2617_v43, 4 }
 0x273   : > { %v2234_v61 = vsel %vm7857_vm2, %v2229_v62, %v2233_v56  ;;  %6955 = vmatpush3.bf16.msra.mxu1 %v7275_v33  ;;  %v2852_v46 = vrot.slane %v2851_v51, 4  ;;  %v2245_v3 = vshll.u32 %v7311_v25, 16  ;;  %v10010_v30 = vshrl.u32 %v8201_v2, 16 }
 0x274   : > { %v6174_v32 = vcombine.low %v2224_v9, %v2234_v61  ;;  %v2243_v8 = vrot.slane %v2242_v55, 4  ;;  %6956 = vmatprep.subr.bf16.mxu1 %v7278_v13  ;;  %v2862_v4 = vrot.slane %v2861_v44, 4  ;;  %v2621_v59 = vsel %vm7865_vm5, %v2619_v50, %v2620_v47 }
 0x275   : > { %v2251_v0 = vrot.slane %v10010_v30, 4  ;;  %v2255_v48 = vshll.u32 %v2127_v52, 16  ;;  %v2857_v57 = vsel %vm7857_vm2, %v2852_v46, %v2856_v10  ;;  %v6191_v33 = vcombine.low %v2618_v60, %v2621_v59  ;;  %v8841_v59 = vld [vmem:[#allocation2 + $0x60] sm:$0xf]  ;;  %v8843_v30 = vld [vmem:[#allocation2 + $0x64] sm:$0xf] }
 0x276   : > { %4887 = vmatmul.mubr.bf16.gmra.mrb[92].mxu1 %v6174_v32  ;;  %v2247_v19 = vrot.slane %v2245_v3, 5  ;;  %v2869_v45 = vshrl.u32 %v8807_v29, 16  ;;  %v2867_v1 = vsel %vm7857_vm2, %v2862_v4, %v2866_v27  ;;  %v2872_v56 = vshll.u32 %v8807_v29, 16 }
 0x277   : > { %v2257_v49 = vrot.slane %v2255_v48, 5  ;;  %v2878_v2 = vshll.u32 %v8809_v58, 16  ;;  %6957 = vmatpush3.bf16.msra.mxu1 %v7278_v13  ;;  %v6223_v39 = vcombine.low %v2857_v57, %v2867_v1  ;;  %4894 = vmatprep.mubr.bf16.mxu1 %v6191_v33  ;;  %v2882_v10 = vshrl.u32 %v8809_v58, 16  ;;  %v7312_v13 = vld [vmem:[#allocation2 + $0x4c] sm:$0xf] }
 0x278   : > { %v2248_v52 = vsel %vm7857_vm2, %v2243_v8, %v2247_v19  ;;  %v2252_v9 = vor.u32 %v2251_v0, %v2247_v19  ;;  %v2871_v14 = vrot.slane %v2869_v45, 4  ;;  %v2874_v17 = vrot.slane %v2872_v56, 5  ;;  %v10011_v0 = vld [vmem:[#allocation19_spill] sm:$0xff]  ;;  %v2738_v45 = vld [vmem:[#allocation2 + $0x68] sm:$0x1] }
 0x279   : > { %v8824_v16 = vpop.f32.mrb[16].mxu0  ;;  %v2880_v37 = vrot.slane %v2878_v2, 5  ;;  %v2888_v12 = vshll.u32 %v2737_v5, 16  ;;  %5055 = vmatprep.mubr.bf16.mxu0 %v6223_v39  ;;  %v6080_v41 = vrot.slane %v2528_v53, 9  ;;  %v2624_v25 = vrot.slane %v7312_v13, 5 }
 0x27a   : > { %v8827_v31 = vpop.f32.mrb[17].mxu0  ;;  %v2253_v62 = vrot.slane %v2252_v9, 4  ;;  %v2627_v43 = vrot.slane %v2128_v38, 5  ;;  %5056 = vmatmul.mubr.bf16.gmra.mrb[96].mxu0 %v6207_v40  ;;  %v2875_v51 = vor.u32 %v2874_v17, %v2871_v14  ;;  %v2884_v27 = vrot.slane %v2882_v10, 4  ;;  %v2529_v53 = vld [vmem:[#allocation2 + $0x54] sm:$0xe] }
 0x27b   : > { %v8829_v47 = vpop.f32.mrb[18].mxu0  ;;  %v2890_v55 = vrot.slane %v2888_v12, 5  ;;  %v6208_v61 = vcombine.low %v8807_v29, %v8809_v58  ;;  %v2625_v50 = vsel %vm7865_vm5, %v6080_v41, %v2624_v25  ;;  %v2626_v32 = vrot.slane %v2624_v25, 4  ;;  %v2129_v14 = vld [vmem:[#allocation2 + $0x5c] sm:$0x1] }
 0x27c   : > { %v8833_v44 = vpop.f32.mrb[19].mxu0  ;;  %v2258_v60 = vsel %vm7857_vm2, %v2253_v62, %v2257_v49  ;;  %v2266_v46 = vor.u32 %v8234_v18, %v8232_v11  ;;  %v2876_v40 = vrot.slane %v2875_v51, 4  ;;  %v2885_v3 = vor.u32 %v2884_v27, %v2880_v37  ;;  %v7313_v27 = vld [vmem:[#allocation2 + $0x58] sm:$0xf] }
 0x27d   : > { %v6175_v8 = vcombine.low %v2248_v52, %v2258_v60  ;;  %v2269_v4 = vshll.u32 %v7312_v13, 16  ;;  %v2628_v29 = vsel %vm7865_vm5, %v2626_v32, %v2627_v43  ;;  %v10012_v48 = vshrl.u32 %v10011_v0, 16 }
 0x27e   : > { %v2267_v58 = vrot.slane %v2266_v46, 4  ;;  %v2279_v33 = vshll.u32 %v2128_v38, 16  ;;  %v2881_v11 = vsel %vm7857_vm2, %v2876_v40, %v2880_v37  ;;  %v2886_v18 = vrot.slane %v2885_v3, 4  ;;  %v10013_v3 = vld [vmem:[#allocation21_spill] sm:$0xff] }
 0x27f   : > { %v2275_v57 = vrot.slane %v10012_v48, 4  ;;  %4895 = vmatmul.mubr.bf16.gmra.mrb[96].mxu1 %v6175_v8  ;;  %v6192_v19 = vcombine.low %v2625_v50, %v2628_v29  ;;  %v2271_v5 = vrot.slane %v2269_v4, 5  ;;  %v2893_v49 = vshrl.u32 %v8841_v59, 16  ;;  %v10014_v4 = vld [vmem:[#allocation22_spill] sm:$0xff] }
 0x280   : > { %v2281_v1 = vrot.slane %v2279_v33, 5  ;;  %v2896_v56 = vshll.u32 %v8841_v59, 16  ;;  %v2902_v2 = vshll.u32 %v8843_v30, 16  ;;  %v2891_v39 = vsel %vm7857_vm2, %v2886_v18, %v2890_v55  ;;  %v8875_v33 = vld [vmem:[#allocation2 + $0x70] sm:$0xf] }
 0x281   : > { %4902 = vmatprep.mubr.bf16.mxu1 %v6192_v19  ;;  %v2272_v38 = vsel %vm7857_vm2, %v2267_v58, %v2271_v5  ;;  %v2276_v52 = vor.u32 %v2275_v57, %v2271_v5  ;;  %v2906_v9 = vshrl.u32 %v8843_v30, 16  ;;  %v6224_v17 = vcombine.low %v2881_v11, %v2891_v39  ;;  %v8869_v58 = vld [vmem:[#allocation2 + $0x6c] sm:$0xf] }
 0x282   : > { %v2895_v37 = vrot.slane %v2893_v49, 4  ;;  %v2898_v10 = vrot.slane %v2896_v56, 5  ;;  %v2904_v12 = vrot.slane %v2902_v2, 5  ;;  %v2912_v13 = vshll.u32 %v2738_v45, 16  ;;  %v10015_v5 = vld [vmem:[#allocation20_spill] sm:$0xff] }
 0x283   : > { %v2277_v62 = vrot.slane %v2276_v52, 4  ;;  %v2908_v41 = vrot.slane %v2906_v9, 4  ;;  %v6081_v25 = vrot.slane %v2529_v53, 9  ;;  %5063 = vmatprep.mubr.bf16.mxu0 %v6224_v17  ;;  %v2631_v55 = vrot.slane %v7313_v27, 5 }
 0x284   : > { %v2899_v51 = vor.u32 %v2898_v10, %v2895_v37  ;;  %v2634_v60 = vrot.slane %v2129_v14, 5  ;;  %v6209_v50 = vcombine.low %v8841_v59, %v8843_v30  ;;  %5064 = vmatmul.mubr.bf16.gmra.mrb[100].mxu0 %v6208_v61  ;;  %v2914_v40 = vrot.slane %v2912_v13, 5  ;;  %v2739_v10 = vld [vmem:[#allocation2 + $0x74] sm:$0x1] }
 0x285   : > { %v8859_v43 = vpop.f32.mrb[20].mxu0  ;;  %v2282_v46 = vsel %vm7857_vm2, %v2277_v62, %v2281_v1  ;;  %v2909_v8 = vor.u32 %v2908_v41, %v2904_v12  ;;  %v2290_v29 = vor.u32 %v10014_v4, %v10013_v3  ;;  %v2632_v59 = vsel %vm7865_vm5, %v6081_v25, %v2631_v55 }
 0x286   : > { %v8863_v32 = vpop.f32.mrb[21].mxu0  ;;  %v6176_v48 = vcombine.low %v2272_v38, %v2282_v46  ;;  %v2900_v57 = vrot.slane %v2899_v51, 4  ;;  %v2633_v30 = vrot.slane %v2631_v55, 4  ;;  %v2293_v19 = vshll.u32 %v7313_v27, 16  ;;  %v2530_v38 = vld [vmem:[#allocation2 + $0x60] sm:$0xe] }
 0x287   : > { %v8871_v0 = vpop.f32.mrb[22].mxu0  ;;  %v2910_v11 = vrot.slane %v2909_v8, 4  ;;  %v2291_v18 = vrot.slane %v2290_v29, 4  ;;  %v10016_v45 = vshrl.u32 %v10015_v5, 16  ;;  %v2303_v53 = vshll.u32 %v2129_v14, 16 }
 0x288   : > { %v8877_v61 = vpop.f32.mrb[23].mxu0  ;;  %4903 = vmatmul.mubr.bf16.gmra.mrb[100].mxu1 %v6176_v48  ;;  %v2905_v56 = vsel %vm7857_vm2, %v2900_v57, %v2904_v12  ;;  %v2635_v2 = vsel %vm7865_vm5, %v2633_v30, %v2634_v60  ;;  %v2917_v39 = vshrl.u32 %v8869_v58, 16  ;;  %v2295_v37 = vrot.slane %v2293_v19, 5  ;;  %v2130_v51 = vld [vmem:[#allocation2 + $0x68] sm:$0x1] }
 0x289   : > { %v2299_v1 = vrot.slane %v10016_v45, 4  ;;  %v8881_v49 = vpop.f32.mrb[20].mxu1  ;;  %v2915_v9 = vsel %vm7857_vm2, %v2910_v11, %v2914_v40  ;;  %v6193_v17 = vcombine.low %v2632_v59, %v2635_v2  ;;  %v2920_v62 = vshll.u32 %v8869_v58, 16  ;;  %v7314_v29 = vld [vmem:[#allocation2 + $0x64] sm:$0xf] }
 0x28a   : > { %v8888_v52 = vpop.f32.mrb[21].mxu1  ;;  %v6225_v12 = vcombine.low %v2905_v56, %v2915_v9  ;;  %v2305_v13 = vrot.slane %v2303_v53, 5  ;;  %v2919_v25 = vrot.slane %v2917_v39, 4  ;;  %v2926_v14 = vshll.u32 %v8875_v33, 16  ;;  %v10017_v53 = vld [vmem:[#allocation24_spill] sm:$0xff] }
 0x28b   : > { %v8893_v41 = vpop.f32.mrb[22].mxu1  ;;  %4910 = vmatprep.mubr.bf16.mxu1 %v6193_v17  ;;  %v2296_v55 = vsel %vm7857_vm2, %v2291_v18, %v2295_v37  ;;  %v2300_v60 = vor.u32 %v2299_v1, %v2295_v37  ;;  %v2922_v46 = vrot.slane %v2920_v62, 5  ;;  %v2930_v8 = vshrl.u32 %v8875_v33, 16  ;;  %v8909_v39 = vld [vmem:[#allocation2 + $0x78] sm:$0xf] }
 0x28c   : > { %v8896_v27 = vpop.f32.mrb[23].mxu1  ;;  %5071 = vmatprep.mubr.bf16.mxu0 %v6225_v12  ;;  %v2928_v40 = vrot.slane %v2926_v14, 5  ;;  %v2936_v3 = vshll.u32 %v2739_v10, 16  ;;  %v6082_v4 = vrot.slane %v2530_v38, 9  ;;  %v2638_v48 = vrot.slane %v7314_v29, 5 }
 0x28d   : > { %5072 = vmatmul.mubr.bf16.gmra.mrb[104].mxu0 %v6209_v50  ;;  %v2301_v57 = vrot.slane %v2300_v60, 4  ;;  %v2923_v59 = vor.u32 %v2922_v46, %v2919_v25  ;;  %v2932_v30 = vrot.slane %v2930_v8, 4  ;;  %v2641_v11 = vrot.slane %v2130_v51, 5  ;;  %v8911_v38 = vld [vmem:[#allocation2 + $0x7c] sm:$0xf] }
 0x28e   : > { %v2938_v19 = vrot.slane %v2936_v3, 5  ;;  %v2639_v5 = vsel %vm7865_vm5, %v6082_v4, %v2638_v48  ;;  %v2640_v18 = vrot.slane %v2638_v48, 4  ;;  %v6210_v45 = vcombine.low %v8869_v58, %v8875_v33  ;;  %v10018_v58 = vld [vmem:[#allocation23_spill] sm:$0xff] }
 0x28f   : > { %v2306_v1 = vsel %vm7857_vm2, %v2301_v57, %v2305_v13  ;;  %v2924_v56 = vrot.slane %v2923_v59, 4  ;;  %v2933_v2 = vor.u32 %v2932_v30, %v2928_v40  ;;  %v2314_v50 = vor.u32 %v8393_v15, %v10017_v53  ;;  %v2740_v12 = vld [vmem:[#allocation2 + $0x80] sm:$0x1]  ;;  %v2531_v30 = vld [vmem:[#allocation2 + $0x6c] sm:$0xe] }
 0x290   : > { %v6177_v17 = vcombine.low %v2296_v55, %v2306_v1  ;;  %v2642_v37 = vsel %vm7865_vm5, %v2640_v18, %v2641_v11  ;;  %v2317_v10 = vshll.u32 %v7314_v29, 16  ;;  %v10019_v33 = vshrl.u32 %v10018_v58, 16 }
 0x291   : > { %v8913_v9 = vpop.f32.mrb[24].mxu1  ;;  %v2929_v15 = vsel %vm7857_vm2, %v2924_v56, %v2928_v40  ;;  %v2934_v25 = vrot.slane %v2933_v2, 4  ;;  %v6194_v14 = vcombine.low %v2639_v5, %v2642_v37  ;;  %v2315_v60 = vrot.slane %v2314_v50, 4  ;;  %v2131_v56 = vld [vmem:[#allocation2 + $0x74] sm:$0x1] }
 0x292   : > { %v2323_v62 = vrot.slane %v10019_v33, 4  ;;  %v8919_v13 = vpop.f32.mrb[25].mxu1  ;;  %4911 = vmatmul.mubr.bf16.gmra.mrb[104].mxu1 %v6177_v17  ;;  %v2319_v55 = vrot.slane %v2317_v10, 5  ;;  %v2327_v8 = vshll.u32 %v2130_v51, 16  ;;  %v2941_v3 = vshrl.u32 %v8909_v39, 16 }
 0x293   : > { %v8923_v46 = vpop.f32.mrb[26].mxu1  ;;  %v2944_v4 = vshll.u32 %v8909_v39, 16  ;;  %v2939_v48 = vsel %vm7857_vm2, %v2934_v25, %v2938_v19  ;;  %4918 = vmatprep.mubr.bf16.mxu1 %v6194_v14  ;;  %v2950_v40 = vshll.u32 %v8911_v38, 16  ;;  %v2954_v57 = vshrl.u32 %v8911_v38, 16  ;;  %v8933_v11 = vpop.f32.mrb[24].mxu0 }
 0x294   : > { %v8927_v29 = vpop.f32.mrb[27].mxu1  ;;  %v2960_v59 = vshll.u32 %v2740_v12, 16  ;;  %v6226_v5 = vcombine.low %v2929_v15, %v2939_v48  ;;  %v2320_v51 = vsel %vm7857_vm2, %v2315_v60, %v2319_v55  ;;  %v2324_v18 = vor.u32 %v2323_v62, %v2319_v55  ;;  %v8937_v2 = vpop.f32.mrb[25].mxu0  ;;  %v7315_v12 = vld [vmem:[#allocation2 + $0x70] sm:$0xf] }
 0x295   : > { %v2329_v1 = vrot.slane %v2327_v8, 5  ;;  %v2943_v53 = vrot.slane %v2941_v3, 4  ;;  %v2946_v19 = vrot.slane %v2944_v4, 5  ;;  %v2952_v50 = vrot.slane %v2950_v40, 5  ;;  %v8939_v37 = vpop.f32.mrb[26].mxu0 }
 0x296   : > { %v2956_v17 = vrot.slane %v2954_v57, 4  ;;  %5079 = vmatprep.mubr.bf16.mxu0 %v6226_v5  ;;  %v2325_v10 = vrot.slane %v2324_v18, 4  ;;  %v2962_v58 = vrot.slane %v2960_v59, 5  ;;  %v6083_v33 = vrot.slane %v2531_v30, 9  ;;  %v8941_v25 = vpop.f32.mrb[27].mxu0 }
 0x297   : > { %v2645_v15 = vrot.slane %v7315_v12, 5  ;;  %5080 = vmatmul.mubr.bf16.gmra.mrb[108].mxu0 %v6210_v45  ;;  %v2947_v62 = vor.u32 %v2946_v19, %v2943_v53  ;;  %v2648_v60 = vrot.slane %v2131_v56, 5  ;;  %v6211_v55 = vcombine.low %v8909_v39, %v8911_v38  ;;  %v8951_v30 = vld [vmem:[#allocation2 + $0x84] sm:$0xf]  ;;  %v8957_v53 = vld [vmem:[#allocation2 + $0x88] sm:$0xf] }
 0x298   : > { %v2957_v14 = vor.u32 %v2956_v17, %v2952_v50  ;;  %v2330_v8 = vsel %vm7857_vm2, %v2325_v10, %v2329_v1  ;;  %v2338_v48 = vor.u32 %v8413_v24, %v8395_v7  ;;  %v2341_v45 = vshll.u32 %v7315_v12, 16  ;;  %v2741_v17 = vld [vmem:[#allocation2 + $0x8c] sm:$0x1]  ;;  %v2532_v10 = vld [vmem:[#allocation2 + $0x78] sm:$0xe] }
 0x299   : > { %v2646_v3 = vsel %vm7865_vm5, %v6083_v33, %v2645_v15  ;;  %v2647_v4 = vrot.slane %v2645_v15, 4  ;;  %v6178_v40 = vcombine.low %v2320_v51, %v2330_v8  ;;  %v2948_v57 = vrot.slane %v2947_v62, 4 }
 0x29a   : > { %v2958_v59 = vrot.slane %v2957_v14, 4  ;;  %v2339_v39 = vrot.slane %v2338_v48, 4  ;;  %v10020_v38 = vshrl.u32 %v8389_v21, 16  ;;  %v2351_v1 = vshll.u32 %v2131_v56, 16 }
 0x29b   : > { %v2649_v5 = vsel %vm7865_vm5, %v2647_v4, %v2648_v60  ;;  %4919 = vmatmul.mubr.bf16.gmra.mrb[108].mxu1 %v6178_v40  ;;  %v2953_v7 = vsel %vm7857_vm2, %v2948_v57, %v2952_v50  ;;  %v2343_v19 = vrot.slane %v2341_v45, 5  ;;  %v2965_v15 = vshrl.u32 %v8951_v30, 16  ;;  %v7316_v45 = vld [vmem:[#allocation2 + $0x7c] sm:$0xf] }
 0x29c   : > { %v2347_v18 = vrot.slane %v10020_v38, 4  ;;  %v2963_v24 = vsel %vm7857_vm2, %v2958_v59, %v2962_v58  ;;  %v6195_v51 = vcombine.low %v2646_v3, %v2649_v5  ;;  %v2353_v12 = vrot.slane %v2351_v1, 5  ;;  %v2132_v58 = vld [vmem:[#allocation2 + $0x80] sm:$0x1] }
 0x29d   : > { %v6227_v33 = vcombine.low %v2953_v7, %v2963_v24  ;;  %v2968_v21 = vshll.u32 %v8951_v30, 16  ;;  %v2344_v56 = vsel %vm7857_vm2, %v2339_v39, %v2343_v19  ;;  %v2974_v50 = vshll.u32 %v8957_v53, 16 }
 0x29e   : > { %4926 = vmatprep.mubr.bf16.mxu1 %v6195_v51  ;;  %v2348_v62 = vor.u32 %v2347_v18, %v2343_v19  ;;  %v2978_v14 = vshrl.u32 %v8957_v53, 16  ;;  %v2967_v60 = vrot.slane %v2965_v15, 4  ;;  %v2984_v3 = vshll.u32 %v2741_v17, 16 }
 0x29f   : > { %5087 = vmatprep.mubr.bf16.mxu0 %v6227_v33  ;;  %v2970_v8 = vrot.slane %v2968_v21, 5  ;;  %v6084_v4 = vrot.slane %v2532_v10, 9  ;;  %v8969_v48 = vpop.f32.mrb[28].mxu0  ;;  %v2976_v57 = vrot.slane %v2974_v50, 5  ;;  %v2652_v5 = vrot.slane %v7316_v45, 5  ;;  %v8971_v39 = vpop.f32.mrb[28].mxu1 }
 0x2a0   : > { %5088 = vmatmul.mubr.bf16.gmra.mrb[112].mxu0 %v6211_v55  ;;  %v2349_v40 = vrot.slane %v2348_v62, 4  ;;  %v2980_v59 = vrot.slane %v2978_v14, 4  ;;  %v8973_v38 = vpop.f32.mrb[29].mxu0  ;;  %v2986_v1 = vrot.slane %v2984_v3, 5  ;;  %v2655_v7 = vrot.slane %v2132_v58, 5  ;;  %v8977_v51 = vpop.f32.mrb[29].mxu1 }
 0x2a1   : > { %v2971_v18 = vor.u32 %v2970_v8, %v2967_v60  ;;  %v6212_v24 = vcombine.low %v8951_v30, %v8957_v53  ;;  %v8979_v19 = vpop.f32.mrb[30].mxu0  ;;  %v2653_v10 = vsel %vm7865_vm5, %v6084_v4, %v2652_v5  ;;  %v2654_v33 = vrot.slane %v2652_v5, 4  ;;  %v8985_v15 = vpop.f32.mrb[30].mxu1  ;;  %v8991_v14 = vld [vmem:[#allocation2 + $0x90] sm:$0xf] }
 0x2a2   : > { %v2354_v55 = vsel %vm7857_vm2, %v2349_v40, %v2353_v12  ;;  %v2981_v17 = vor.u32 %v2980_v59, %v2976_v57  ;;  %10021 = vst [vmem:[#allocation18_spill] sm:$0xff] %v8985_v15  ;;  %v8987_v21 = vpop.f32.mrb[31].mxu0  ;;  %v2362_v30 = vor.u32 %v8489_v26, %v8441_v35  ;;  %v2365_v53 = vshll.u32 %v7316_v45, 16  ;;  %v8993_v60 = vpop.f32.mrb[31].mxu1  ;;  %v10023_v3 = vld [vmem:[#allocation25_spill] sm:$0xff] }
 0x2a3   : > { %v6179_v62 = vcombine.low %v2344_v56, %v2354_v55  ;;  %v2972_v50 = vrot.slane %v2971_v18, 4  ;;  %10022 = vst [vmem:[#allocation19_spill] sm:$0xff] %v8993_v60  ;;  %v2656_v8 = vsel %vm7865_vm5, %v2654_v33, %v2655_v7  ;;  %v10024_v4 = vshrl.u32 %v10023_v3, 16  ;;  %v8999_v5 = vld [vmem:[#allocation2 + $0x94] sm:$0xf] }
 0x2a4   : > { %v2982_v12 = vrot.slane %v2981_v17, 4  ;;  %v2375_v59 = vshll.u32 %v2132_v58, 16  ;;  %v6196_v35 = vcombine.low %v2653_v10, %v2656_v8  ;;  %v2363_v26 = vrot.slane %v2362_v30, 4  ;;  %v2742_v18 = vld [vmem:[#allocation2 + $0x98] sm:$0x1] }
 0x2a5   : > { %v2371_v40 = vrot.slane %v10024_v4, 4  ;;  %4927 = vmatmul.mubr.bf16.gmra.mrb[112].mxu1 %v6179_v62  ;;  %v2977_v56 = vsel %vm7857_vm2, %v2972_v50, %v2976_v57  ;;  %v2367_v45 = vrot.slane %v2365_v53, 5  ;;  %v2989_v7 = vshrl.u32 %v8991_v14, 16  ;;  %v2533_v3 = vld [vmem:[#allocation2 + $0x84] sm:$0xe] }
 0x2a6   : > { %v2987_v55 = vsel %vm7857_vm2, %v2982_v12, %v2986_v1  ;;  %v2377_v17 = vrot.slane %v2375_v59, 5  ;;  %v2992_v33 = vshll.u32 %v8991_v14, 16  ;;  %4934 = vmatprep.mubr.bf16.mxu1 %v6196_v35  ;;  %v2998_v57 = vshll.u32 %v8999_v5, 16  ;;  %v2133_v10 = vld [vmem:[#allocation2 + $0x8c] sm:$0x1] }
 0x2a7   : > { %v6228_v58 = vcombine.low %v2977_v56, %v2987_v55  ;;  %v2368_v62 = vsel %vm7857_vm2, %v2363_v26, %v2367_v45  ;;  %v2372_v4 = vor.u32 %v2371_v40, %v2367_v45  ;;  %v2991_v50 = vrot.slane %v2989_v7, 4  ;;  %v7317_v60 = vld [vmem:[#allocation2 + $0x88] sm:$0xf] }
 0x2a8   : > { %v2994_v30 = vrot.slane %v2992_v33, 5  ;;  %v3002_v53 = vshrl.u32 %v8999_v5, 16  ;;  %v3008_v1 = vshll.u32 %v2742_v18, 16  ;;  %v3000_v8 = vrot.slane %v2998_v57, 5  ;;  %v9017_v33 = vld [vmem:[#allocation2 + $0x9c] sm:$0xf] }
 0x2a9   : > { %5095 = vmatprep.mubr.bf16.mxu0 %v6228_v58  ;;  %v2373_v12 = vrot.slane %v2372_v4, 4  ;;  %v6085_v59 = vrot.slane %v2533_v3, 9  ;;  %v2659_v15 = vrot.slane %v7317_v60, 5  ;;  %v2662_v26 = vrot.slane %v2133_v10, 5  ;;  %v9019_v3 = vld [vmem:[#allocation2 + $0xa0] sm:$0xf] }
 0x2aa   : > { %5096 = vmatmul.mubr.bf16.gmra.mrb[116].mxu0 %v6212_v24  ;;  %v2995_v56 = vor.u32 %v2994_v30, %v2991_v50  ;;  %v3004_v35 = vrot.slane %v3002_v53, 4  ;;  %v3010_v55 = vrot.slane %v3008_v1, 5  ;;  %v6213_v18 = vcombine.low %v8991_v14, %v8999_v5 }
 0x2ab   : > { %v2378_v40 = vsel %vm7857_vm2, %v2373_v12, %v2377_v17  ;;  %v2660_v45 = vsel %vm7865_vm5, %v6085_v59, %v2659_v15  ;;  %v2661_v7 = vrot.slane %v2659_v15, 4  ;;  %v9021_v58 = vpop.f32.mrb[32].mxu1  ;;  %v2386_v50 = vor.u32 %v8511_v34, %v8492_v54  ;;  %v2743_v17 = vld [vmem:[#allocation2 + $0xa4] sm:$0x1]  ;;  %v9025_v30 = vpop.f32.mrb[32].mxu0 }
 0x2ac   : > { %10025 = vst [vmem:[#allocation21_spill] sm:$0xff] %v9021_v58  ;;  %v6180_v24 = vcombine.low %v2368_v62, %v2378_v40  ;;  %v2996_v4 = vrot.slane %v2995_v56, 4  ;;  %v3005_v57 = vor.u32 %v3004_v35, %v3000_v8  ;;  %v9027_v53 = vpop.f32.mrb[33].mxu1  ;;  %v2389_v14 = vshll.u32 %v7317_v60, 16  ;;  %v9033_v59 = vpop.f32.mrb[33].mxu0 }
 0x2ad   : > { %10026 = vst [vmem:[#allocation22_spill] sm:$0xff] %v9027_v53  ;;  %v2663_v15 = vsel %vm7865_vm5, %v2661_v7, %v2662_v26  ;;  %v10027_v5 = vshrl.u32 %v8485_v42, 16  ;;  %v2399_v12 = vshll.u32 %v2133_v10, 16  ;;  %10028 = vst [vmem:[#allocation20_spill] sm:$0xff] %v9033_v59  ;;  %v9035_v62 = vpop.f32.mrb[34].mxu1  ;;  %v2387_v35 = vrot.slane %v2386_v50, 4 }
 0x2ae   : > { %10029 = vst [vmem:[#allocation24_spill] sm:$0xff] %v9035_v62  ;;  %4935 = vmatmul.mubr.bf16.gmra.mrb[116].mxu1 %v6180_v24  ;;  %v3001_v54 = vsel %vm7857_vm2, %v2996_v4, %v3000_v8  ;;  %v3006_v34 = vrot.slane %v3005_v57, 4  ;;  %v6197_v56 = vcombine.low %v2660_v45, %v2663_v15  ;;  %v9039_v40 = vpop.f32.mrb[34].mxu0  ;;  %v9041_v53 = vpop.f32.mrb[35].mxu1  ;;  %v2391_v60 = vrot.slane %v2389_v14, 5 }
 0x2af   : > { %v2395_v1 = vrot.slane %v10027_v5, 4  ;;  %10030 = vst [vmem:[#allocation23_spill] sm:$0xff] %v9039_v40  ;;  %10031 = vst [vmem:[#allocation25_spill] sm:$0xff] %v9041_v53  ;;  %v2401_v26 = vrot.slane %v2399_v12, 5  ;;  %v3013_v42 = vshrl.u32 %v9017_v33, 16  ;;  %v3016_v10 = vshll.u32 %v9017_v33, 16 }
 0x2b0   : > { %v9045_v7 = vpop.f32.mrb[35].mxu0  ;;  %v3011_v24 = vsel %vm7857_vm2, %v3006_v34, %v3010_v55  ;;  %4942 = vmatprep.mubr.bf16.mxu1 %v6197_v56  ;;  %v3022_v8 = vshll.u32 %v9019_v3, 16  ;;  %v3026_v45 = vshrl.u32 %v9019_v3, 16  ;;  %v3032_v4 = vshll.u32 %v2743_v17, 16  ;;  %v2534_v57 = vld [vmem:[#allocation2 + $0x90] sm:$0xe] }
 0x2b1   : > { %10032 = vst [vmem:[#allocation40_spill] sm:$0xff] %v9045_v7  ;;  %v6229_v50 = vcombine.low %v3001_v54, %v3011_v24  ;;  %v2392_v15 = vsel %vm7857_vm2, %v2387_v35, %v2391_v60  ;;  %v2396_v14 = vor.u32 %v2395_v1, %v2391_v60  ;;  %v3015_v5 = vrot.slane %v3013_v42, 4  ;;  %v2134_v12 = vld [vmem:[#allocation2 + $0x98] sm:$0x1]  ;;  %v7318_v58 = vld [vmem:[#allocation2 + $0x94] sm:$0xf] }
 0x2b2   : > { %v3018_v53 = vrot.slane %v3016_v10, 5  ;;  %v3024_v62 = vrot.slane %v3022_v8, 5  ;;  %v3028_v7 = vrot.slane %v3026_v45, 4  ;;  %v3034_v40 = vrot.slane %v3032_v4, 5 }
 0x2b3   : > { %5103 = vmatprep.mubr.bf16.mxu0 %v6229_v50  ;;  %v2397_v55 = vrot.slane %v2396_v14, 4  ;;  %v6416_v34 = vadd.f32 %v8625_v28, %v8602_v23  ;;  %v6086_v56 = vrot.slane %v2534_v57, 9  ;;  %v2666_v17 = vrot.slane %v7318_v58, 5 }
 0x2b4   : > { %5104 = vmatmul.mubr.bf16.gmra.mrb[120].mxu0 %v6213_v18  ;;  %v3019_v54 = vor.u32 %v3018_v53, %v3015_v5  ;;  %v3029_v24 = vor.u32 %v3028_v7, %v3024_v62  ;;  %v2669_v59 = vrot.slane %v2134_v12, 5  ;;  %v6419_v1 = vadd.f32 %v8635_v36, %v8630_v63  ;;  %v10034_v7 = vld [vmem:[#allocation28_spill] sm:$0xff]  ;;  %v10038_v5 = vld [vmem:[#allocation26_spill] sm:$0xff] }
 0x2b5   : > { %v2402_v35 = vsel %vm7857_vm2, %v2397_v55, %v2401_v26  ;;  %v2667_v60 = vsel %vm7865_vm5, %v6086_v56, %v2666_v17  ;;  %v2668_v42 = vrot.slane %v2666_v17, 4  ;;  %v6528_v23 = vadd.f32 %v8827_v31, %v8824_v16  ;;  %v9075_v16 = vld [vmem:[#allocation2 + $0xa8] sm:$0xf]  ;;  %v9077_v31 = vld [vmem:[#allocation2 + $0xac] sm:$0xf] }
 0x2b6   : > { %v6181_v28 = vcombine.low %v2392_v15, %v2402_v35  ;;  %v3020_v10 = vrot.slane %v3019_v54, 4  ;;  %v3030_v8 = vrot.slane %v3029_v24, 4  ;;  %v6531_v18 = vadd.f32 %v8833_v44, %v8829_v47  ;;  %v9065_v53 = vpop.f32.mrb[36].mxu0  ;;  %10035 = vst [vmem:[#allocation28_spill] sm:$0xff] %v9077_v31  ;;  %v9093_v56 = vld [vmem:[#allocation2 + $0xa4] sm:$0x1] }
 0x2b7   : > { %v2670_v63 = vsel %vm7865_vm5, %v2668_v42, %v2669_v59  ;;  %v9069_v36 = vadd.f32 %v6528_v23, %v6416_v34  ;;  %v6214_v26 = vcombine.low %v9017_v33, %v9019_v3  ;;  %v2410_v45 = vor.u32 %v10034_v7, %v8541_v22  ;;  %v9079_v4 = vpop.f32.mrb[37].mxu0  ;;  %v9087_v33 = vld [vmem:[#allocation2 + $0xb0] sm:$0x1]  ;;  %v2535_v3 = vld [vmem:[#allocation2 + $0x9c] sm:$0xe] }
 0x2b8   : > { %4943 = vmatmul.mubr.bf16.gmra.mrb[120].mxu1 %v6181_v28  ;;  %v3025_v47 = vsel %vm7857_vm2, %v3020_v10, %v3024_v62  ;;  %v3035_v44 = vsel %vm7857_vm2, %v3030_v8, %v3034_v40  ;;  %v6198_v59 = vcombine.low %v2667_v60, %v2670_v63  ;;  %v9085_v57 = vadd.f32 %v6531_v18, %v6419_v1  ;;  %v9089_v22 = vpop.f32.mrb[38].mxu0  ;;  %v9095_v62 = vpop.f32.mrb[36].mxu1  ;;  %v7280_v7 = vld [vmem:[#allocation9] sm:$0xff]  }
 0x2b9   : > { %10033 = vst [vmem:[#allocation41_spill] sm:$0xff] %v9069_v36  ;;  %10037 = vst [vmem:[#allocation43_spill] sm:$0xff] %v9087_v33  ;;  %v6230_v50 = vcombine.low %v3025_v47, %v3035_v44  ;;  %v2411_v15 = vrot.slane %v2410_v45, 4  ;;  %v2413_v14 = vshll.u32 %v7318_v58, 16  ;;  %v10039_v55 = vshrl.u32 %v10038_v5, 16  ;;  %v9097_v17 = vpop.f32.mrb[39].mxu0  ;;  %6990 = vmatprep.subr.bf16.mxu0 %v7280_v7 }
 0x2ba   : > { %10036 = vst [vmem:[#allocation42_spill] sm:$0xff] %v9085_v57  ;;  %4950 = vmatprep.mubr.bf16.mxu1 %v6198_v59  ;;  %v2423_v40 = vshll.u32 %v2134_v12, 16  ;;  %v3037_v54 = vshrl.u32 %v9075_v16, 16  ;;  %v3040_v24 = vshll.u32 %v9075_v16, 16  ;;  %v3046_v1 = vshll.u32 %v9077_v31, 16  ;;  %v9102_v35 = vpop.f32.mrb[37].mxu1  ;;  %6991 = vmatpush3.bf16.msra.mxu0 %v7280_v7 }
 0x2bb   : > { %v2419_v34 = vrot.slane %v10039_v55, 4  ;;  %5111 = vmatprep.mubr.bf16.mxu0 %v6230_v50  ;;  %v2415_v58 = vrot.slane %v2413_v14, 5  ;;  %v3050_v60 = vshrl.u32 %v9077_v31, 16  ;;  %v3056_v42 = vshll.u32 %v9087_v33, 16  ;;  %v9106_v28 = vpop.f32.mrb[38].mxu1  ;;  %v10044_v7 = vld [vmem:[#allocation31_spill] sm:$0xff] }
 0x2bc   : > { %v6087_v23 = vrot.slane %v2535_v3, 9  ;;  %5112 = vmatmul.mubr.bf16.gmra.mrb[124].mxu0 %v6214_v26  ;;  %v2425_v10 = vrot.slane %v2423_v40, 5  ;;  %v3039_v12 = vrot.slane %v3037_v54, 4  ;;  %v3042_v8 = vrot.slane %v3040_v24, 5  ;;  %v9108_v63 = vpop.f32.mrb[39].mxu1  ;;  %v7282_v33 = vld [vmem:[#allocation9 + $0x10] sm:$0xff]  }
 0x2bd   : > { %v3048_v18 = vrot.slane %v3046_v1, 5  ;;  %v2416_v45 = vsel %vm7857_vm2, %v2411_v15, %v2415_v58  ;;  %v2420_v47 = vor.u32 %v2419_v34, %v2415_v58  ;;  %v3052_v44 = vrot.slane %v3050_v60, 4  ;;  %v7319_v14 = vld [vmem:[#allocation2 + $0xa0] sm:$0xf] }
 0x2be   : > { %v3058_v59 = vrot.slane %v3056_v42, 5  ;;  %v3043_v50 = vor.u32 %v3042_v8, %v3039_v12  ;;  %v2673_v5 = vrot.slane %v7319_v14, 5  ;;  %v2676_v3 = vrot.slane %v9093_v56, 5  ;;  %v10043_v8 = vld [vmem:[#allocation29_spill] sm:$0xff] }
 0x2bf   : > { %v6534_v26 = vadd.f32 %v8863_v32, %v8859_v43  ;;  %v2421_v55 = vrot.slane %v2420_v47, 4  ;;  %v3053_v40 = vor.u32 %v3052_v44, %v3048_v18  ;;  %v6422_v54 = vadd.f32 %v8888_v52, %v8881_v49  ;;  %v9129_v52 = vld [vmem:[#allocation2 + $0xb4] sm:$0xf]  ;;  %v9147_v44 = vld [vmem:[#allocation2 + $0xbc] sm:$0x1] }
 0x2c0   : > { %v6537_v15 = vadd.f32 %v8877_v61, %v8871_v0  ;;  %v3044_v34 = vrot.slane %v3043_v50, 4  ;;  %v2674_v24 = vsel %vm7865_vm5, %v6087_v23, %v2673_v5  ;;  %v2675_v1 = vrot.slane %v2673_v5, 4  ;;  %v9139_v23 = vld [vmem:[#allocation2 + $0xb8] sm:$0xf]  ;;  %10045 = vst [vmem:[#allocation29_spill] sm:$0xff] %v9147_v44  ;;  %v10046_v5 = vld [vmem:[#allocation27_spill] sm:$0xff] }
 0x2c1   : > { %v6425_v58 = vadd.f32 %v8896_v27, %v8893_v41  ;;  %v2426_v43 = vsel %vm7857_vm2, %v2421_v55, %v2425_v10  ;;  %v3054_v32 = vrot.slane %v3053_v40, 4  ;;  %v9125_v60 = vadd.f32 %v6534_v26, %v6422_v54  ;;  %v9131_v0 = vpop.f32.mrb[40].mxu1  ;;  %10042 = vst [vmem:[#allocation45_spill] sm:$0xff] %v9139_v23  ;;  %v9155_v54 = vld [vmem:[#allocation2 + $0xb0] sm:$0x1] }
 0x2c2   : > { %v6215_v49 = vcombine.low %v9075_v16, %v9077_v31  ;;  %v6182_v61 = vcombine.low %v2416_v45, %v2426_v43  ;;  %v3049_v42 = vsel %vm7857_vm2, %v3044_v34, %v3048_v18  ;;  %v2677_v41 = vsel %vm7865_vm5, %v2675_v1, %v2676_v3  ;;  %v9141_v10 = vpop.f32.mrb[41].mxu1 }
 0x2c3   : > { %10040 = vst [vmem:[#allocation26_spill] sm:$0xff] %v9125_v60  ;;  %v9137_v27 = vadd.f32 %v6537_v15, %v6425_v58  ;;  %v3059_v16 = vsel %vm7857_vm2, %v3054_v32, %v3058_v59  ;;  %v6199_v12 = vcombine.low %v2674_v24, %v2677_v41  ;;  %v2434_v47 = vor.u32 %v10044_v7, %v10043_v8  ;;  %v9149_v18 = vpop.f32.mrb[42].mxu1  ;;  %v2536_v59 = vld [vmem:[#allocation2 + $0xa8] sm:$0xe] }
 0x2c4   : > { %v2437_v45 = vshll.u32 %v7319_v14, 16  ;;  %4951 = vmatmul.mubr.bf16.gmra.mrb[124].mxu1 %v6182_v61  ;;  %v6231_v50 = vcombine.low %v3049_v42, %v3059_v16  ;;  %v10047_v3 = vshrl.u32 %v10046_v5, 16  ;;  %v2447_v55 = vshll.u32 %v9093_v56, 16  ;;  %v9157_v15 = vpop.f32.mrb[43].mxu1  ;;  %v7320_v5 = vld [vmem:[#allocation2 + $0xac] sm:$0xf] }
 0x2c5   : > { %10041 = vst [vmem:[#allocation44_spill] sm:$0xff] %v9137_v27  ;;  %v3061_v40 = vshrl.u32 %v9129_v52, 16  ;;  %4958 = vmatprep.mubr.bf16.mxu1 %v6199_v12  ;;  %v2435_v14 = vrot.slane %v2434_v47, 4  ;;  %v3064_v24 = vshll.u32 %v9129_v52, 16  ;;  %v3070_v1 = vshll.u32 %v9139_v23, 16  ;;  %v9161_v58 = vpop.f32.mrb[40].mxu0 }
 0x2c6   : > { %v2443_v26 = vrot.slane %v10047_v3, 4  ;;  %v2439_v34 = vrot.slane %v2437_v45, 5  ;;  %5119 = vmatprep.mubr.bf16.mxu0 %v6231_v50  ;;  %v2449_v43 = vrot.slane %v2447_v55, 5  ;;  %v3074_v56 = vshrl.u32 %v9139_v23, 16  ;;  %v9165_v42 = vpop.f32.mrb[41].mxu0 }
 0x2c7   : > { %v3063_v32 = vrot.slane %v3061_v40, 4  ;;  %v3080_v61 = vshll.u32 %v9147_v44, 16  ;;  %5120 = vmatmul.mubr.bf16.gmra.mrb[128].mxu0 %v6215_v49  ;;  %v3066_v12 = vrot.slane %v3064_v24, 5  ;;  %v3072_v8 = vrot.slane %v3070_v1, 5  ;;  %v9169_v7 = vpop.f32.mrb[42].mxu0 }
 0x2c8   : > { %v2440_v41 = vsel %vm7857_vm2, %v2435_v14, %v2439_v34  ;;  %v2444_v16 = vor.u32 %v2443_v26, %v2439_v34  ;;  %v3076_v47 = vrot.slane %v3074_v56, 4  ;;  %v6088_v50 = vrot.slane %v2536_v59, 9  ;;  %v9171_v55 = vpop.f32.mrb[43].mxu0 }
 0x2c9   : > { %v3082_v45 = vrot.slane %v3080_v61, 5  ;;  %v2680_v3 = vrot.slane %v7320_v5, 5  ;;  %v3067_v27 = vor.u32 %v3066_v12, %v3063_v32  ;;  %v2683_v60 = vrot.slane %v9155_v54, 5  ;;  %v9190_v12 = vld [vmem:[#allocation2 + $0xc0] sm:$0xf] }
 0x2ca   : > { %v2445_v40 = vrot.slane %v2444_v16, 4  ;;  %v6540_v49 = vadd.f32 %v8937_v2, %v8933_v11  ;;  %v3077_v14 = vor.u32 %v3076_v47, %v3072_v8  ;;  %v6428_v24 = vadd.f32 %v8919_v13, %v8913_v9  ;;  %v10053_v47 = vld [vmem:[#allocation30_spill] sm:$0xff] }
 0x2cb   : > { %v2681_v26 = vsel %vm7865_vm5, %v6088_v50, %v2680_v3  ;;  %v2682_v34 = vrot.slane %v2680_v3, 4  ;;  %v3068_v1 = vrot.slane %v3067_v27, 4  ;;  %v6543_v32 = vadd.f32 %v8941_v25, %v8939_v37  ;;  %v9198_v25 = vld [vmem:[#allocation2 + $0xc4] sm:$0xf] }
 0x2cc   : > { %v2450_v59 = vsel %vm7857_vm2, %v2445_v40, %v2449_v43  ;;  %v6431_v56 = vadd.f32 %v8927_v29, %v8923_v46  ;;  %v3078_v11 = vrot.slane %v3077_v14, 4  ;;  %v9188_v16 = vadd.f32 %v6540_v49, %v6428_v24  ;;  %10050 = vst [vmem:[#allocation46_spill] sm:$0xff] %v9198_v25  ;;  %v10051_v29 = vld [vmem:[#allocation32_spill] sm:$0xff] }
 0x2cd   : > { %v6183_v61 = vcombine.low %v2440_v41, %v2450_v59  ;;  %v2684_v2 = vsel %vm7865_vm5, %v2682_v34, %v2683_v60  ;;  %v3073_v9 = vsel %vm7857_vm2, %v3068_v1, %v3072_v8  ;;  %v6216_v37 = vcombine.low %v9129_v52, %v9139_v23  ;;  %v10052_v60 = vld [vmem:[#allocation33_spill] sm:$0xff]  ;;  %v9206_v8 = vld [vmem:[#allocation2 + $0xc8] sm:$0x1] }
 0x2ce   : > { %10048 = vst [vmem:[#allocation31_spill] sm:$0xff] %v9188_v16  ;;  %v6200_v13 = vcombine.low %v2681_v26, %v2684_v2  ;;  %v9194_v27 = vadd.f32 %v6543_v32, %v6431_v56  ;;  %v3083_v46 = vsel %vm7857_vm2, %v3078_v11, %v3082_v45  ;;  %v2458_v43 = vor.u32 %v10052_v60, %v10051_v29  ;;  %v9211_v26 = vld [vmem:[#allocation2 + $0xbc] sm:$0x1]  ;;  %v2537_v45 = vld [vmem:[#allocation2 + $0xb4] sm:$0xe] }
 0x2cf   : > { %4959 = vmatmul.mubr.bf16.gmra.mrb[128].mxu1 %v6183_v61  ;;  %v2461_v41 = vshll.u32 %v7320_v5, 16  ;;  %v10054_v50 = vshrl.u32 %v10053_v47, 16  ;;  %10055 = vst [vmem:[#allocation32_spill] sm:$0xff] %v9206_v8  ;;  %v6232_v40 = vcombine.low %v3073_v9, %v3083_v46  ;;  %v2471_v49 = vshll.u32 %v9155_v54, 16  ;;  %v9213_v34 = vpop.f32.mrb[44].mxu0  ;;  %v9217_v32 = vpop.f32.mrb[44].mxu1 }
 0x2d0   : > { %10049 = vst [vmem:[#allocation27_spill] sm:$0xff] %v9194_v27  ;;  %4966 = vmatprep.mubr.bf16.mxu1 %v6200_v13  ;;  %v3085_v52 = vshrl.u32 %v9190_v12, 16  ;;  %v3088_v14 = vshll.u32 %v9190_v12, 16  ;;  %v2459_v24 = vrot.slane %v2458_v43, 4  ;;  %v3094_v59 = vshll.u32 %v9198_v25, 16  ;;  %v9219_v56 = vpop.f32.mrb[45].mxu0 }
 0x2d1   : > { %v2467_v3 = vrot.slane %v10054_v50, 4  ;;  %v2463_v5 = vrot.slane %v2461_v41, 5  ;;  %v3098_v1 = vshrl.u32 %v9198_v25, 16  ;;  %5127 = vmatprep.mubr.bf16.mxu0 %v6232_v40  ;;  %v2473_v54 = vrot.slane %v2471_v49, 5  ;;  %v9222_v9 = vpop.f32.mrb[45].mxu1  ;;  %v9224_v13 = vpop.f32.mrb[46].mxu0 }
 0x2d2   : > { %v3087_v61 = vrot.slane %v3085_v52, 4  ;;  %v3090_v11 = vrot.slane %v3088_v14, 5  ;;  %v3104_v2 = vshll.u32 %v9206_v8, 16  ;;  %5128 = vmatmul.mubr.bf16.gmra.mrb[132].mxu0 %v6216_v37  ;;  %v3096_v60 = vrot.slane %v3094_v59, 5  ;;  %v9228_v41 = vpop.f32.mrb[46].mxu1  ;;  %v9230_v47 = vpop.f32.mrb[47].mxu0 }
 0x2d3   : > { %v2464_v46 = vsel %vm7857_vm2, %v2459_v24, %v2463_v5  ;;  %v2468_v29 = vor.u32 %v2467_v3, %v2463_v5  ;;  %v3100_v43 = vrot.slane %v3098_v1, 4  ;;  %v7281_v50 = vld [vmem:[#allocation9 + $0x8] sm:$0xff]   ;;  %v6089_v52 = vrot.slane %v2537_v45, 9  ;;  %v7321_v14 = vld [vmem:[#allocation2 + $0xb8] sm:$0xf]  ;;  %v9232_v16 = vpop.f32.mrb[47].mxu1 }
 0x2d4   : > { %v3091_v40 = vor.u32 %v3090_v11, %v3087_v61  ;;  %v3106_v49 = vrot.slane %v3104_v2, 5  ;;  %v2687_v27 = vrot.slane %v7321_v14, 5  ;;  %v2690_v36 = vrot.slane %v9211_v26, 5  ;;  %6992 = vmatprep.subr.bf16.mxu0 %v7281_v50  ;;  %v10056_v2 = vld [vmem:[#allocation18_spill] sm:$0xff] }
 0x2d5   : > { %v2469_v57 = vrot.slane %v2468_v29, 4  ;;  %v3101_v37 = vor.u32 %v3100_v43, %v3096_v60  ;;  %v6546_v3 = vadd.f32 %v8973_v38, %v8969_v48  ;;  %v6434_v45 = vadd.f32 %v8977_v51, %v8971_v39  ;;  %6993 = vmatpush3.bf16.msra.mxu0 %v7281_v50  ;;  %v10057_v29 = vld [vmem:[#allocation19_spill] sm:$0xff]  ;;  %v2138_v39 = vld [vmem:[#allocation2 + $0xc8] sm:$0x1] }
 0x2d6   : > { %v3092_v24 = vrot.slane %v3091_v40, 4  ;;  %v2688_v5 = vsel %vm7865_vm5, %v6089_v52, %v2687_v27  ;;  %v2689_v59 = vrot.slane %v2687_v27, 4  ;;  %v6549_v11 = vadd.f32 %v8987_v21, %v8979_v19  ;;  %v2538_v51 = vld [vmem:[#allocation2 + $0xc0] sm:$0xe]  ;;  %6994 = vmatprep.subr.bf16.mxu0 %v7282_v33 }
 0x2d7   : > { %v2474_v1 = vsel %vm7857_vm2, %v2469_v57, %v2473_v54  ;;  %v3102_v61 = vrot.slane %v3101_v37, 4  ;;  %v6437_v48 = vadd.f32 %v10057_v29, %v10056_v2  ;;  %v9251_v40 = vadd.f32 %v6546_v3, %v6434_v45  ;;  %v10065_v29 = vld [vmem:[#allocation21_spill] sm:$0xff] }
 0x2d8   : > { %v6184_v38 = vcombine.low %v2464_v46, %v2474_v1  ;;  %v3097_v43 = vsel %vm7857_vm2, %v3092_v24, %v3096_v60  ;;  %v2691_v27 = vsel %vm7865_vm5, %v2689_v59, %v2690_v36  ;;  %v6217_v19 = vcombine.low %v9190_v12, %v9198_v25  ;;  %v10060_v46 = vld [vmem:[#allocation35_spill] sm:$0xff]  ;;  %v10061_v60 = vld [vmem:[#allocation36_spill] sm:$0xff]  ;;  %v10062_v36 = vld [vmem:[#allocation34_spill] sm:$0xff] }
 0x2d9   : > { %10058 = vst [vmem:[#allocation33_spill] sm:$0xff] %v9251_v40  ;;  %v3107_v57 = vsel %vm7857_vm2, %v3102_v61, %v3106_v49  ;;  %v6201_v54 = vcombine.low %v2688_v5, %v2691_v27  ;;  %v9255_v50 = vadd.f32 %v6549_v11, %v6437_v48  ;;  %v2482_v52 = vor.u32 %v10061_v60, %v10060_v46  ;;  %v7322_v49 = vld [vmem:[#allocation2 + $0xc4] sm:$0xf]  ;;  %v10064_v12 = vld [vmem:[#allocation20_spill] sm:$0xff]  ;;  %v10066_v48 = vld [vmem:[#allocation22_spill] sm:$0xff] }
 0x2da   : > { %4967 = vmatmul.mubr.bf16.gmra.mrb[132].mxu1 %v6184_v38  ;;  %v6233_v21 = vcombine.low %v3097_v43, %v3107_v57  ;;  %v2485_v37 = vshll.u32 %v7321_v14, 16  ;;  %v10063_v3 = vshrl.u32 %v10062_v36, 16  ;;  %v2495_v59 = vshll.u32 %v9211_v26, 16  ;;  %v9268_v14 = vld [vmem:[#allocation2 + $0x2c] sm:$0x1]  ;;  %6995 = vmatpush3.bf16.msra.mxu0 %v7282_v33 }
 0x2db   : > { %10059 = vst [vmem:[#allocation30_spill] sm:$0xff] %v9255_v50  ;;  %4974 = vmatprep.mubr.bf16.mxu1 %v6201_v54  ;;  %v6090_v45 = vrot.slane %v2538_v51, 9  ;;  %v2694_v5 = vrot.slane %v7322_v49, 5  ;;  %v2697_v1 = vrot.slane %v2138_v39, 5  ;;  %v2483_v61 = vrot.slane %v2482_v52, 4  ;;  %v10067_v51 = vld [vmem:[#allocation23_spill] sm:$0xff] }
 0x2dc   : > { %v2491_v24 = vrot.slane %v10063_v3, 4  ;;  %5135 = vmatprep.mubr.bf16.mxu0 %v6233_v21  ;;  %v2487_v11 = vrot.slane %v2485_v37, 5  ;;  %v6552_v2 = vadd.f32 %v10064_v12, %v9025_v30  ;;  %v6440_v38 = vadd.f32 %v10066_v48, %v10065_v29  ;;  %v10068_v57 = vld [vmem:[#allocation40_spill] sm:$0xff]  ;;  %v9273_v46 = vpop.f32.mrb[48].mxu1  ;;  %v10071_v37 = vld [vmem:[#allocation25_spill] sm:$0xff]  ;;  %v10073_v29 = vld [vmem:[#allocation39_spill] sm:$0xff] }
 0x2dd   : > { %5136 = vmatmul.mubr.bf16.gmra.mrb[136].mxu0 %v6217_v19  ;;  %v2497_v27 = vrot.slane %v2495_v59, 5  ;;  %v2696_v26 = vrot.slane %v2694_v5, 4  ;;  %v6555_v54 = vadd.f32 %v10068_v57, %v10067_v51  ;;  %v2695_v60 = vsel %vm7865_vm5, %v6090_v45, %v2694_v5  ;;  %v10070_v52 = vld [vmem:[#allocation24_spill] sm:$0xff]  ;;  %v9283_v12 = vpop.f32.mrb[49].mxu1  ;;  %v10072_v59 = vld [vmem:[#allocation38_spill] sm:$0xff]  ;;  %v9293_v5 = vpop.f32.mrb[48].mxu0 }
 0x2de   : > { %v2492_v21 = vor.u32 %v2491_v24, %v2487_v11  ;;  %v9277_v30 = vadd.f32 %v6552_v2, %v6440_v38  ;;  %v6443_v36 = vadd.f32 %v10071_v37, %v10070_v52  ;;  %v9281_v3 = vld [vmem:[#allocation2 + $0xcc] sm:$0xf]  ;;  %v2506_v48 = vor.u32 %v10073_v29, %v10072_v59  ;;  %v10074_v24 = vld [vmem:[#allocation37_spill] sm:$0xff]  ;;  %v9295_v2 = vpop.f32.mrb[50].mxu1  ;;  %v9303_v59 = vpop.f32.mrb[49].mxu0 }
 0x2df   : > { %v2698_v19 = vsel %vm7865_vm5, %v2696_v26, %v2697_v1  ;;  %v2509_v51 = vshll.u32 %v7322_v49, 16  ;;  %v10075_v57 = vshrl.u32 %v10074_v24, 16  ;;  %v9291_v45 = vld [vmem:[#allocation2 + $0xd0] sm:$0xf]  ;;  %v2488_v38 = vsel %vm7857_vm2, %v2483_v61, %v2487_v11  ;;  %v9301_v26 = vld [vmem:[#allocation2 + $0xd4] sm:$0x1] }
 0x2e0   : > { %10069 = vst [vmem:[#allocation18_spill] sm:$0xff] %v9277_v30  ;;  %v2493_v52 = vrot.slane %v2492_v21, 4  ;;  %v9299_v37 = vadd.f32 %v6555_v54, %v6443_v36  ;;  %v2519_v1 = vshll.u32 %v2138_v39, 16  ;;  %v9305_v49 = vpop.f32.mrb[51].mxu1  ;;  %v2507_v29 = vrot.slane %v2506_v48, 4  ;;  %v9309_v50 = vpop.f32.mrb[50].mxu0 }
 0x2e1   : > { %v2515_v43 = vrot.slane %v10075_v57, 4  ;;  %v2511_v24 = vrot.slane %v2509_v51, 5  ;;  %v3109_v57 = vshrl.u32 %v9281_v3, 16  ;;  %v3112_v30 = vshll.u32 %v9281_v3, 16  ;;  %v3132_v21 = vld [vmem:[#allocation2 + $0x18] sm:$0xe] }
 0x2e2   : > { %10076 = vst [vmem:[#allocation19_spill] sm:$0xff] %v9299_v37  ;;  %v2498_v61 = vsel %vm7857_vm2, %v2493_v52, %v2497_v27  ;;  %v6202_v11 = vcombine.low %v2695_v60, %v2698_v19  ;;  %v3118_v39 = vshll.u32 %v9291_v45, 16  ;;  %v3122_v54 = vshrl.u32 %v9291_v45, 16  ;;  %v9315_v36 = vpop.f32.mrb[51].mxu0  ;;  %v7324_v52 = vld [vmem:[#allocation2 + $0x1c] sm:$0xf] }
 0x2e3   : > { %v6185_v37 = vcombine.low %v2488_v38, %v2498_v61  ;;  %v2516_v48 = vor.u32 %v2515_v43, %v2511_v24  ;;  %v2521_v51 = vrot.slane %v2519_v1, 5  ;;  %v3111_v40 = vrot.slane %v3109_v57, 4  ;;  %v7325_v57 = vld [vmem:[#allocation2 + $0x20] sm:$0x1] }
 0x2e4   : > { %v3114_v31 = vrot.slane %v3112_v30, 5  ;;  %v3120_v8 = vrot.slane %v3118_v39, 5  ;;  %v3124_v25 = vrot.slane %v3122_v54, 4  ;;  %v3128_v44 = vshll.u32 %v9301_v26, 16 }
 0x2e5   : > { %4975 = vmatmul.mubr.bf16.gmra.mrb[136].mxu1 %v6185_v37  ;;  %v2512_v27 = vsel %vm7857_vm2, %v2507_v29, %v2511_v24  ;;  %v2517_v60 = vrot.slane %v2516_v48, 4  ;;  %v6091_v19 = vrot.slane %v3132_v21, 9  ;;  %v3198_v23 = vrot.slane %v7324_v52, 5  ;;  %v3133_v24 = vld [vmem:[#allocation2 + $0x24] sm:$0xe] }
 0x2e6   : > { %4982 = vmatprep.mubr.bf16.mxu1 %v6202_v11  ;;  %v3115_v38 = vor.u32 %v3114_v31, %v3111_v40  ;;  %v3125_v43 = vor.u32 %v3124_v25, %v3120_v8  ;;  %v3130_v1 = vrot.slane %v3128_v44, 5  ;;  %v3201_v61 = vrot.slane %v7325_v57, 5 }
 0x2e7   : > { %v2522_v30 = vsel %vm7857_vm2, %v2517_v60, %v2521_v51  ;;  %v3200_v39 = vrot.slane %v3198_v23, 4  ;;  %v6218_v37 = vcombine.low %v9281_v3, %v9291_v45  ;;  %v6558_v29 = vadd.f32 %v9079_v4, %v9065_v53  ;;  %v3134_v53 = vld [vmem:[#allocation2 + $0x30] sm:$0xe] }
 0x2e8   : > { %v3116_v54 = vrot.slane %v3115_v38, 4  ;;  %v3126_v21 = vrot.slane %v3125_v43, 4  ;;  %v3199_v31 = vsel %vm7865_vm5, %v6091_v19, %v3198_v23  ;;  %v6446_v44 = vadd.f32 %v9102_v35, %v9095_v62  ;;  %v7328_v43 = vld [vmem:[#allocation2 + $0x38] sm:$0x1] }
 0x2e9   : > { %v6186_v33 = vcombine.low %v2512_v27, %v2522_v30  ;;  %v3202_v25 = vsel %vm7865_vm5, %v3200_v39, %v3201_v61  ;;  %v6561_v40 = vadd.f32 %v9097_v17, %v9089_v22  ;;  %v6449_v3 = vadd.f32 %v9108_v63, %v9106_v28  ;;  %v7326_v27 = vld [vmem:[#allocation2 + $0x28] sm:$0xf]  ;;  %v9344_v22 = vpop.f32.mrb[52].mxu0  ;;  %v7327_v28 = vld [vmem:[#allocation2 + $0x34] sm:$0xf] }
 0x2ea   : > { %v3121_v4 = vsel %vm7857_vm2, %v3116_v54, %v3120_v8  ;;  %v3131_v23 = vsel %vm7857_vm2, %v3126_v21, %v3130_v1  ;;  %v9340_v11 = vadd.f32 %v6558_v29, %v6446_v44  ;;  %v6092_v62 = vrot.slane %v3133_v24, 9  ;;  %v9350_v19 = vpop.f32.mrb[52].mxu1  ;;  %v9352_v52 = vpop.f32.mrb[53].mxu0  ;;  %v3136_v21 = vld [vmem:[#allocation2 + $0x48] sm:$0xe] }
 0x2eb   : > { %v6234_v35 = vcombine.low %v3121_v4, %v3131_v23  ;;  %v6235_v48 = vcombine.low %v3199_v31, %v3202_v25  ;;  %v9342_v51 = vadd.f32 %v6561_v40, %v6449_v3  ;;  %v3205_v60 = vrot.slane %v7326_v27, 5  ;;  %v9358_v30 = vpop.f32.mrb[53].mxu1  ;;  %v7330_v31 = vld [vmem:[#allocation2 + $0x4c] sm:$0xf] }
 0x2ec   : > { %v6093_v17 = vrot.slane %v3134_v53, 9  ;;  %v3212_v63 = vrot.slane %v7327_v28, 5  ;;  %v6564_v8 = vadd.f32 %v9165_v42, %v9161_v58  ;;  %v6452_v6 = vadd.f32 %v9141_v10, %v9131_v0  ;;  %v9360_v58 = vpop.f32.mrb[54].mxu0  ;;  %v3135_v42 = vld [vmem:[#allocation2 + $0x3c] sm:$0xe]  ;;  %v9364_v39 = vpop.f32.mrb[54].mxu1 }
 0x2ed   : > { %4983 = vmatmul.mubr.bf16.gmra.mrb[140].mxu1 %v6186_v33  ;;  %5143 = vmatprep.mubr.bf16.mxu0 %v6234_v35  ;;  %v3207_v38 = vrot.slane %v3205_v60, 4  ;;  %v3215_v1 = vrot.slane %v7328_v43, 5  ;;  %v6567_v57 = vadd.f32 %v9171_v55, %v9169_v7  ;;  %v6455_v61 = vadd.f32 %v9157_v15, %v9149_v18  ;;  %v9366_v29 = vpop.f32.mrb[55].mxu0  ;;  %v7329_v7 = vld [vmem:[#allocation2 + $0x40] sm:$0xf]  ;;  %v9370_v54 = vpop.f32.mrb[55].mxu1 }
 0x2ee   : > { %6958 = vmatprep.mubr.bf16.mxu1 %v6235_v48  ;;  %5144 = vmatmul.mubr.bf16.gmra.mrb[140].mxu0 %v6218_v37  ;;  %v3214_v0 = vrot.slane %v3212_v63, 4  ;;  %v9362_v10 = vadd.f32 %v6564_v8, %v6452_v6  ;;  %v3219_v55 = vrot.slane %v7329_v7, 5  ;;  %v3206_v18 = vsel %vm7865_vm5, %v6092_v62, %v3205_v60  ;;  %v7331_v53 = vld [vmem:[#allocation2 + $0x44] sm:$0x1]  ;;  %v7332_v28 = vld [vmem:[#allocation2 + $0x50] sm:$0x1] }
 0x2ef   : > { %v9368_v24 = vadd.f32 %v6567_v57, %v6455_v61  ;;  %v10077_v15 = vrot.slane %v9268_v14, 5  ;;  %v3226_v44 = vrot.slane %v7330_v31, 5  ;;  %v3213_v33 = vsel %vm7865_vm5, %v6093_v17, %v3212_v63  ;;  %v7334_v7 = vld [vmem:[#allocation2 + $0x64] sm:$0xf] }
 0x2f0   : > { %v3216_v25 = vsel %vm7865_vm5, %v3214_v0, %v3215_v1  ;;  %v6094_v40 = vrot.slane %v3135_v42, 9  ;;  %v3221_v3 = vrot.slane %v3219_v55, 4  ;;  %v3222_v4 = vrot.slane %v7331_v53, 5  ;;  %v3138_v42 = vld [vmem:[#allocation2 + $0x60] sm:$0xe] }
 0x2f1   : > { %v3209_v37 = vsel %vm7865_vm5, %v3207_v38, %v10077_v15  ;;  %v6570_v23 = vadd.f32 %v9219_v56, %v9213_v34  ;;  %v6458_v14 = vadd.f32 %v9222_v9, %v9217_v32  ;;  %v6095_v35 = vrot.slane %v3136_v21, 9  ;;  %v3137_v34 = vld [vmem:[#allocation2 + $0x54] sm:$0xe]  ;;  %v7333_v56 = vld [vmem:[#allocation2 + $0x58] sm:$0xf] }
 0x2f2   : > { %v6236_v62 = vcombine.low %v3206_v18, %v3209_v37  ;;  %v6573_v48 = vadd.f32 %v9230_v47, %v9224_v13  ;;  %v6461_v27 = vadd.f32 %v9232_v16, %v9228_v41  ;;  %v6237_v60 = vcombine.low %v3213_v33, %v3216_v25  ;;  %v7283_v16 = vld [vmem:[#allocation9 + $0x18] sm:$0xff]   ;;  %v3139_v18 = vld [vmem:[#allocation2 + $0x6c] sm:$0xe]  ;;  %v3140_v25 = vld [vmem:[#allocation2 + $0x78] sm:$0xe] }
 0x2f3   : > { %v3228_v17 = vrot.slane %v3226_v44, 4  ;;  %v3229_v63 = vrot.slane %v7332_v28, 5  ;;  %v9390_v8 = vadd.f32 %v6570_v23, %v6458_v14  ;;  %v3233_v32 = vrot.slane %v7333_v56, 5  ;;  %6996 = vmatprep.subr.bf16.mxu0 %v7283_v16  ;;  %v7338_v23 = vld [vmem:[#allocation2 + $0x68] sm:$0x1] }
 0x2f4   : > { %v9392_v6 = vadd.f32 %v6573_v48, %v6461_v27  ;;  %v3220_v9 = vsel %vm7865_vm5, %v6094_v40, %v3219_v55  ;;  %v3223_v13 = vsel %vm7865_vm5, %v3221_v3, %v3222_v4  ;;  %v6576_v41 = vadd.f32 %v9303_v59, %v9293_v5  ;;  %6997 = vmatpush3.bf16.msra.mxu0 %v7283_v16  ;;  %v7337_v40 = vld [vmem:[#allocation2 + $0x7c] sm:$0xf] }
 0x2f5   : > { %6959 = vmatmul.mubr.bf16.vlgmr.msra.gmra.mrb[144].mxu1 %v6236_v62  ;;  %v6464_v47 = vadd.f32 %v9283_v12, %v9273_v46  ;;  %v6579_v38 = vadd.f32 %v9315_v36, %v9309_v50  ;;  %v6467_v43 = vadd.f32 %v9305_v49, %v9295_v2  ;;  %v6474_v1 = vpop.f32.mrb[56].mxu1  ;;  %v3227_v57 = vsel %vm7865_vm5, %v6095_v35, %v3226_v44  ;;  %v7335_v12 = vld [vmem:[#allocation2 + $0x5c] sm:$0x1]  ;;  %v7336_v44 = vld [vmem:[#allocation2 + $0x70] sm:$0xf] }
 0x2f6   : > { %6962 = vmatprep.mubr.bf16.mxu1 %v6237_v60  ;;  %v3230_v61 = vsel %vm7865_vm5, %v3228_v17, %v3229_v63  ;;  %v6096_v0 = vrot.slane %v3137_v34, 9  ;;  %v3240_v5 = vrot.slane %v7334_v7, 5  ;;  %v6475_v59 = vpop.f32.mrb[57].mxu1  ;;  %v3235_v46 = vrot.slane %v3233_v32, 4 }
 0x2f7   : > { %v3236_v55 = vrot.slane %v7335_v12, 5  ;;  %v9410_v50 = vadd.f32 %v6576_v41, %v6464_v47  ;;  %v9412_v36 = vadd.f32 %v6579_v38, %v6467_v43  ;;  %v6477_v2 = vpop.f32.mrb[58].mxu1  ;;  %v6238_v49 = vcombine.low %v3220_v9, %v3223_v13  ;;  %v6586_v15 = vpop.f32.mrb[56].mxu0 }
 0x2f8   : > { %v6478_v37 = vpop.f32.mrb[59].mxu1  ;;  %v6239_v21 = vcombine.low %v3227_v57, %v3230_v61  ;;  %v6097_v31 = vrot.slane %v3138_v42, 9  ;;  %v3247_v33 = vrot.slane %v7336_v44, 5  ;;  %v3254_v3 = vrot.slane %v7337_v40, 5  ;;  %v6587_v53 = vpop.f32.mrb[57].mxu0  ;;  %v10078_v44 = vld [vmem:[#allocation45_spill] sm:$0xff] }
 0x2f9   : > { %v3242_v4 = vrot.slane %v3240_v5, 4  ;;  %v3243_v14 = vrot.slane %v7338_v23, 5  ;;  %v6582_v62 = vadd.f32 %v9352_v52, %v9344_v22  ;;  %v6470_v35 = vadd.f32 %v9358_v30, %v9350_v19  ;;  %v6589_v48 = vpop.f32.mrb[58].mxu0  ;;  %v7339_v52 = vld [vmem:[#allocation2 + $0x74] sm:$0x1] }
 0x2fa   : > { %v3234_v27 = vsel %vm7865_vm5, %v6096_v0, %v3233_v32  ;;  %v3237_v60 = vsel %vm7865_vm5, %v3235_v46, %v3236_v55  ;;  %v6585_v17 = vadd.f32 %v9366_v29, %v9360_v58  ;;  %v6473_v28 = vadd.f32 %v9370_v54, %v9364_v39  ;;  %v6590_v63 = vpop.f32.mrb[59].mxu0  ;;  %v7340_v32 = vld [vmem:[#allocation2 + $0x80] sm:$0x1]  ;;  %v9440_v61 = vld [vmem:[#allocation2 + $0x84] sm:$0xe]  ;;  %v10079_v23 = vld [vmem:[#allocation29_spill] sm:$0xff] }
 0x2fb   : > { %v6098_v22 = vrot.slane %v3139_v18, 9  ;;  %v3250_v34 = vrot.slane %v7339_v52, 5  ;;  %v6099_v19 = vrot.slane %v3140_v25, 9  ;;  %v9426_v30 = vadd.f32 %v6582_v62, %v6470_v35  ;;  %v7341_v46 = vld [vmem:[#allocation2 + $0x88] sm:$0xf]  ;;  %v10080_v35 = vld [vmem:[#allocation46_spill] sm:$0xff] }
 0x2fc   : > { %v3249_v56 = vrot.slane %v3247_v33, 4  ;;  %v3256_v9 = vrot.slane %v3254_v3, 4  ;;  %v3257_v13 = vrot.slane %v7340_v32, 5  ;;  %v9428_v16 = vadd.f32 %v6585_v17, %v6473_v28  ;;  %v3146_v55 = vld [vmem:[#allocation2 + $0xc0] sm:$0xe]  ;;  %v7284_v52 = vld [vmem:[#allocation9 + $0x20] sm:$0xff]  }
 0x2fd   : > { %6963 = vmatmul.mubr.bf16.gmra.mrb[148].mxu1 %v6238_v49  ;;  %v3241_v58 = vsel %vm7865_vm5, %v6097_v31, %v3240_v5  ;;  %v3244_v39 = vsel %vm7865_vm5, %v3242_v4, %v3243_v14  ;;  %v6588_v29 = vadd.f32 %v6587_v53, %v6586_v15  ;;  %v6476_v54 = vadd.f32 %v6475_v59, %v6474_v1  ;;  %v3145_v5 = vld [vmem:[#allocation2 + $0xb4] sm:$0xe]  ;;  %v9451_v49 = vld [vmem:[#allocation2 + $0x90] sm:$0xe]  ;;  %v3147_v25 = vld [vmem:[#allocation2 + $0xcc] sm:$0xe] }
 0x2fe   : > { %6966 = vmatprep.mubr.bf16.mxu1 %v6239_v21  ;;  %v6591_v41 = vadd.f32 %v6590_v63, %v6589_v48  ;;  %v6479_v47 = vadd.f32 %v6478_v37, %v6477_v2  ;;  %v6240_v38 = vcombine.low %v3234_v27, %v3237_v60  ;;  %v3248_v43 = vsel %vm7865_vm5, %v6098_v22, %v3247_v33  ;;  %v7342_v40 = vld [vmem:[#allocation2 + $0x8c] sm:$0x1] }
 0x2ff   : > { %v9438_v57 = vsel %vm7865_vm5, %v6099_v19, %v3254_v3  ;;  %v3251_v0 = vsel %vm7865_vm5, %v3249_v56, %v3250_v34  ;;  %v3258_v42 = vsel %vm7865_vm5, %v3256_v9, %v3257_v13  ;;  %v9446_v7 = vadd.f32 %v6588_v29, %v6476_v54  ;;  %v7343_v34 = vld [vmem:[#allocation2 + $0x94] sm:$0xf]  ;;  %6998 = vmatprep.subr.bf16.mxu0 %v7284_v52 }
 0x300   : > { %v9448_v1 = vadd.f32 %v6591_v41, %v6479_v47  ;;  %v6241_v59 = vcombine.low %v3241_v58, %v3244_v39  ;;  %v3261_v12 = vrot.slane %v7341_v46, 5  ;;  %v6100_v2 = vrot.slane %v9440_v61, 9  ;;  %6999 = vmatpush3.bf16.msra.mxu0 %v7284_v52 }
 0x301   : > { %v6242_v18 = vcombine.low %v3248_v43, %v3251_v0  ;;  %v6243_v15 = vcombine.low %v9438_v57, %v3258_v42  ;;  %v6104_v31 = vrot.slane %v3145_v5, 9  ;;  %v3289_v33 = vrot.slane %v10078_v44, 5  ;;  %v7344_v0 = vld [vmem:[#allocation2 + $0x98] sm:$0x1] }
 0x302   : > { %v3264_v3 = vrot.slane %v7342_v40, 5  ;;  %v3292_v14 = vrot.slane %v10079_v23, 5  ;;  %v6105_v62 = vrot.slane %v3146_v55, 9  ;;  %v3296_v48 = vrot.slane %v10080_v35, 5 }
 0x303   : > { %v6592_v37 = vpop.f32.mrb[60].mxu0  ;;  %v3263_v27 = vrot.slane %v3261_v12, 4  ;;  %v6101_v60 = vrot.slane %v9451_v49, 9  ;;  %v3268_v19 = vrot.slane %v7343_v34, 5  ;;  %v9460_v32 = vsel %vm7865_vm5, %v6104_v31, %v3289_v33 }
 0x304   : > { %v6480_v21 = vpop.f32.mrb[60].mxu1  ;;  %v6593_v53 = vpop.f32.mrb[61].mxu0  ;;  %v3291_v13 = vrot.slane %v3289_v33, 4  ;;  %v9464_v58 = vsel %vm7865_vm5, %v6105_v62, %v3296_v48  ;;  %v3298_v41 = vrot.slane %v3296_v48, 4  ;;  %v6106_v57 = vrot.slane %v3147_v25, 9 }
 0x305   : > { %6967 = vmatmul.mubr.bf16.gmra.mrb[152].mxu1 %v6240_v38  ;;  %v6481_v4 = vpop.f32.mrb[61].mxu1  ;;  %v6594_v17 = vadd.f32 %v6593_v53, %v6592_v37  ;;  %v6595_v63 = vpop.f32.mrb[62].mxu0  ;;  %v10081_v38 = vld [vmem:[#allocation32_spill] sm:$0xff]  ;;  %v3303_v61 = vrot.slane %v9291_v45, 5  ;;  %v3271_v42 = vrot.slane %v7344_v0, 5  ;;  %v3306_v46 = vrot.slane %v9301_v26, 5 }
 0x306   : > { %6970 = vmatprep.mubr.bf16.mxu1 %v6241_v59  ;;  %v6482_v28 = vadd.f32 %v6481_v4, %v6480_v21  ;;  %v6483_v22 = vpop.f32.mrb[62].mxu1  ;;  %v6596_v56 = vpop.f32.mrb[63].mxu0  ;;  %v9470_v47 = vsel %vm7865_vm5, %v3291_v13, %v3292_v14  ;;  %v3299_v43 = vrot.slane %v10081_v38, 5  ;;  %v3270_v55 = vrot.slane %v3268_v19, 4  ;;  %v3143_v53 = vld [vmem:[#allocation2 + $0x9c] sm:$0xe] }
 0x307   : > { %v6484_v9 = vpop.f32.mrb[63].mxu1  ;;  %v6597_v29 = vadd.f32 %v6596_v56, %v6595_v63  ;;  %v6248_v59 = vcombine.low %v9460_v32, %v9470_v47  ;;  %v9485_v37 = vsel %vm7865_vm5, %v6106_v57, %v3303_v61  ;;  %v3305_v45 = vrot.slane %v3303_v61, 4  ;;  %v7345_v4 = vld [vmem:[#allocation2 + $0xa0] sm:$0xf]  ;;  %v3144_v63 = vld [vmem:[#allocation2 + $0xa8] sm:$0xe] }
 0x308   : > { %v9466_v39 = vadd.f32 %v6594_v17, %v6482_v28  ;;  %v6485_v54 = vadd.f32 %v6484_v9, %v6483_v22  ;;  %v9481_v49 = vsel %vm7865_vm5, %v3298_v41, %v3299_v43  ;;  %v3262_v26 = vsel %vm7865_vm5, %v6100_v2, %v3261_v12  ;;  %v10083_v43 = vld [vmem:[#allocation43_spill] sm:$0xff] }
 0x309   : > { %v6249_v21 = vcombine.low %v9464_v58, %v9481_v49  ;;  %v9495_v40 = vsel %vm7865_vm5, %v3305_v45, %v3306_v46  ;;  %v3269_v12 = vsel %vm7865_vm5, %v6101_v60, %v3268_v19  ;;  %v3272_v2 = vsel %vm7865_vm5, %v3270_v55, %v3271_v42 }
 0x30a   : > { %v9474_v5 = vadd.f32 %v6597_v29, %v6485_v54  ;;  %v6250_v48 = vcombine.low %v9485_v37, %v9495_v40  ;;  %v6102_v9 = vrot.slane %v3143_v53, 9  ;;  %v6245_v13 = vcombine.low %v3269_v12, %v3272_v2  ;;  %v7346_v54 = vld [vmem:[#allocation2 + $0xa4] sm:$0x1] }
 0x30b   : > { %v6598_v31 = vpop.f32.mrb[64].mxu0  ;;  %v3278_v41 = vrot.slane %v7346_v54, 5  ;;  %v6103_v60 = vrot.slane %v3144_v63, 9  ;;  %v3285_v57 = vrot.slane %v10083_v43, 5 }
 0x30c   : > { %v6486_v44 = vpop.f32.mrb[64].mxu1  ;;  %v6599_v33 = vpop.f32.mrb[65].mxu0 }
 0x30d   : > { %6971 = vmatmul.mubr.bf16.gmra.mrb[156].mxu1 %v6242_v18  ;;  %v3265_v18 = vsel %vm7865_vm5, %v3263_v27, %v3264_v3  ;;  %v6487_v25 = vpop.f32.mrb[65].mxu1  ;;  %v6600_v23 = vadd.f32 %v6599_v33, %v6598_v31  ;;  %v6601_v62 = vpop.f32.mrb[66].mxu0  ;;  %v10082_v3 = vld [vmem:[#allocation28_spill] sm:$0xff] }
 0x30e   : > { %6974 = vmatprep.mubr.bf16.mxu1 %v6243_v15  ;;  %v3275_v15 = vrot.slane %v7345_v4, 5  ;;  %v6488_v14 = vadd.f32 %v6487_v25, %v6486_v44  ;;  %v6489_v35 = vpop.f32.mrb[66].mxu1  ;;  %v3282_v27 = vrot.slane %v10082_v3, 5  ;;  %v6602_v17 = vpop.f32.mrb[67].mxu0  ;;  %v6244_v56 = vcombine.low %v3262_v26, %v3265_v18  ;;  %v7285_v3 = vld [vmem:[#allocation9 + $0x28] sm:$0xff]  }
 0x30f   : > { %v6490_v28 = vpop.f32.mrb[67].mxu1  ;;  %v6603_v52 = vadd.f32 %v6602_v17, %v6601_v62  ;;  %7000 = vmatprep.subr.bf16.mxu0 %v7285_v3 }
 0x310   : > { %v9504_v22 = vadd.f32 %v6600_v23, %v6488_v14  ;;  %v6491_v34 = vadd.f32 %v6490_v28, %v6489_v35  ;;  %v3277_v29 = vrot.slane %v3275_v15, 4  ;;  %v3284_v19 = vrot.slane %v3282_v27, 4  ;;  %7001 = vmatpush3.bf16.msra.mxu0 %v7285_v3  ;;  %v10085_v3 = vld [vmem:[#allocation42_spill] sm:$0xff] }
 0x311   : > { %v3276_v46 = vsel %vm7865_vm5, %v6102_v9, %v3275_v15  ;;  %v3283_v26 = vsel %vm7865_vm5, %v6103_v60, %v3282_v27 }
 0x312   : > { %v9506_v38 = vadd.f32 %v6603_v52, %v6491_v34  ;;  %v3279_v55 = vsel %vm7865_vm5, %v3277_v29, %v3278_v41  ;;  %v3286_v18 = vsel %vm7865_vm5, %v3284_v19, %v3285_v57 }
 0x313   : > { %v6604_v61 = vpop.f32.mrb[68].mxu0  ;;  %v6246_v14 = vcombine.low %v3276_v46, %v3279_v55  ;;  %v6247_v35 = vcombine.low %v3283_v26, %v3286_v18 }
 0x314   : > { %v6492_v0 = vpop.f32.mrb[68].mxu1  ;;  %v6605_v42 = vpop.f32.mrb[69].mxu0 }
 0x315   : > { %6975 = vmatmul.mubr.bf16.gmra.mrb[160].mxu1 %v6244_v56  ;;  %v6606_v45 = vadd.f32 %v6605_v42, %v6604_v61  ;;  %v6493_v31 = vpop.f32.mrb[69].mxu1  ;;  %v6607_v44 = vpop.f32.mrb[70].mxu0 }
 0x316   : > { %6978 = vmatprep.mubr.bf16.mxu1 %v6245_v13  ;;  %v6494_v33 = vadd.f32 %v6493_v31, %v6492_v0  ;;  %v6495_v25 = vpop.f32.mrb[70].mxu1  ;;  %v6608_v53 = vpop.f32.mrb[71].mxu0 }
 0x317   : > { %v6609_v4 = vadd.f32 %v6608_v53, %v6607_v44  ;;  %v6496_v23 = vpop.f32.mrb[71].mxu1 }
 0x318   : > { %v9517_v62 = vadd.f32 %v6606_v45, %v6494_v33  ;;  %v6497_v15 = vadd.f32 %v6496_v23, %v6495_v25 }
 0x31a   : > { %v9519_v12 = vadd.f32 %v6609_v4, %v6497_v15 }
 0x31b   : > { %v6610_v2 = vpop.f32.mrb[72].mxu0 }
 0x31c   : > { %v6498_v27 = vpop.f32.mrb[72].mxu1  ;;  %v6611_v17 = vpop.f32.mrb[73].mxu0 }
 0x31d   : > { %6979 = vmatmul.mubr.bf16.gmra.mrb[164].mxu1 %v6246_v14  ;;  %v6612_v20 = vadd.f32 %v6611_v17, %v6610_v2  ;;  %v6499_v28 = vpop.f32.mrb[73].mxu1  ;;  %v6613_v63 = vpop.f32.mrb[74].mxu0  ;;  %v10084_v14 = vld [vmem:[#allocation41_spill] sm:$0xff]  ;;  %v7286_v2 = vld [vmem:[#allocation9 + $0x30] sm:$0xff]  }
 0x31e   : > { %6982 = vmatprep.mubr.bf16.mxu1 %v6247_v35  ;;  %v6500_v52 = vadd.f32 %v6499_v28, %v6498_v27  ;;  %v6501_v34 = vpop.f32.mrb[74].mxu1  ;;  %v6614_v56 = vpop.f32.mrb[75].mxu0  ;;  %7002 = vmatprep.subr.bf16.mxu0 %v7286_v2 }
 0x31f   : > { %v6615_v9 = vadd.f32 %v6614_v56, %v6613_v63  ;;  %v6502_v13 = vpop.f32.mrb[75].mxu1  ;;  %7003 = vmatpush3.bf16.msra.mxu0 %v7286_v2 }
 0x320   : > { %v9521_v29 = vadd.f32 %v6612_v20, %v6500_v52  ;;  %v6503_v54 = vadd.f32 %v6502_v13, %v6501_v34  ;;  %v10086_v13 = vld [vmem:[#allocation26_spill] sm:$0xff] }
 0x322   : > { %v9526_v41 = vadd.f32 %v6615_v9, %v6503_v54 }
 0x323   : > { %v6616_v60 = vpop.f32.mrb[76].mxu0 }
 0x324   : > { %v6504_v19 = vpop.f32.mrb[76].mxu1  ;;  %v6617_v43 = vpop.f32.mrb[77].mxu0 }
 0x325   : > { %6983 = vmatmul.mubr.bf16.gmra.mrb[168].mxu1 %v6248_v59  ;;  %v6618_v57 = vadd.f32 %v6617_v43, %v6616_v60  ;;  %v6505_v61 = vpop.f32.mrb[77].mxu1  ;;  %v6619_v0 = vpop.f32.mrb[78].mxu0 }
 0x326   : > { %6986 = vmatprep.mubr.bf16.mxu1 %v6249_v21  ;;  %v6506_v42 = vadd.f32 %v6505_v61, %v6504_v19  ;;  %v6507_v46 = vpop.f32.mrb[78].mxu1  ;;  %v6620_v55 = vpop.f32.mrb[79].mxu0  ;;  %v10087_v19 = vld [vmem:[#allocation44_spill] sm:$0xff] }
 0x327   : > { %v6621_v45 = vadd.f32 %v6620_v55, %v6619_v0  ;;  %v6508_v31 = vpop.f32.mrb[79].mxu1 }
 0x328   : > { %v9531_v44 = vadd.f32 %v6618_v57, %v6506_v42  ;;  %v6509_v32 = vadd.f32 %v6508_v31, %v6507_v46 }
 0x32a   : > { %v9536_v58 = vadd.f32 %v6621_v45, %v6509_v32 }
 0x32b   : > { %v6750_v47 = vpop.f32.mrb[80].mxu0 }
 0x32c   : > { %v6638_v59 = vpop.f32.mrb[80].mxu1  ;;  %v6751_v49 = vpop.f32.mrb[81].mxu0 }
 0x32d   : > { %6987 = vmatmul.mubr.bf16.gmra.mrb[172].mxu1 %v6250_v48  ;;  %v6752_v21 = vadd.f32 %v6751_v49, %v6750_v47  ;;  %v6639_v26 = vpop.f32.mrb[81].mxu1  ;;  %v6753_v18 = vpop.f32.mrb[82].mxu0  ;;  %v10088_v49 = vld [vmem:[#allocation31_spill] sm:$0xff] }
 0x32e   : > { %v6640_v33 = vadd.f32 %v6639_v26, %v6638_v59  ;;  %v6641_v25 = vpop.f32.mrb[82].mxu1  ;;  %v6754_v53 = vpop.f32.mrb[83].mxu0 }
 0x32f   : > { %v6755_v4 = vadd.f32 %v6754_v53, %v6753_v18  ;;  %v6642_v23 = vpop.f32.mrb[83].mxu1 }
 0x330   : > { %v4865_v15 = vadd.f32 %v6640_v33, %v10084_v14  ;;  %v6643_v35 = vadd.f32 %v6642_v23, %v6641_v25  ;;  %v7287_v25 = vld [vmem:[#allocation9 + $0x38] sm:$0xff]   ;;  %v10089_v14 = vld [vmem:[#allocation27_spill] sm:$0xff] }
 0x331   : > { %7004 = vmatprep.subr.bf16.mxu0 %v7287_v25 }
 0x332   : > { %v4868_v37 = vadd.f32 %v6643_v35, %v10085_v3  ;;  %7005 = vmatpush3.bf16.msra.mxu0 %v7287_v25 }
 0x333   : > { %v6756_v40 = vpop.f32.mrb[84].mxu0 }
 0x334   : > { %v6757_v27 = vpop.f32.mrb[85].mxu0 }
 0x335   : > { %v6644_v48 = vpop.f32.mrb[84].mxu1  ;;  %v6758_v17 = vadd.f32 %v6757_v27, %v6756_v40  ;;  %v6759_v28 = vpop.f32.mrb[86].mxu0 }
 0x336   : > { %v6645_v20 = vpop.f32.mrb[85].mxu1  ;;  %v6760_v34 = vpop.f32.mrb[87].mxu0 }
 0x337   : > { %v6646_v63 = vadd.f32 %v6645_v20, %v6644_v48  ;;  %v6647_v52 = vpop.f32.mrb[86].mxu1  ;;  %v6761_v56 = vadd.f32 %v6760_v34, %v6759_v28  ;;  %v10090_v34 = vld [vmem:[#allocation33_spill] sm:$0xff] }
 0x338   : > { %v6648_v9 = vpop.f32.mrb[87].mxu1 }
 0x339   : > { %v4873_v54 = vadd.f32 %v6646_v63, %v10086_v13  ;;  %v6649_v60 = vadd.f32 %v6648_v9, %v6647_v52 }
 0x33b   : > { %v4876_v43 = vadd.f32 %v6649_v60, %v10087_v19  ;;  %v6762_v57 = vpop.f32.mrb[88].mxu0  ;;  %v9543_v53 = vadd.f32 %v6758_v17, %v4873_v54  ;;  %v9547_v60 = vadd.f32 %v6752_v21, %v4865_v15  ;;  %v10091_v19 = vld [vmem:[#allocation30_spill] sm:$0xff] }
 0x33c   : > { %v6763_v61 = vpop.f32.mrb[89].mxu0 }
 0x33d   : > { %v6764_v0 = vadd.f32 %v6763_v61, %v6762_v57  ;;  %v6765_v42 = vpop.f32.mrb[90].mxu0  ;;  %v9549_v54 = vadd.f32 %v6761_v56, %v4876_v43  ;;  %v10092_v56 = vld [vmem:[#allocation18_spill] sm:$0xff] }
 0x33e   : > { %v6766_v46 = vpop.f32.mrb[91].mxu0 }
 0x33f   : > { %v6650_v55 = vpop.f32.mrb[88].mxu1  ;;  %v6767_v45 = vadd.f32 %v6766_v46, %v6765_v42 }
 0x340   : > { %v6651_v31 = vpop.f32.mrb[89].mxu1 }
 0x341   : > { %v6652_v32 = vadd.f32 %v6651_v31, %v6650_v55  ;;  %v6653_v47 = vpop.f32.mrb[90].mxu1  ;;  %v9552_v31 = vadd.f32 %v6755_v4, %v4868_v37 }
 0x342   : > { %v6654_v59 = vpop.f32.mrb[91].mxu1 }
 0x343   : > { %v4881_v26 = vadd.f32 %v6652_v32, %v10088_v49  ;;  %v6655_v18 = vadd.f32 %v6654_v59, %v6653_v47  ;;  %v6768_v33 = vpop.f32.mrb[92].mxu0 }
 0x344   : > { %v6769_v23 = vpop.f32.mrb[93].mxu0 }
 0x345   : > { %v4884_v35 = vadd.f32 %v6655_v18, %v10089_v14  ;;  %v6770_v2 = vadd.f32 %v6769_v23, %v6768_v33  ;;  %v6771_v3 = vpop.f32.mrb[94].mxu0  ;;  %v9556_v15 = vadd.f32 %v6764_v0, %v4881_v26 }
 0x346   : > { %v6772_v40 = vpop.f32.mrb[95].mxu0 }
 0x347   : > { %v6773_v48 = vadd.f32 %v6772_v40, %v6771_v3  ;;  %v9561_v14 = vadd.f32 %v6767_v45, %v4884_v35  ;;  %v10093_v3 = vld [vmem:[#allocation19_spill] sm:$0xff] }
 0x349   : > { %v6656_v27 = vpop.f32.mrb[92].mxu1 }
 0x34a   : > { %v6657_v20 = vpop.f32.mrb[93].mxu1 }
 0x34b   : > { %v6658_v28 = vadd.f32 %v6657_v20, %v6656_v27  ;;  %v6659_v63 = vpop.f32.mrb[94].mxu1 }
 0x34c   : > { %v6660_v52 = vpop.f32.mrb[95].mxu1 }
 0x34d   : > { %v4889_v9 = vadd.f32 %v6658_v28, %v10090_v34  ;;  %v6661_v13 = vadd.f32 %v6660_v52, %v6659_v63  ;;  %v6774_v17 = vpop.f32.mrb[96].mxu0 }
 0x34e   : > { %v6775_v61 = vpop.f32.mrb[97].mxu0 }
 0x34f   : > { %v4892_v57 = vadd.f32 %v6661_v13, %v10091_v19  ;;  %v6776_v42 = vadd.f32 %v6775_v61, %v6774_v17  ;;  %v6777_v46 = vpop.f32.mrb[98].mxu0  ;;  %v9554_v32 = vadd.f32 %v6770_v2, %v4889_v9 }
 0x350   : > { %v6778_v55 = vpop.f32.mrb[99].mxu0 }
 0x351   : > { %v6779_v59 = vadd.f32 %v6778_v55, %v6777_v46  ;;  %v9559_v23 = vadd.f32 %v6773_v48, %v4892_v57 }
 0x352   : > { %v6662_v47 = vpop.f32.mrb[96].mxu1 }
 0x353   : > { %v6663_v49 = vpop.f32.mrb[97].mxu1 }
 0x354   : > { %v6664_v18 = vadd.f32 %v6663_v49, %v6662_v47  ;;  %v6665_v33 = vpop.f32.mrb[98].mxu1 }
 0x355   : > { %v6666_v21 = vpop.f32.mrb[99].mxu1 }
 0x356   : > { %v4897_v43 = vadd.f32 %v6664_v18, %v10092_v56  ;;  %v6667_v25 = vadd.f32 %v6666_v21, %v6665_v33 }
 0x357   : > { %v6780_v37 = vpop.f32.mrb[100].mxu0 }
 0x358   : > { %v4900_v4 = vadd.f32 %v6667_v25, %v10093_v3  ;;  %v6781_v2 = vpop.f32.mrb[101].mxu0  ;;  %v9564_v26 = vadd.f32 %v6776_v42, %v4897_v43 }
 0x359   : > { %v6782_v40 = vadd.f32 %v6781_v2, %v6780_v37  ;;  %v6783_v27 = vpop.f32.mrb[102].mxu0 }
 0x35a   : > { %v6784_v28 = vpop.f32.mrb[103].mxu0  ;;  %v9567_v45 = vadd.f32 %v6779_v59, %v4900_v4 }
 0x35b   : > { %v6668_v20 = vpop.f32.mrb[100].mxu1  ;;  %v6785_v52 = vadd.f32 %v6784_v28, %v6783_v27 }
 0x35c   : > { %v6669_v63 = vpop.f32.mrb[101].mxu1 }
 0x35d   : > { %v6670_v34 = vadd.f32 %v6669_v63, %v6668_v20  ;;  %v6671_v0 = vpop.f32.mrb[102].mxu1 }
 0x35e   : > { %v6672_v9 = vpop.f32.mrb[103].mxu1 }
 0x35f   : > { %v4905_v48 = vadd.f32 %v6670_v34, %v9340_v11  ;;  %v6673_v13 = vadd.f32 %v6672_v9, %v6671_v0 }
 0x360   : > { %v6786_v35 = vpop.f32.mrb[104].mxu0 }
 0x361   : > { %v4908_v17 = vadd.f32 %v6673_v13, %v9342_v51  ;;  %v6787_v19 = vpop.f32.mrb[105].mxu0  ;;  %v9570_v57 = vadd.f32 %v6782_v40, %v4905_v48 }
 0x362   : > { %v6788_v61 = vadd.f32 %v6787_v19, %v6786_v35  ;;  %v6789_v46 = vpop.f32.mrb[106].mxu0 }
 0x363   : > { %v6790_v55 = vpop.f32.mrb[107].mxu0  ;;  %v9572_v47 = vadd.f32 %v6785_v52, %v4908_v17 }
 0x364   : > { %v6791_v49 = vadd.f32 %v6790_v55, %v6789_v46 }
 0x365   : > { %v6674_v42 = vpop.f32.mrb[104].mxu1 }
 0x366   : > { %v6675_v18 = vpop.f32.mrb[105].mxu1 }
 0x367   : > { %v6676_v33 = vadd.f32 %v6675_v18, %v6674_v42  ;;  %v6677_v21 = vpop.f32.mrb[106].mxu1 }
 0x368   : > { %v6678_v11 = vpop.f32.mrb[107].mxu1 }
 0x369   : > { %v4913_v59 = vadd.f32 %v6676_v33, %v9362_v10  ;;  %v6679_v56 = vadd.f32 %v6678_v11, %v6677_v21 }
 0x36a   : > { %v6792_v43 = vpop.f32.mrb[108].mxu0 }
 0x36b   : > { %v4916_v51 = vadd.f32 %v6679_v56, %v9368_v24  ;;  %v6793_v25 = vpop.f32.mrb[109].mxu0  ;;  %v9576_v3 = vadd.f32 %v6788_v61, %v4913_v59 }
 0x36c   : > { %v6794_v4 = vadd.f32 %v6793_v25, %v6792_v43  ;;  %v6795_v37 = vpop.f32.mrb[110].mxu0 }
 0x36d   : > { %v6796_v2 = vpop.f32.mrb[111].mxu0  ;;  %v9578_v40 = vadd.f32 %v6791_v49, %v4916_v51 }
 0x36e   : > { %v6680_v27 = vpop.f32.mrb[108].mxu1  ;;  %v6797_v20 = vadd.f32 %v6796_v2, %v6795_v37 }
 0x36f   : > { %v6681_v28 = vpop.f32.mrb[109].mxu1 }
 0x370   : > { %v6682_v63 = vadd.f32 %v6681_v28, %v6680_v27  ;;  %v6683_v52 = vpop.f32.mrb[110].mxu1 }
 0x371   : > { %v6684_v34 = vpop.f32.mrb[111].mxu1 }
 0x372   : > { %v4921_v10 = vadd.f32 %v6682_v63, %v9390_v8  ;;  %v6685_v0 = vadd.f32 %v6684_v34, %v6683_v52 }
 0x373   : > { %v6798_v9 = vpop.f32.mrb[112].mxu0 }
 0x374   : > { %v6799_v48 = vpop.f32.mrb[113].mxu0  ;;  %v4924_v24 = vadd.f32 %v6685_v0, %v9392_v6  ;;  %v9582_v17 = vadd.f32 %v6794_v4, %v4921_v10 }
 0x375   : > { %v6800_v13 = vadd.f32 %v6799_v48, %v6798_v9  ;;  %v6801_v35 = vpop.f32.mrb[114].mxu0 }
 0x376   : > { %v6802_v19 = vpop.f32.mrb[115].mxu0  ;;  %v9584_v46 = vadd.f32 %v6797_v20, %v4924_v24 }
 0x377   : > { %v6803_v61 = vadd.f32 %v6802_v19, %v6801_v35 }
 0x378   : > { %v6686_v55 = vpop.f32.mrb[112].mxu1 }
 0x379   : > { %v6687_v49 = vpop.f32.mrb[113].mxu1 }
 0x37a   : > { %v6688_v42 = vadd.f32 %v6687_v49, %v6686_v55  ;;  %v6689_v18 = vpop.f32.mrb[114].mxu1 }
 0x37b   : > { %v6690_v33 = vpop.f32.mrb[115].mxu1 }
 0x37c   : > { %v4929_v8 = vadd.f32 %v6688_v42, %v9410_v50  ;;  %v6691_v21 = vadd.f32 %v6690_v33, %v6689_v18 }
 0x37d   : > { %v6804_v11 = vpop.f32.mrb[116].mxu0 }
 0x37e   : > { %v4932_v59 = vadd.f32 %v6691_v21, %v9412_v36  ;;  %v6805_v6 = vpop.f32.mrb[117].mxu0  ;;  %v9588_v56 = vadd.f32 %v6800_v13, %v4929_v8 }
 0x37f   : > { %v6806_v43 = vadd.f32 %v6805_v6, %v6804_v11  ;;  %v6807_v51 = vpop.f32.mrb[118].mxu0 }
 0x380   : > { %v6808_v25 = vpop.f32.mrb[119].mxu0  ;;  %v9590_v4 = vadd.f32 %v6803_v61, %v4932_v59 }
 0x381   : > { %v6692_v37 = vpop.f32.mrb[116].mxu1  ;;  %v6809_v2 = vadd.f32 %v6808_v25, %v6807_v51 }
 0x382   : > { %v6693_v27 = vpop.f32.mrb[117].mxu1 }
 0x383   : > { %v6694_v20 = vadd.f32 %v6693_v27, %v6692_v37  ;;  %v6695_v28 = vpop.f32.mrb[118].mxu1 }
 0x384   : > { %v6696_v63 = vpop.f32.mrb[119].mxu1 }
 0x385   : > { %v4937_v50 = vadd.f32 %v6694_v20, %v9426_v30  ;;  %v6697_v52 = vadd.f32 %v6696_v63, %v6695_v28 }
 0x387   : > { %v4940_v34 = vadd.f32 %v6697_v52, %v9428_v16  ;;  %v6810_v36 = vpop.f32.mrb[120].mxu0  ;;  %v9594_v10 = vadd.f32 %v6806_v43, %v4937_v50 }
 0x388   : > { %v6811_v0 = vpop.f32.mrb[121].mxu0 }
 0x389   : > { %v6812_v9 = vadd.f32 %v6811_v0, %v6810_v36  ;;  %v6813_v48 = vpop.f32.mrb[122].mxu0  ;;  %v9596_v24 = vadd.f32 %v6809_v2, %v4940_v34 }
 0x38a   : > { %v6814_v13 = vpop.f32.mrb[123].mxu0 }
 0x38b   : > { %v6698_v35 = vpop.f32.mrb[120].mxu1  ;;  %v6815_v19 = vadd.f32 %v6814_v13, %v6813_v48 }
 0x38c   : > { %v6699_v61 = vpop.f32.mrb[121].mxu1 }
 0x38d   : > { %v6700_v55 = vadd.f32 %v6699_v61, %v6698_v35  ;;  %v6701_v49 = vpop.f32.mrb[122].mxu1 }
 0x38e   : > { %v6702_v42 = vpop.f32.mrb[123].mxu1 }
 0x38f   : > { %v4945_v30 = vadd.f32 %v6700_v55, %v9446_v7  ;;  %v6703_v18 = vadd.f32 %v6702_v42, %v6701_v49  ;;  %v6816_v33 = vpop.f32.mrb[124].mxu0 }
 0x390   : > { %v6817_v16 = vpop.f32.mrb[125].mxu0 }
 0x391   : > { %v4948_v8 = vadd.f32 %v6703_v18, %v9448_v1  ;;  %v6818_v21 = vadd.f32 %v6817_v16, %v6816_v33  ;;  %v6819_v11 = vpop.f32.mrb[126].mxu0  ;;  %v9600_v59 = vadd.f32 %v6812_v9, %v4945_v30 }
 0x392   : > { %v6820_v6 = vpop.f32.mrb[127].mxu0 }
 0x393   : > { %v6821_v43 = vadd.f32 %v6820_v6, %v6819_v11  ;;  %v9602_v51 = vadd.f32 %v6815_v19, %v4948_v8 }
 0x397   : > { %v6704_v25 = vpop.f32.mrb[124].mxu1 }
 0x398   : > { %v6705_v37 = vpop.f32.mrb[125].mxu1 }
 0x399   : > { %v6706_v2 = vadd.f32 %v6705_v37, %v6704_v25  ;;  %v6707_v27 = vpop.f32.mrb[126].mxu1 }
 0x39a   : > { %v6708_v20 = vpop.f32.mrb[127].mxu1  ;;  %v6822_v28 = vpop.f32.mrb[128].mxu0 }
 0x39b   : > { %v4953_v7 = vadd.f32 %v6706_v2, %v9466_v39  ;;  %v6709_v63 = vadd.f32 %v6708_v20, %v6707_v27  ;;  %v6823_v50 = vpop.f32.mrb[129].mxu0 }
 0x39c   : > { %v6824_v52 = vadd.f32 %v6823_v50, %v6822_v28  ;;  %v6825_v1 = vpop.f32.mrb[130].mxu0 }
 0x39d   : > { %v4956_v34 = vadd.f32 %v6709_v63, %v9474_v5  ;;  %v6826_v36 = vpop.f32.mrb[131].mxu0  ;;  %v9606_v0 = vadd.f32 %v6818_v21, %v4953_v7 }
 0x39e   : > { %v6827_v9 = vadd.f32 %v6826_v36, %v6825_v1 }
 0x39f   : > { %v9608_v48 = vadd.f32 %v6821_v43, %v4956_v34 }
 0x3a2   : > { %v6710_v13 = vpop.f32.mrb[128].mxu1 }
 0x3a3   : > { %v6711_v35 = vpop.f32.mrb[129].mxu1 }
 0x3a4   : > { %v6712_v19 = vadd.f32 %v6711_v35, %v6710_v13  ;;  %v6713_v61 = vpop.f32.mrb[130].mxu1 }
 0x3a5   : > { %v6714_v55 = vpop.f32.mrb[131].mxu1  ;;  %v6828_v42 = vpop.f32.mrb[132].mxu0 }
 0x3a6   : > { %v4961_v49 = vadd.f32 %v6712_v19, %v9504_v22  ;;  %v6715_v39 = vadd.f32 %v6714_v55, %v6713_v61  ;;  %v6829_v30 = vpop.f32.mrb[133].mxu0 }
 0x3a7   : > { %v6830_v33 = vadd.f32 %v6829_v30, %v6828_v42  ;;  %v6831_v5 = vpop.f32.mrb[134].mxu0 }
 0x3a8   : > { %v4964_v18 = vadd.f32 %v6715_v39, %v9506_v38  ;;  %v9612_v16 = vadd.f32 %v6824_v52, %v4961_v49  ;;  %v6832_v8 = vpop.f32.mrb[135].mxu0 }
 0x3a9   : > { %v6833_v21 = vadd.f32 %v6832_v8, %v6831_v5 }
 0x3aa   : > { %v9614_v11 = vadd.f32 %v6827_v9, %v4964_v18 }
 0x3ad   : > { %v6716_v6 = vpop.f32.mrb[132].mxu1 }
 0x3ae   : > { %v6717_v43 = vpop.f32.mrb[133].mxu1 }
 0x3af   : > { %v6718_v25 = vadd.f32 %v6717_v43, %v6716_v6  ;;  %v6719_v37 = vpop.f32.mrb[134].mxu1 }
 0x3b0   : > { %v6720_v2 = vpop.f32.mrb[135].mxu1  ;;  %v6834_v27 = vpop.f32.mrb[136].mxu0 }
 0x3b1   : > { %v4969_v22 = vadd.f32 %v6718_v25, %v9517_v62  ;;  %v6721_v20 = vadd.f32 %v6720_v2, %v6719_v37  ;;  %v6835_v28 = vpop.f32.mrb[137].mxu0 }
 0x3b2   : > { %v6836_v7 = vadd.f32 %v6835_v28, %v6834_v27  ;;  %v6837_v38 = vpop.f32.mrb[138].mxu0 }
 0x3b3   : > { %v4972_v63 = vadd.f32 %v6721_v20, %v9519_v12  ;;  %v6838_v50 = vpop.f32.mrb[139].mxu0  ;;  %v9618_v52 = vadd.f32 %v6830_v33, %v4969_v22  ;;  %v9635_v22 = vld [vmem:[%s9922_s6] ss:$0 sm:$0xff] }
 0x3b4   : > { %v6839_v1 = vadd.f32 %v6838_v50, %v6837_v38 }
 0x3b5   : > { %v9620_v34 = vadd.f32 %v6833_v21, %v4972_v63 }
 0x3b8   : > { %v6722_v36 = vpop.f32.mrb[136].mxu1 }
 0x3b9   : > { %v6723_v9 = vpop.f32.mrb[137].mxu1 }
 0x3ba   : > { %v6724_v13 = vadd.f32 %v6723_v9, %v6722_v36  ;;  %v6725_v35 = vpop.f32.mrb[138].mxu1 }
 0x3bb   : > { %v6726_v19 = vpop.f32.mrb[139].mxu1 }
 0x3bc   : > { %v4977_v61 = vadd.f32 %v6724_v13, %v9521_v29  ;;  %v6727_v62 = vadd.f32 %v6726_v19, %v6725_v35 }
 0x3be   : > { %v4980_v55 = vadd.f32 %v6727_v62, %v9526_v41  ;;  %v9624_v49 = vadd.f32 %v6836_v7, %v4977_v61 }
 0x3c0   : > { %v6728_v39 = vpop.f32.mrb[140].mxu1  ;;  %v9626_v12 = vadd.f32 %v6839_v1, %v4980_v55 }
 0x3c1   : > { %v6729_v42 = vpop.f32.mrb[141].mxu1  ;;  %v6840_v30 = vpop.f32.mrb[140].mxu0 }
 0x3c2   : > { %v6730_v18 = vadd.f32 %v6729_v42, %v6728_v39  ;;  %v6731_v33 = vpop.f32.mrb[142].mxu1  ;;  %v6841_v5 = vpop.f32.mrb[141].mxu0 }
 0x3c3   : > { %v6732_v8 = vpop.f32.mrb[143].mxu1  ;;  %v6842_v21 = vadd.f32 %v6841_v5, %v6840_v30  ;;  %v6843_v6 = vpop.f32.mrb[142].mxu0 }
 0x3c4   : > { %v4985_v43 = vadd.f32 %v6730_v18, %v9531_v44  ;;  %v6733_v25 = vadd.f32 %v6732_v8, %v6731_v33  ;;  %v6844_v29 = vpop.f32.mrb[143].mxu0  ;;  %v9643_v44 = vld [vmem:[%s9923_s7] ss:$0 sm:$0xff] }
 0x3c5   : > { %v6845_v37 = vadd.f32 %v6844_v29, %v6843_v6 }
 0x3c6   : > { %v4988_v41 = vadd.f32 %v6733_v25, %v9536_v58  ;;  %v9630_v2 = vadd.f32 %v6842_v21, %v4985_v43 }
 0x3c8   : > { %v6960_v27 = vpop.f32.mrb[144].mxu1  ;;  %v9637_v20 = vadd.f32 %v6845_v37, %v4988_v41 }
 0x3c9   : > { %v5195_v28 = vadd.f32 %v6960_v27, %v9543_v53  ;;  %v5186_v7 = vpop.f32.mrb[145].mxu1 }
 0x3ca   : > { %v5187_v58 = vadd.f32 %v5186_v7, %v9547_v60  ;;  %v6961_v38 = vpop.f32.mrb[146].mxu1 }
 0x3cb   : > { %v5322_v63 = vmul.f32 %v9635_v22, %v5195_v28  ;;  %v5198_v50 = vadd.f32 %v6961_v38, %v9549_v54  ;;  %v5189_v1 = vpop.f32.mrb[147].mxu1 }
 0x3cc   : > { %v5320_v36 = vmul.f32 %v9635_v22, %v5187_v58  ;;  %v5190_v9 = vadd.f32 %v5189_v1, %v9552_v31 }
 0x3cd   : > { %v5361_v53 = vadd.f32 %v9643_v44, %v5322_v63  ;;  %v5323_v13 = vmul.f32 %v9635_v22, %v5198_v50 }
 0x3ce   : > { %v5359_v35 = vadd.f32 %v9643_v44, %v5320_v36  ;;  %v5321_v19 = vmul.f32 %v9635_v22, %v5190_v9 }
 0x3cf   : > { %v5362_v60 = vadd.f32 %v9643_v44, %v5323_v13  ;;  %v5393_v55 = vmax.f32 %v5361_v53, 0.0 }
 0x3d0   : > { %v5360_v61 = vadd.f32 %v9643_v44, %v5321_v19  ;;  %v6964_v62 = vpop.f32.mrb[148].mxu1  ;;  %v5391_v30 = vmax.f32 %v5359_v35, 0.0 }
 0x3d1   : > { %v5394_v54 = vmax.f32 %v5362_v60, 0.0  ;;  %v5211_v39 = vadd.f32 %v6964_v62, %v9554_v32  ;;  %v5202_v42 = vpop.f32.mrb[149].mxu1 }
 0x3d2   : > { %v5392_v31 = vmax.f32 %v5360_v61, 0.0  ;;  %v5203_v18 = vadd.f32 %v5202_v42, %v9556_v15  ;;  %v6965_v33 = vpop.f32.mrb[150].mxu1 }
 0x3d3   : > { %v5424_v5 = vpack.c.bf16 %v5394_v54, %v5393_v55  ;;  %v5326_v8 = vmul.f32 %v9635_v22, %v5211_v39  ;;  %v5214_v21 = vadd.f32 %v6965_v33, %v9559_v23  ;;  %v5205_v6 = vpop.f32.mrb[151].mxu1 }
 0x3d4   : > { %v5324_v43 = vmul.f32 %v9635_v22, %v5203_v18  ;;  %v5206_v25 = vadd.f32 %v5205_v6, %v9561_v14  ;;  %v5423_v29 = vpack.c.bf16 %v5392_v31, %v5391_v30 }
 0x3d5   : > { %v5365_v37 = vadd.f32 %v9643_v44, %v5326_v8  ;;  %v5327_v32 = vmul.f32 %v9635_v22, %v5214_v21 }
 0x3d6   : > { %v5363_v41 = vadd.f32 %v9643_v44, %v5324_v43  ;;  %v5325_v15 = vmul.f32 %v9635_v22, %v5206_v25  ;;  %7006 = vmatprep.mubr.bf16.mxu0 %v5423_v29 }
 0x3d7   : > { %v5366_v27 = vadd.f32 %v9643_v44, %v5327_v32  ;;  %7007 = vmatmul.mubr.bf16.vlgmr.msra.gmra.mrb[144].mxu0 %v5424_v5  ;;  %v5397_v7 = vmax.f32 %v5365_v37, 0.0 }
 0x3d8   : > { %v5364_v23 = vadd.f32 %v9643_v44, %v5325_v15  ;;  %v6968_v28 = vpop.f32.mrb[152].mxu1  ;;  %v5395_v63 = vmax.f32 %v5363_v41, 0.0 }
 0x3d9   : > { %v5398_v58 = vmax.f32 %v5366_v27, 0.0  ;;  %v5227_v14 = vadd.f32 %v6968_v28, %v9570_v57  ;;  %v5218_v38 = vpop.f32.mrb[153].mxu1 }
 0x3da   : > { %v5396_v50 = vmax.f32 %v5364_v23, 0.0  ;;  %v5219_v1 = vadd.f32 %v5218_v38, %v9564_v26  ;;  %v6969_v36 = vpop.f32.mrb[154].mxu1 }
 0x3db   : > { %v5330_v9 = vmul.f32 %v9635_v22, %v5227_v14  ;;  %v5230_v53 = vadd.f32 %v6969_v36, %v9572_v47  ;;  %v5221_v13 = vpop.f32.mrb[155].mxu1  ;;  %v5426_v35 = vpack.c.bf16 %v5398_v58, %v5397_v7 }
 0x3dc   : > { %v5328_v19 = vmul.f32 %v9635_v22, %v5219_v1  ;;  %v5222_v60 = vadd.f32 %v5221_v13, %v9567_v45  ;;  %v5425_v61 = vpack.c.bf16 %v5396_v50, %v5395_v63 }
 0x3dd   : > { %v5369_v62 = vadd.f32 %v9643_v44, %v5330_v9  ;;  %v5331_v57 = vmul.f32 %v9635_v22, %v5230_v53 }
 0x3de   : > { %v5367_v55 = vadd.f32 %v9643_v44, %v5328_v19  ;;  %v5329_v26 = vmul.f32 %v9635_v22, %v5222_v60  ;;  %7010 = vmatprep.mubr.bf16.mxu0 %v5425_v61 }
 0x3df   : > { %v5370_v54 = vadd.f32 %v9643_v44, %v5331_v57  ;;  %7011 = vmatmul.mubr.bf16.gmra.mrb[148].mxu0 %v5426_v35  ;;  %v5401_v42 = vmax.f32 %v5369_v62, 0.0 }
 0x3e0   : > { %v5368_v47 = vadd.f32 %v9643_v44, %v5329_v26  ;;  %v6972_v39 = vpop.f32.mrb[156].mxu1  ;;  %v5399_v18 = vmax.f32 %v5367_v55, 0.0 }
 0x3e1   : > { %v5402_v30 = vmax.f32 %v5370_v54, 0.0  ;;  %v5243_v45 = vadd.f32 %v6972_v39, %v9582_v17  ;;  %v5234_v31 = vpop.f32.mrb[157].mxu1 }
 0x3e2   : > { %v5400_v33 = vmax.f32 %v5368_v47, 0.0  ;;  %v5235_v5 = vadd.f32 %v5234_v31, %v9576_v3  ;;  %v6973_v8 = vpop.f32.mrb[158].mxu1 }
 0x3e3   : > { %v5334_v21 = vmul.f32 %v9635_v22, %v5243_v45  ;;  %v5246_v6 = vadd.f32 %v6973_v8, %v9584_v46  ;;  %v5237_v43 = vpop.f32.mrb[159].mxu1  ;;  %v5428_v25 = vpack.c.bf16 %v5402_v30, %v5401_v42 }
 0x3e4   : > { %v5332_v29 = vmul.f32 %v9635_v22, %v5235_v5  ;;  %v5238_v37 = vadd.f32 %v5237_v43, %v9578_v40  ;;  %v5427_v32 = vpack.c.bf16 %v5400_v33, %v5399_v18 }
 0x3e5   : > { %v5373_v41 = vadd.f32 %v9643_v44, %v5334_v21  ;;  %v5335_v17 = vmul.f32 %v9635_v22, %v5246_v6 }
 0x3e6   : > { %v5371_v15 = vadd.f32 %v9643_v44, %v5332_v29  ;;  %v5333_v3 = vmul.f32 %v9635_v22, %v5238_v37  ;;  %7014 = vmatprep.mubr.bf16.mxu0 %v5427_v32 }
 0x3e7   : > { %v5374_v27 = vadd.f32 %v9643_v44, %v5335_v17  ;;  %7015 = vmatmul.mubr.bf16.gmra.mrb[152].mxu0 %v5428_v25  ;;  %v5405_v28 = vmax.f32 %v5373_v41, 0.0 }
 0x3e8   : > { %v5372_v46 = vadd.f32 %v9643_v44, %v5333_v3  ;;  %v6976_v23 = vpop.f32.mrb[160].mxu1  ;;  %v5403_v14 = vmax.f32 %v5371_v15, 0.0 }
 0x3e9   : > { %v5406_v7 = vmax.f32 %v5374_v27, 0.0  ;;  %v5259_v40 = vadd.f32 %v6976_v23, %v9594_v10  ;;  %v5250_v58 = vpop.f32.mrb[161].mxu1 }
 0x3ea   : > { %v5404_v38 = vmax.f32 %v5372_v46, 0.0  ;;  %v5251_v63 = vadd.f32 %v5250_v58, %v9588_v56  ;;  %v6977_v50 = vpop.f32.mrb[162].mxu1 }
 0x3eb   : > { %v5338_v1 = vmul.f32 %v9635_v22, %v5259_v40  ;;  %v5262_v36 = vadd.f32 %v6977_v50, %v9596_v24  ;;  %v5253_v9 = vpop.f32.mrb[163].mxu1  ;;  %v5430_v53 = vpack.c.bf16 %v5406_v7, %v5405_v28 }
 0x3ec   : > { %v5336_v13 = vmul.f32 %v9635_v22, %v5251_v63  ;;  %v5254_v35 = vadd.f32 %v5253_v9, %v9590_v4  ;;  %v5429_v19 = vpack.c.bf16 %v5404_v38, %v5403_v14 }
 0x3ed   : > { %v5377_v60 = vadd.f32 %v9643_v44, %v5338_v1  ;;  %v5339_v10 = vmul.f32 %v9635_v22, %v5262_v36 }
 0x3ee   : > { %v5375_v61 = vadd.f32 %v9643_v44, %v5336_v13  ;;  %v5337_v56 = vmul.f32 %v9635_v22, %v5254_v35  ;;  %7018 = vmatprep.mubr.bf16.mxu0 %v5429_v19 }
 0x3ef   : > { %v5378_v62 = vadd.f32 %v9643_v44, %v5339_v10  ;;  %7019 = vmatmul.mubr.bf16.gmra.mrb[156].mxu0 %v5430_v53  ;;  %v5409_v55 = vmax.f32 %v5377_v60, 0.0 }
 0x3f0   : > { %v5376_v24 = vadd.f32 %v9643_v44, %v5337_v56  ;;  %v6980_v57 = vpop.f32.mrb[164].mxu1  ;;  %v5407_v47 = vmax.f32 %v5375_v61, 0.0 }
 0x3f1   : > { %v5410_v26 = vmax.f32 %v5378_v62, 0.0  ;;  %v5275_v4 = vadd.f32 %v6980_v57, %v9606_v0  ;;  %v5266_v54 = vpop.f32.mrb[165].mxu1 }
 0x3f2   : > { %v5408_v39 = vmax.f32 %v5376_v24, 0.0  ;;  %v5267_v42 = vadd.f32 %v5266_v54, %v9600_v59  ;;  %v6981_v30 = vpop.f32.mrb[166].mxu1 }
 0x3f3   : > { %v5342_v45 = vmul.f32 %v9635_v22, %v5275_v4  ;;  %v5278_v31 = vadd.f32 %v6981_v30, %v9608_v48  ;;  %v5269_v18 = vpop.f32.mrb[167].mxu1  ;;  %v5432_v33 = vpack.c.bf16 %v5410_v26, %v5409_v55 }
 0x3f4   : > { %v5340_v5 = vmul.f32 %v9635_v22, %v5267_v42  ;;  %v5270_v8 = vadd.f32 %v5269_v18, %v9602_v51  ;;  %v5431_v21 = vpack.c.bf16 %v5408_v39, %v5407_v47  ;;  %v7347_v18 = vld [vmem:[%s7827_s12 + $0x8] sm:$0xff]  }
 0x3f5   : > { %v5381_v6 = vadd.f32 %v9643_v44, %v5342_v45  ;;  %v5343_v0 = vmul.f32 %v9635_v22, %v5278_v31 }
 0x3f6   : > { %v5379_v43 = vadd.f32 %v9643_v44, %v5340_v5  ;;  %v5341_v59 = vmul.f32 %v9635_v22, %v5270_v8  ;;  %7022 = vmatprep.mubr.bf16.mxu0 %v5431_v21  ;;  %v7348_v21 = vld [vmem:[%s7827_s12] sm:$0xff]  }
 0x3f7   : > { %v5382_v25 = vadd.f32 %v9643_v44, %v5343_v0  ;;  %7023 = vmatmul.mubr.bf16.gmra.mrb[160].mxu0 %v5432_v33  ;;  %v5413_v37 = vmax.f32 %v5381_v6, 0.0  ;;  %v5666_v33 = vunpack.c.l.bf16 %v7347_v18  ;;  %v5664_v6 = vunpack.c.l.bf16 %v7348_v21 }
 0x3f8   : > { %v5380_v48 = vadd.f32 %v9643_v44, %v5341_v59  ;;  %v6984_v29 = vpop.f32.mrb[168].mxu1  ;;  %v5411_v17 = vmax.f32 %v5379_v43, 0.0  ;;  %v5667_v59 = vunpack.c.h.bf16 %v7347_v18 }
 0x3f9   : > { %v5414_v32 = vmax.f32 %v5382_v25, 0.0  ;;  %v5291_v51 = vadd.f32 %v6984_v29, %v9618_v52  ;;  %v5282_v41 = vpop.f32.mrb[169].mxu1 }
 0x3fa   : > { %v5412_v15 = vmax.f32 %v5380_v48, 0.0  ;;  %v5283_v3 = vadd.f32 %v5282_v41, %v9612_v16  ;;  %v6985_v27 = vpop.f32.mrb[170].mxu1 }
 0x3fb   : > { %v5346_v46 = vmul.f32 %v9635_v22, %v5291_v51  ;;  %v5294_v23 = vadd.f32 %v6985_v27, %v9620_v34  ;;  %v5285_v28 = vpop.f32.mrb[171].mxu1  ;;  %v5434_v7 = vpack.c.bf16 %v5414_v32, %v5413_v37  ;;  %v5665_v37 = vunpack.c.h.bf16 %v7348_v21 }
 0x3fc   : > { %v5344_v40 = vmul.f32 %v9635_v22, %v5283_v3  ;;  %v5286_v58 = vadd.f32 %v5285_v28, %v9614_v11  ;;  %v5433_v14 = vpack.c.bf16 %v5412_v15, %v5411_v17 }
 0x3fd   : > { %v5385_v38 = vadd.f32 %v9643_v44, %v5346_v46  ;;  %v5347_v52 = vmul.f32 %v9635_v22, %v5294_v23 }
 0x3fe   : > { %v5383_v63 = vadd.f32 %v9643_v44, %v5344_v40  ;;  %v5345_v16 = vmul.f32 %v9635_v22, %v5286_v58  ;;  %7026 = vmatprep.mubr.bf16.mxu0 %v5433_v14  ;;  %v7349_v40 = vld [vmem:[%s7827_s12 + $0x18] sm:$0xff]  }
 0x3ff   : > { %v5386_v50 = vadd.f32 %v9643_v44, %v5347_v52  ;;  %7027 = vmatmul.mubr.bf16.gmra.mrb[164].mxu0 %v5434_v7  ;;  %v5417_v36 = vmax.f32 %v5385_v38, 0.0  ;;  %v5670_v58 = vunpack.c.l.bf16 %v7349_v40 }
 0x400   : > { %v5384_v34 = vadd.f32 %v9643_v44, %v5345_v16  ;;  %v6988_v1 = vpop.f32.mrb[172].mxu1  ;;  %v5415_v13 = vmax.f32 %v5383_v63, 0.0  ;;  %v7350_v63 = vld [vmem:[%s7827_s12 + $0x10] sm:$0xff]  }
 0x401   : > { %v5418_v9 = vmax.f32 %v5386_v50, 0.0  ;;  %v5307_v11 = vadd.f32 %v6988_v1, %v9630_v2  ;;  %v5298_v53 = vpop.f32.mrb[173].mxu1  ;;  %v5668_v16 = vunpack.c.l.bf16 %v7350_v63 }
 0x402   : > { %v5416_v35 = vmax.f32 %v5384_v34, 0.0  ;;  %v5299_v19 = vadd.f32 %v5298_v53, %v9624_v49  ;;  %v6989_v60 = vpop.f32.mrb[174].mxu1 }
 0x403   : > { %v5350_v10 = vmul.f32 %v9635_v22, %v5307_v11  ;;  %v5310_v61 = vadd.f32 %v6989_v60, %v9637_v20  ;;  %v5301_v56 = vpop.f32.mrb[175].mxu1  ;;  %v5436_v62 = vpack.c.bf16 %v5418_v9, %v5417_v36  ;;  %v5671_v36 = vunpack.c.h.bf16 %v7349_v40 }
 0x404   : > { %v5348_v24 = vmul.f32 %v9635_v22, %v5299_v19  ;;  %v5302_v57 = vadd.f32 %v5301_v56, %v9626_v12  ;;  %v5435_v55 = vpack.c.bf16 %v5416_v35, %v5415_v13  ;;  %v5669_v13 = vunpack.c.h.bf16 %v7350_v63 }
 0x405   : > { %v5389_v26 = vadd.f32 %v9643_v44, %v5350_v10  ;;  %v5351_v2 = vmul.f32 %v9635_v22, %v5310_v61 }
 0x406   : > { %v5387_v4 = vadd.f32 %v9643_v44, %v5348_v24  ;;  %v5349_v49 = vmul.f32 %v9635_v22, %v5302_v57  ;;  %7030 = vmatprep.mubr.bf16.mxu0 %v5435_v55  ;;  %v9743_v22 = vld [vmem:[%s9924_s8] ss:$0 sm:$0xff] }
 0x407   : > { %v5390_v54 = vadd.f32 %v9643_v44, %v5351_v2  ;;  %7031 = vmatmul.mubr.bf16.gmra.mrb[168].mxu0 %v5436_v62  ;;  %v5421_v47 = vmax.f32 %v5389_v26, 0.0  ;;  %v7351_v2 = vld [vmem:[%s7827_s12 + $0x28] sm:$0xff]  }
 0x408   : > { %v5388_v20 = vadd.f32 %v9643_v44, %v5349_v49  ;;  %v5419_v12 = vmax.f32 %v5387_v4, 0.0  ;;  %v9748_v44 = vld [vmem:[%s10094_s11] ss:$0 sm:$0xff]  ;;  %v5674_v4 = vunpack.c.l.bf16 %v7351_v2 }
 0x409   : > { %v5422_v39 = vmax.f32 %v5390_v54, 0.0 }
 0x40a   : > { %v5420_v42 = vmax.f32 %v5388_v20, 0.0 }
 0x40b   : > { %v5438_v30 = vpack.c.bf16 %v5422_v39, %v5421_v47  ;;  %v7352_v47 = vld [vmem:[%s7827_s12 + $0x20] sm:$0xff]  }
 0x40c   : > { %v5437_v45 = vpack.c.bf16 %v5420_v42, %v5419_v12  ;;  %v5672_v39 = vunpack.c.l.bf16 %v7352_v47 }
 0x40e   : > { %7034 = vmatprep.mubr.bf16.mxu0 %v5437_v45  ;;  %v5675_v45 = vunpack.c.h.bf16 %v7351_v2 }
 0x40f   : > { %7035 = vmatmul.mubr.bf16.gmra.mrb[172].mxu0 %v5438_v30 }
 0x4aa   : > { %v7008_v31 = vpop.f32.mrb[144].mxu0 }
 0x4ab   : > { %v5705_v5 = vmul.f32 %v7008_v31, %v9743_v22  ;;  %v5537_v8 = vpop.f32.mrb[145].mxu0 }
 0x4ac   : > { %v5703_v0 = vmul.f32 %v9743_v22, %v5537_v8  ;;  %v7009_v43 = vpop.f32.mrb[146].mxu0 }
 0x4ad   : > { %v5744_v25 = vadd.f32 %v9748_v44, %v5705_v5  ;;  %v5706_v48 = vmul.f32 %v7009_v43, %v9743_v22  ;;  %v5540_v29 = vpop.f32.mrb[147].mxu0  ;;  %v5673_v5 = vunpack.c.h.bf16 %v7352_v47 }
 0x4ae   : > { %v5742_v32 = vadd.f32 %v9748_v44, %v5703_v0  ;;  %v5704_v51 = vmul.f32 %v9743_v22, %v5540_v29 }
 0x4af   : > { %v5776_v41 = vadd.f32 %v5744_v25, %v5666_v33  ;;  %v5745_v17 = vadd.f32 %v9748_v44, %v5706_v48 }
 0x4b0   : > { %v5774_v15 = vadd.f32 %v5742_v32, %v5664_v6  ;;  %v5743_v3 = vadd.f32 %v9748_v44, %v5704_v51  ;;  %v7353_v51 = vld [vmem:[%s7827_s12 + $0x38] sm:$0xff]  }
 0x4b1   : > { %v5808_v27 = vmax.f32 %v5776_v41, 0.0  ;;  %v5777_v46 = vadd.f32 %v5745_v17, %v5667_v59  ;;  %v5678_v41 = vunpack.c.l.bf16 %v7353_v51  ;;  %v5679_v40 = vunpack.c.h.bf16 %v7353_v51 }
 0x4b2   : > { %v5806_v23 = vmax.f32 %v5774_v15, 0.0  ;;  %v5775_v28 = vadd.f32 %v5743_v3, %v5665_v37  ;;  %v7012_v7 = vpop.f32.mrb[148].mxu0 }
 0x4b3   : > { %5840 = vst [vmem:[%s9762_s26 + $0x10] sm:$0xff] %v5808_v27  ;;  %v5809_v14 = vmax.f32 %v5777_v46, 0.0  ;;  %v5709_v38 = vmul.f32 %v7012_v7, %v9743_v22  ;;  %v5553_v52 = vpop.f32.mrb[149].mxu0  ;;  %v7354_v27 = vld [vmem:[%s7827_s12 + $0x30] sm:$0xff]  }
 0x4b4   : > { %5838 = vst [vmem:[%s9762_s26] sm:$0xff] %v5806_v23  ;;  %v5807_v50 = vmax.f32 %v5775_v28, 0.0  ;;  %v5707_v34 = vmul.f32 %v9743_v22, %v5553_v52  ;;  %v7013_v1 = vpop.f32.mrb[150].mxu0  ;;  %v5676_v46 = vunpack.c.l.bf16 %v7354_v27  ;;  %v5677_v52 = vunpack.c.h.bf16 %v7354_v27 }
 0x4b5   : > { %5841 = vst [vmem:[%s9762_s26 + $0x18] sm:$0xff] %v5809_v14  ;;  %v5748_v9 = vadd.f32 %v9748_v44, %v5709_v38  ;;  %v5710_v11 = vmul.f32 %v7013_v1, %v9743_v22  ;;  %v5556_v53 = vpop.f32.mrb[151].mxu0 }
 0x4b6   : > { %5839 = vst [vmem:[%s9762_s26 + $0x8] sm:$0xff] %v5807_v50  ;;  %v5746_v35 = vadd.f32 %v9748_v44, %v5707_v34  ;;  %v5708_v19 = vmul.f32 %v9743_v22, %v5556_v53 }
 0x4b7   : > { %v5780_v60 = vadd.f32 %v5748_v9, %v5670_v58  ;;  %v5749_v10 = vadd.f32 %v9748_v44, %v5710_v11 }
 0x4b8   : > { %v5778_v61 = vadd.f32 %v5746_v35, %v5668_v16  ;;  %v5747_v56 = vadd.f32 %v9748_v44, %v5708_v19  ;;  %v7355_v19 = vld [vmem:[%s7827_s12 + $0x48] sm:$0xff]  }
 0x4b9   : > { %v5812_v62 = vmax.f32 %v5780_v60, 0.0  ;;  %v5781_v24 = vadd.f32 %v5749_v10, %v5671_v36  ;;  %v5682_v60 = vunpack.c.l.bf16 %v7355_v19  ;;  %v5683_v2 = vunpack.c.h.bf16 %v7355_v19 }
 0x4ba   : > { %v5810_v57 = vmax.f32 %v5778_v61, 0.0  ;;  %v5779_v55 = vadd.f32 %v5747_v56, %v5669_v13  ;;  %v7016_v26 = vpop.f32.mrb[152].mxu0 }
 0x4bb   : > { %5844 = vst [vmem:[%s9762_s26 + $0x30] sm:$0xff] %v5812_v62  ;;  %v5813_v49 = vmax.f32 %v5781_v24, 0.0  ;;  %v5713_v54 = vmul.f32 %v7016_v26, %v9743_v22  ;;  %v5569_v20 = vpop.f32.mrb[153].mxu0  ;;  %v7356_v62 = vld [vmem:[%s7827_s12 + $0x40] sm:$0xff]  }
 0x4bc   : > { %5842 = vst [vmem:[%s9762_s26 + $0x20] sm:$0xff] %v5810_v57  ;;  %v5811_v12 = vmax.f32 %v5779_v55, 0.0  ;;  %v5711_v42 = vmul.f32 %v9743_v22, %v5569_v20  ;;  %v7017_v30 = vpop.f32.mrb[154].mxu0  ;;  %v5680_v24 = vunpack.c.l.bf16 %v7356_v62  ;;  %v5681_v20 = vunpack.c.h.bf16 %v7356_v62 }
 0x4bd   : > { %5845 = vst [vmem:[%s9762_s26 + $0x38] sm:$0xff] %v5813_v49  ;;  %v5752_v31 = vadd.f32 %v9748_v44, %v5713_v54  ;;  %v5714_v18 = vmul.f32 %v7017_v30, %v9743_v22  ;;  %v5572_v33 = vpop.f32.mrb[155].mxu0 }
 0x4be   : > { %5843 = vst [vmem:[%s9762_s26 + $0x28] sm:$0xff] %v5811_v12  ;;  %v5750_v8 = vadd.f32 %v9748_v44, %v5711_v42  ;;  %v5712_v21 = vmul.f32 %v9743_v22, %v5572_v33 }
 0x4bf   : > { %v5784_v6 = vadd.f32 %v5752_v31, %v5674_v4  ;;  %v5753_v0 = vadd.f32 %v9748_v44, %v5714_v18 }
 0x4c0   : > { %v5782_v43 = vadd.f32 %v5750_v8, %v5672_v39  ;;  %v5751_v59 = vadd.f32 %v9748_v44, %v5712_v21  ;;  %v7357_v21 = vld [vmem:[%s7827_s12 + $0x58] sm:$0xff]  }
 0x4c1   : > { %v5816_v25 = vmax.f32 %v5784_v6, 0.0  ;;  %v5785_v48 = vadd.f32 %v5753_v0, %v5675_v45  ;;  %v5686_v6 = vunpack.c.l.bf16 %v7357_v21  ;;  %v5687_v51 = vunpack.c.h.bf16 %v7357_v21 }
 0x4c2   : > { %v5814_v29 = vmax.f32 %v5782_v43, 0.0  ;;  %v5783_v37 = vadd.f32 %v5751_v59, %v5673_v5  ;;  %v7020_v32 = vpop.f32.mrb[156].mxu0 }
 0x4c3   : > { %5848 = vst [vmem:[%s9762_s26 + $0x50] sm:$0xff] %v5816_v25  ;;  %v5817_v17 = vmax.f32 %v5785_v48, 0.0  ;;  %v5717_v15 = vmul.f32 %v7020_v32, %v9743_v22  ;;  %v5585_v3 = vpop.f32.mrb[157].mxu0  ;;  %v7358_v25 = vld [vmem:[%s7827_s12 + $0x50] sm:$0xff]  }
 0x4c4   : > { %5846 = vst [vmem:[%s9762_s26 + $0x40] sm:$0xff] %v5814_v29  ;;  %v5815_v23 = vmax.f32 %v5783_v37, 0.0  ;;  %v5715_v28 = vmul.f32 %v9743_v22, %v5585_v3  ;;  %v7021_v7 = vpop.f32.mrb[158].mxu0  ;;  %v5684_v48 = vunpack.c.l.bf16 %v7358_v25  ;;  %v5685_v3 = vunpack.c.h.bf16 %v7358_v25 }
 0x4c5   : > { %5849 = vst [vmem:[%s9762_s26 + $0x58] sm:$0xff] %v5817_v17  ;;  %v5756_v58 = vadd.f32 %v9748_v44, %v5717_v15  ;;  %v5718_v14 = vmul.f32 %v7021_v7, %v9743_v22  ;;  %v5588_v38 = vpop.f32.mrb[159].mxu0 }
 0x4c6   : > { %5847 = vst [vmem:[%s9762_s26 + $0x48] sm:$0xff] %v5815_v23  ;;  %v5754_v63 = vadd.f32 %v9748_v44, %v5715_v28  ;;  %v5716_v16 = vmul.f32 %v9743_v22, %v5588_v38 }
 0x4c7   : > { %v5788_v50 = vadd.f32 %v5756_v58, %v5678_v41  ;;  %v5757_v34 = vadd.f32 %v9748_v44, %v5718_v14 }
 0x4c8   : > { %v5786_v1 = vadd.f32 %v5754_v63, %v5676_v46  ;;  %v5755_v36 = vadd.f32 %v9748_v44, %v5716_v16  ;;  %v7359_v16 = vld [vmem:[%s7827_s12 + $0x68] sm:$0xff]  }
 0x4c9   : > { %v5820_v9 = vmax.f32 %v5788_v50, 0.0  ;;  %v5789_v11 = vadd.f32 %v5757_v34, %v5679_v40  ;;  %v5690_v50 = vunpack.c.l.bf16 %v7359_v16  ;;  %v5691_v19 = vunpack.c.h.bf16 %v7359_v16 }
 0x4ca   : > { %v5818_v53 = vmax.f32 %v5786_v1, 0.0  ;;  %v5787_v13 = vadd.f32 %v5755_v36, %v5677_v52  ;;  %v7024_v35 = vpop.f32.mrb[160].mxu0 }
 0x4cb   : > { %5852 = vst [vmem:[%s9762_s26 + $0x70] sm:$0xff] %v5820_v9  ;;  %v5821_v10 = vmax.f32 %v5789_v11, 0.0  ;;  %v5721_v61 = vmul.f32 %v7024_v35, %v9743_v22  ;;  %v5601_v56 = vpop.f32.mrb[161].mxu0  ;;  %v7360_v9 = vld [vmem:[%s7827_s12 + $0x60] sm:$0xff]  }
 0x4cc   : > { %5850 = vst [vmem:[%s9762_s26 + $0x60] sm:$0xff] %v5818_v53  ;;  %v5819_v57 = vmax.f32 %v5787_v13, 0.0  ;;  %v5719_v55 = vmul.f32 %v9743_v22, %v5601_v56  ;;  %v7025_v26 = vpop.f32.mrb[162].mxu0  ;;  %v5688_v11 = vunpack.c.l.bf16 %v7360_v9  ;;  %v5689_v56 = vunpack.c.h.bf16 %v7360_v9 }
 0x4cd   : > { %5853 = vst [vmem:[%s9762_s26 + $0x78] sm:$0xff] %v5821_v10  ;;  %v5760_v4 = vadd.f32 %v9748_v44, %v5721_v61  ;;  %v5722_v49 = vmul.f32 %v7025_v26, %v9743_v22  ;;  %v5604_v54 = vpop.f32.mrb[163].mxu0 }
 0x4ce   : > { %5851 = vst [vmem:[%s9762_s26 + $0x68] sm:$0xff] %v5819_v57  ;;  %v5758_v47 = vadd.f32 %v9748_v44, %v5719_v55  ;;  %v5720_v39 = vmul.f32 %v9743_v22, %v5604_v54 }
 0x4cf   : > { %v5792_v12 = vadd.f32 %v5760_v4, %v5682_v60  ;;  %v5761_v42 = vadd.f32 %v9748_v44, %v5722_v49 }
 0x4d0   : > { %v5790_v30 = vadd.f32 %v5758_v47, %v5680_v24  ;;  %v5759_v45 = vadd.f32 %v9748_v44, %v5720_v39  ;;  %v7361_v39 = vld [vmem:[%s7827_s12 + $0x78] sm:$0xff]  }
 0x4d1   : > { %v5824_v31 = vmax.f32 %v5792_v12, 0.0  ;;  %v5793_v18 = vadd.f32 %v5761_v42, %v5683_v2  ;;  %v5694_v12 = vunpack.c.l.bf16 %v7361_v39  ;;  %v5695_v21 = vunpack.c.h.bf16 %v7361_v39 }
 0x4d2   : > { %v5822_v33 = vmax.f32 %v5790_v30, 0.0  ;;  %v5791_v5 = vadd.f32 %v5759_v45, %v5681_v20  ;;  %v7028_v8 = vpop.f32.mrb[164].mxu0 }
 0x4d3   : > { %5856 = vst [vmem:[%s9762_s26 + $0x90] sm:$0xff] %v5824_v31  ;;  %v5825_v0 = vmax.f32 %v5793_v18, 0.0  ;;  %v5725_v43 = vmul.f32 %v7028_v8, %v9743_v22  ;;  %v5617_v59 = vpop.f32.mrb[165].mxu0  ;;  %v7362_v31 = vld [vmem:[%s7827_s12 + $0x70] sm:$0xff]   ;;  %s6373_s12 = sshll.u32 %s7639_s17, 12  ;;  %s5871_s17 = scalar_lea.sflag [#allocation5], %s7823_s10 }
 0x4d4   : > { %5854 = vst [vmem:[%s9762_s26 + $0x80] sm:$0xff] %v5822_v33  ;;  %v5823_v29 = vmax.f32 %v5791_v5, 0.0  ;;  %v5723_v37 = vmul.f32 %v9743_v22, %v5617_v59  ;;  %v7029_v32 = vpop.f32.mrb[166].mxu0  ;;  %v5692_v18 = vunpack.c.l.bf16 %v7362_v31  ;;  %v5693_v59 = vunpack.c.h.bf16 %v7362_v31  ;;  %s9867_s27 = scalar_lea.hbm %s10095_s28, %s6373_s12 }
 0x4d5   : > { %5857 = vst [vmem:[%s9762_s26 + $0x98] sm:$0xff] %v5825_v0  ;;  %v5764_v41 = vadd.f32 %v9748_v44, %v5725_v43  ;;  %v5726_v17 = vmul.f32 %v7029_v32, %v9743_v22  ;;  %v5620_v15 = vpop.f32.mrb[167].mxu0 }
 0x4d6   : > { %5855 = vst [vmem:[%s9762_s26 + $0x88] sm:$0xff] %v5823_v29  ;;  %v5762_v27 = vadd.f32 %v9748_v44, %v5723_v37  ;;  %v5724_v46 = vmul.f32 %v9743_v22, %v5620_v15 }
 0x4d7   : > { %v5796_v23 = vadd.f32 %v5764_v41, %v5686_v6  ;;  %v5765_v28 = vadd.f32 %v9748_v44, %v5726_v17 }
 0x4d8   : > { %v5794_v7 = vadd.f32 %v5762_v27, %v5684_v48  ;;  %v5763_v40 = vadd.f32 %v9748_v44, %v5724_v46 }
 0x4d9   : > { %v5828_v58 = vmax.f32 %v5796_v23, 0.0  ;;  %v5797_v14 = vadd.f32 %v5765_v28, %v5687_v51 }
 0x4da   : > { %v5826_v38 = vmax.f32 %v5794_v7, 0.0  ;;  %v5795_v52 = vadd.f32 %v5763_v40, %v5685_v3  ;;  %v7032_v63 = vpop.f32.mrb[168].mxu0 }
 0x4db   : > { %5860 = vst [vmem:[%s9762_s26 + $0xb0] sm:$0xff] %v5828_v58  ;;  %v5829_v34 = vmax.f32 %v5797_v14, 0.0  ;;  %v5729_v1 = vmul.f32 %v7032_v63, %v9743_v22  ;;  %v5633_v36 = vpop.f32.mrb[169].mxu0 }
 0x4dc   : > { %5858 = vst [vmem:[%s9762_s26 + $0xa0] sm:$0xff] %v5826_v38  ;;  %v5827_v53 = vmax.f32 %v5795_v52, 0.0  ;;  %v5727_v13 = vmul.f32 %v9743_v22, %v5633_v36  ;;  %v7033_v35 = vpop.f32.mrb[170].mxu0 }
 0x4dd   : > { %5861 = vst [vmem:[%s9762_s26 + $0xb8] sm:$0xff] %v5829_v34  ;;  %v5768_v60 = vadd.f32 %v9748_v44, %v5729_v1  ;;  %v5730_v10 = vmul.f32 %v7033_v35, %v9743_v22  ;;  %v5636_v61 = vpop.f32.mrb[171].mxu0 }
 0x4de   : > { %5859 = vst [vmem:[%s9762_s26 + $0xa8] sm:$0xff] %v5827_v53  ;;  %v5766_v62 = vadd.f32 %v9748_v44, %v5727_v13  ;;  %v5728_v24 = vmul.f32 %v9743_v22, %v5636_v61 }
 0x4df   : > { %v5800_v57 = vadd.f32 %v5768_v60, %v5690_v50  ;;  %v5769_v55 = vadd.f32 %v9748_v44, %v5730_v10 }
 0x4e0   : > { %v5798_v26 = vadd.f32 %v5766_v62, %v5688_v11  ;;  %v5767_v2 = vadd.f32 %v9748_v44, %v5728_v24 }
 0x4e1   : > { %v5832_v4 = vmax.f32 %v5800_v57, 0.0  ;;  %v5801_v49 = vadd.f32 %v5769_v55, %v5691_v19 }
 0x4e2   : > { %v5830_v54 = vmax.f32 %v5798_v26, 0.0  ;;  %v5799_v20 = vadd.f32 %v5767_v2, %v5689_v56  ;;  %v7036_v47 = vpop.f32.mrb[172].mxu0 }
 0x4e3   : > { %5864 = vst [vmem:[%s9762_s26 + $0xd0] sm:$0xff] %v5832_v4  ;;  %v5833_v42 = vmax.f32 %v5801_v49, 0.0  ;;  %v5733_v30 = vmul.f32 %v7036_v47, %v9743_v22  ;;  %v5649_v45 = vpop.f32.mrb[173].mxu0 }
 0x4e4   : > { %5862 = vst [vmem:[%s9762_s26 + $0xc0] sm:$0xff] %v5830_v54  ;;  %v5831_v33 = vmax.f32 %v5799_v20, 0.0  ;;  %v5731_v5 = vmul.f32 %v9743_v22, %v5649_v45  ;;  %v7037_v8 = vpop.f32.mrb[174].mxu0 }
 0x4e5   : > { %5865 = vst [vmem:[%s9762_s26 + $0xd8] sm:$0xff] %v5833_v42  ;;  %v5772_v6 = vadd.f32 %v9748_v44, %v5733_v30  ;;  %v5734_v0 = vmul.f32 %v7037_v8, %v9743_v22  ;;  %v5652_v43 = vpop.f32.mrb[175].mxu0 }
 0x4e6   : > { %5863 = vst [vmem:[%s9762_s26 + $0xc8] sm:$0xff] %v5831_v33  ;;  %v5770_v25 = vadd.f32 %v9748_v44, %v5731_v5  ;;  %v5732_v48 = vmul.f32 %v9743_v22, %v5652_v43 }
 0x4e7   : > { %v5804_v29 = vadd.f32 %v5772_v6, %v5694_v12  ;;  %v5773_v37 = vadd.f32 %v9748_v44, %v5734_v0 }
 0x4e8   : > { %v5802_v32 = vadd.f32 %v5770_v25, %v5692_v18  ;;  %v5771_v51 = vadd.f32 %v9748_v44, %v5732_v48 }
 0x4e9   : > { %v5836_v41 = vmax.f32 %v5804_v29, 0.0  ;;  %v5805_v17 = vadd.f32 %v5773_v37, %v5695_v21 }
 0x4ea   : > { %v5834_v15 = vmax.f32 %v5802_v32, 0.0  ;;  %v5803_v3 = vadd.f32 %v5771_v51, %v5693_v59 }
 0x4eb   : > { %5868 = vst [vmem:[%s9762_s26 + $0xf0] sm:$0xff] %v5836_v41  ;;  %v5837_v27 = vmax.f32 %v5805_v17, 0.0 }
 0x4ec   : > { %5866 = vst [vmem:[%s9762_s26 + $0xe0] sm:$0xff] %v5834_v15  ;;  %v5835_v22 = vmax.f32 %v5803_v3, 0.0 }
 0x4ed   : > { %5869 = vst [vmem:[%s9762_s26 + $0xf8] sm:$0xff] %v5837_v27 }
 0x4ee   : > { %5867 = vst [vmem:[%s9762_s26 + $0xe8] sm:$0xff] %v5835_v22 }
 0x4ef   : > { %7490 = shalt.err (!%p7487_p4)
}
 0x4f0   : > { %s7491_s30 = scalar_lea.hbm %s9867_s27, 4096  ;;  %s7495_s26 = scalar_lea.hbm %s10095_s28, 8192 }
 0x4f1   : > { %p7492_p9 = scmp.ne.s32.totalorder %s9867_s27, %s7491_s30  ;;  %p7496_p8 = scmp.lt.u32.totalorder %s9867_s27, %s10095_s28 }
 0x4f2   : > { %p7497_p13 = scmp.lt.u32.totalorder %s7495_s26, %s7491_s30  ;;  %p7499_p10 = scmp.lt.u32.totalorder %s7491_s30, %s9867_s27 }
 0x4f3   : > { %p7493_p0 = pnand %p7492_p9, %p7772_p5 }
 0x4f4   : > { %p7498_p6 = por %p7497_p13, %p7496_p8 }
 0x4f5   : > { %p7494_p11 = pneg %p7493_p0 }
 0x4f6   : > { %p7500_p3 = por %p7499_p10, %p7498_p6 }
 0x4f8   : > { %p7501_p7 = pnand %p7500_p3, %p7494_p11 }
 0x4fa   : > { %7504 = shalt.err (!%p7501_p7)
}
 0x4fb   : > { %s7561_s18 = smov 128   ;;  %s7562_s25 = smov 8  }
 0x4fc   : > { %7068 = dma.vmem_to_hbm [thread:$0]  (%p7772_p5), %s9869_s9, 4096, %s9867_s27, %s5871_s17, %s7561_s18, %s7561_s18, %s7562_s25  }
 0x4fd PF: > { %s10096_s23 = sld [smem:[#allocation16_spill]]  ;;  %s10097_s19 = sld [smem:[#allocation17_spill]] }
 0x4fe   : > { %p10099_p1 = scmp.ge.s32.totalorder %s7551_s16, 2 }
 0x503   : > { %s5899_s21 = sand.u32 1, %s10096_s23   ;;  %p10098_p12 = scmp.ne.s32.totalorder %s10097_s19, 0 }
 0x504   : > { %s5900_s30 = scalar_lea.sflag [#allocation5], %s5899_s21 }
 0x505   : > { %p7085_p2 = pnand %p10099_p1, %p10098_p12 }
 0x507   : > { %7534 = dma.done.wait (!%p7085_p2), %s5900_s30, 4096  }
 0x508   : > { %7536 = vsyncadd (!%p7085_p2), %s5900_s30, 4294963200  ;;  %s10100_s11 = smov %s7768_s13  ;;  %p25_p4 = scmp.ge.s32.totalorder %s7758_s22, 4  }
 0x509   : > { %s10101_s13 = smov %s7543_s14  ;;  %s10102_s14 = smov %s7547_s15 }
 0x50a   : > { %s10103_s15 = smov %s10100_s11  ;;  %s10104_s16 = smov %s7758_s22 }
 0x50b   :  { %27 = sbr.rel (!%p25_p4) target bundleno = 10 (0xa), region = 119 }
 0x512   :  { %5905 = vsyncpa [#allocation4], 1 }
 0x513   :  { %5907 = vsyncpa [#allocation4 + $0x1], 1 }
 0x514   :  { %5908 = vsyncpa [#allocation7], 1 }
 0x515   :  { %5909 = vsyncpa [#allocation10], 1 }
 0x516   :  { %5910 = vsyncpa [#allocation5], 1 }
 0x517   :  { %5912 = vsyncpa [#allocation5 + $0x1], 1 }

</bundles_post_ra>
